<compile_context>
chip_gen: v7x
topology: tpu7x:2x2x1
jax: 0.10.0
libtpu: 0.0.40
codegen_flags: <defaults>
</compile_context>

<pallas_src>
import functools

import jax
import jax.numpy as jnp
from jax.experimental import pallas as pl
from jax.experimental.pallas import tpu as pltpu


def _bf16_exp_default():
    """Use bf16 exp only on TPU generations with a bf16 EUP path (v6e/v7x)."""
    try:
        kind = jax.devices()[0].device_kind.lower()
    except Exception:
        return False
    if "v6" in kind or "v7" in kind:
        return True
    return False


def _emd_kernel(p1_ref, p2_ref, cost_ref, *, n, m, bf16_exp):
    x1 = p1_ref[0]    # (N, 3)  points on sublanes, xyz on lanes
    x2t = p2_ref[0]   # (3, M)  xyz on sublanes, points on lanes

    # Pairwise squared distances, coordinate by coordinate (matches the CUDA
    # reference arithmetic: (x1-x2)^2 + (y1-y2)^2 + (z1-z2)^2).
    d2 = None
    for c in range(3):
        diff = x1[:, c:c + 1] - x2t[c:c + 1, :]        # (N, 1) - (1, M) -> (N, M)
        sq = diff * diff
        d2 = sq if d2 is None else d2 + sq

    # True division (see header note); == 1.0 when N == M.
    factorl = float(max(n, m)) / float(n)
    factorr = float(max(n, m)) / float(m)
    saturatedl = jnp.full((n, 1), factorl, jnp.float32)   # remaining mass per row
    saturatedr = jnp.full((1, m), factorr, jnp.float32)   # remaining mass per col
    match = jnp.zeros((n, m), jnp.float32)

    # approxmatch: 11 annealing rounds, j = 8, 7, ..., -1, -2.
    for j in range(8, -3, -1):
        level = 0.0 if j == -2 else -(4.0 ** j)

        # --- weight = exp(level * d2) * saturatedr (single live (N, M) value) ---
        if level == 0.0:
            # exp(0) == 1: no transcendental pass on the last round.
            w = jnp.broadcast_to(saturatedr, (n, m))
        else:
            arg = level * d2
            if bf16_exp:
                e = jnp.exp(arg.astype(jnp.bfloat16)).astype(jnp.float32)
            else:
                e = jnp.exp(arg)
            w = e * saturatedr

        # --- row normalization: one (N, 1) reciprocal + one (N, M) multiply ---
        rowsum = jnp.sum(w, axis=1, keepdims=True) + 1e-9          # (N, 1)
        rowfac = saturatedl * pl.reciprocal(rowsum, approx=True)   # (N, 1)
        w = w * rowfac

        # --- column cap ---
        colsum = jnp.sum(w, axis=0, keepdims=True)                 # (1, M)
        r = jnp.minimum(saturatedr / (colsum + 1e-9), 1.0)         # (1, M)
        w = w * r

        # --- remaining-mass updates ---
        # sum_i (w * r)[i, j] == colsum[j] * r[j]  (saves a full axis-0 reduce)
        saturatedl = jnp.maximum(
            saturatedl - jnp.sum(w, axis=1, keepdims=True), 0.0)
        saturatedr = jnp.maximum(saturatedr - colsum * r, 0.0)

        match = match + w

    # matchcost: sum_ij sqrt(d2_ij) * match_ij  -> scalar per batch element.
    cost = jnp.sum(jnp.sqrt(jnp.maximum(d2, 0.0)) * match)
    cost_ref[...] = jnp.reshape(cost, (1, 1, 1))


def earth_mover_distance(p1, p2, *, bf16_exp=None):
    """p1: (B, 3, N), p2: (B, 3, M) float point clouds (BCN, like the torch module).

    Returns cost: (B,) float32 approximate EMD per batch element.
    """
    assert p1.ndim == 3 and p2.ndim == 3, "expected (B, 3, N) point clouds"
    B, C1, N = p1.shape
    B2, C2, M = p2.shape
    assert C1 == 3 and C2 == 3 and B == B2

    if bf16_exp is None:
        bf16_exp = _bf16_exp_default()

    p1_bnc = jnp.transpose(p1, (0, 2, 1)).astype(jnp.float32)   # (B, N, 3)
    p2_bcm = p2.astype(jnp.float32)                             # (B, 3, M)

    # VMEM budget: d2 + match + live weight (+ compiler temporaries) plus the
    # (lane-padded) input buffers. Default scoped limits (16/32 MiB) are too
    # small for large point clouds, so size it explicitly (cap at 128 MiB).
    nm_bytes = N * M * 4
    vmem_bytes = int(min(max(8 * nm_bytes + (N + M) * 2048 + (4 << 20),
                             32 << 20),
                         128 << 20))
    # TODO(synk): for very large point clouds (N=M >~ 2000, esp. v7x's 64 MiB
    # VMEM), add an M-tiled inner pipeline (two passes per round) instead of
    # keeping the whole (N, M) problem resident.

    cost_estimate = pl.CostEstimate(
        flops=int(B * (9 * N * M + 11 * 9 * N * M + 2 * N * M)),
        transcendentals=int(B * 11 * N * M),
        bytes_accessed=int(B * 3 * (N + M) * 4 + B * 4),
    )

    kernel = functools.partial(_emd_kernel, n=N, m=M, bf16_exp=bool(bf16_exp))
    cost = pl.pallas_call(
        kernel,
        out_shape=jax.ShapeDtypeStruct((B, 1, 1), jnp.float32),
        grid_spec=pltpu.PrefetchScalarGridSpec(
            num_scalar_prefetch=0,
            grid=(B,),
            in_specs=[
                pl.BlockSpec((1, N, 3), lambda b: (b, 0, 0)),
                pl.BlockSpec((1, 3, M), lambda b: (b, 0, 0)),
            ],
            out_specs=pl.BlockSpec((1, 1, 1), lambda b: (b, 0, 0)),
        ),
        compiler_params=pltpu.CompilerParams(
            dimension_semantics=("parallel",),
            vmem_limit_bytes=vmem_bytes),
        cost_estimate=cost_estimate,
    )(p1_bnc, p2_bcm)
    return cost[:, 0, 0]


class EarthMoverDistance:
    """JAX/Pallas equivalent of the PyTorch EarthMoverDistance module (no params)."""

    def __call__(self, p1, p2):
        return earth_mover_distance(p1, p2)
    # TODO(synk): forward pass only (no custom VJP matching the reference
    # approxmatch gradient of the original CUDA autograd Function).


if __name__ == "__main__":
    key = jax.random.PRNGKey(0)
    k1, k2 = jax.random.split(key)
    B, N, M = 2, 128, 128
    # BCN layout, matching the torch module's default (transpose=True) convention.
    p1 = jax.random.uniform(k1, (B, 3, N), dtype=jnp.float32)
    p2 = jax.random.uniform(k2, (B, 3, M), dtype=jnp.float32)

    emd = EarthMoverDistance()
    cost = jax.block_until_ready(emd(p1, p2))

    assert cost.shape == (B,), cost.shape
    assert cost.dtype == jnp.float32
    assert bool(jnp.all(jnp.isfinite(cost)))
    assert bool(jnp.all(cost >= 0.0))
    print("KERNEL_OK")
</pallas_src>

<mosaic_0001>
module attributes {stable_mosaic.version = 11 : i64} {
  func.func @_emd_kernel(%arg0: i32, %arg1: memref<1x128x3xf32, #tpu.memory_space<vmem>>, %arg2: memref<1x3x128xf32, #tpu.memory_space<vmem>>, %arg3: memref<1x1x1xf32, #tpu.memory_space<vmem>>) attributes {dimension_semantics = [#tpu.dimension_semantics<parallel>], iteration_bounds = array<i64: 2>, scalar_prefetch = 0 : i64, scratch_operands = 0 : i64, tpu.core_type = #tpu.core_type<tc>, window_params = [{transform_indices = @transform_0, window_bounds = array<i64: 1, 128, 3>}, {transform_indices = @transform_1, window_bounds = array<i64: 1, 3, 128>}, {transform_indices = @transform_2, window_bounds = array<i64: 1, 1, 1>}]} {
    %c0 = arith.constant 0 : index
    %c0_0 = arith.constant 0 : index
    %c0_1 = arith.constant 0 : index
    %0 = vector.load %arg1[%c0, %c0_0, %c0_1] : memref<1x128x3xf32, #tpu.memory_space<vmem>>, vector<1x128x3xf32>
    %1 = vector.shape_cast %0 : vector<1x128x3xf32> to vector<128x3xf32>
    %c0_2 = arith.constant 0 : index
    %c0_3 = arith.constant 0 : index
    %c0_4 = arith.constant 0 : index
    %2 = vector.load %arg2[%c0_2, %c0_3, %c0_4] : memref<1x3x128xf32, #tpu.memory_space<vmem>>, vector<1x3x128xf32>
    %3 = vector.shape_cast %2 : vector<1x3x128xf32> to vector<3x128xf32>
    %4 = vector.extract_strided_slice %1 {offsets = [0, 0], sizes = [128, 1], strides = [1, 1]} : vector<128x3xf32> to vector<128x1xf32>
    %5 = vector.extract_strided_slice %3 {offsets = [0, 0], sizes = [1, 128], strides = [1, 1]} : vector<3x128xf32> to vector<1x128xf32>
    %6 = vector.broadcast %4 : vector<128x1xf32> to vector<128x128xf32>
    %7 = vector.broadcast %5 : vector<1x128xf32> to vector<128x128xf32>
    %8 = arith.subf %6, %7 : vector<128x128xf32>
    %9 = arith.mulf %8, %8 : vector<128x128xf32>
    %10 = vector.extract_strided_slice %1 {offsets = [0, 1], sizes = [128, 1], strides = [1, 1]} : vector<128x3xf32> to vector<128x1xf32>
    %11 = vector.extract_strided_slice %3 {offsets = [1, 0], sizes = [1, 128], strides = [1, 1]} : vector<3x128xf32> to vector<1x128xf32>
    %12 = vector.broadcast %10 : vector<128x1xf32> to vector<128x128xf32>
    %13 = vector.broadcast %11 : vector<1x128xf32> to vector<128x128xf32>
    %14 = arith.subf %12, %13 : vector<128x128xf32>
    %15 = arith.mulf %14, %14 : vector<128x128xf32>
    %16 = arith.addf %9, %15 : vector<128x128xf32>
    %17 = vector.extract_strided_slice %1 {offsets = [0, 2], sizes = [128, 1], strides = [1, 1]} : vector<128x3xf32> to vector<128x1xf32>
    %18 = vector.extract_strided_slice %3 {offsets = [2, 0], sizes = [1, 128], strides = [1, 1]} : vector<3x128xf32> to vector<1x128xf32>
    %19 = vector.broadcast %17 : vector<128x1xf32> to vector<128x128xf32>
    %20 = vector.broadcast %18 : vector<1x128xf32> to vector<128x128xf32>
    %21 = arith.subf %19, %20 : vector<128x128xf32>
    %22 = arith.mulf %21, %21 : vector<128x128xf32>
    %23 = arith.addf %16, %22 : vector<128x128xf32>
    %cst = arith.constant 1.000000e+00 : f32
    %24 = vector.broadcast %cst : f32 to vector<128x1xf32>
    %cst_5 = arith.constant 1.000000e+00 : f32
    %25 = vector.broadcast %cst_5 : f32 to vector<1x128xf32>
    %cst_6 = arith.constant 0.000000e+00 : f32
    %26 = vector.broadcast %cst_6 : f32 to vector<128x128xf32>
    %cst_7 = arith.constant -6.553600e+04 : f32
    %27 = vector.broadcast %cst_7 : f32 to vector<128x128xf32>
    %28 = arith.mulf %27, %23 : vector<128x128xf32>
    %29 = math.exp %28 : vector<128x128xf32>
    %30 = vector.broadcast %25 : vector<1x128xf32> to vector<128x128xf32>
    %31 = arith.mulf %29, %30 : vector<128x128xf32>
    %cst_8 = arith.constant dense<0.000000e+00> : vector<128xf32>
    %32 = vector.multi_reduction <add>, %31, %cst_8 [1] : vector<128x128xf32> to vector<128xf32>
    %33 = vector.shape_cast %32 : vector<128xf32> to vector<128x1xf32>
    %cst_9 = arith.constant 9.99999971E-10 : f32
    %34 = vector.broadcast %cst_9 : f32 to vector<128x1xf32>
    %35 = arith.addf %33, %34 : vector<128x1xf32>
    %36 = tpu.reciprocal %35 {approx = true} : vector<128x1xf32> -> vector<128x1xf32>
    %37 = arith.mulf %24, %36 : vector<128x1xf32>
    %38 = vector.broadcast %37 : vector<128x1xf32> to vector<128x128xf32>
    %39 = arith.mulf %31, %38 : vector<128x128xf32>
    %cst_10 = arith.constant dense<0.000000e+00> : vector<128xf32>
    %40 = vector.multi_reduction <add>, %39, %cst_10 [0] : vector<128x128xf32> to vector<128xf32>
    %41 = vector.shape_cast %40 : vector<128xf32> to vector<1x128xf32>
    %cst_11 = arith.constant 9.99999971E-10 : f32
    %42 = vector.broadcast %cst_11 : f32 to vector<1x128xf32>
    %43 = arith.addf %41, %42 : vector<1x128xf32>
    %44 = arith.divf %25, %43 : vector<1x128xf32>
    %cst_12 = arith.constant 1.000000e+00 : f32
    %45 = vector.broadcast %cst_12 : f32 to vector<1x128xf32>
    %46 = arith.minimumf %44, %45 : vector<1x128xf32>
    %47 = vector.broadcast %46 : vector<1x128xf32> to vector<128x128xf32>
    %48 = arith.mulf %39, %47 : vector<128x128xf32>
    %cst_13 = arith.constant dense<0.000000e+00> : vector<128xf32>
    %49 = vector.multi_reduction <add>, %48, %cst_13 [1] : vector<128x128xf32> to vector<128xf32>
    %50 = vector.shape_cast %49 : vector<128xf32> to vector<128x1xf32>
    %51 = arith.subf %24, %50 : vector<128x1xf32>
    %cst_14 = arith.constant 0.000000e+00 : f32
    %52 = vector.broadcast %cst_14 : f32 to vector<128x1xf32>
    %53 = arith.maximumf %51, %52 : vector<128x1xf32>
    %54 = arith.mulf %41, %46 : vector<1x128xf32>
    %55 = arith.subf %25, %54 : vector<1x128xf32>
    %cst_15 = arith.constant 0.000000e+00 : f32
    %56 = vector.broadcast %cst_15 : f32 to vector<1x128xf32>
    %57 = arith.maximumf %55, %56 : vector<1x128xf32>
    %58 = arith.addf %26, %48 : vector<128x128xf32>
    %cst_16 = arith.constant -1.638400e+04 : f32
    %59 = vector.broadcast %cst_16 : f32 to vector<128x128xf32>
    %60 = arith.mulf %59, %23 : vector<128x128xf32>
    %61 = math.exp %60 : vector<128x128xf32>
    %62 = vector.broadcast %57 : vector<1x128xf32> to vector<128x128xf32>
    %63 = arith.mulf %61, %62 : vector<128x128xf32>
    %cst_17 = arith.constant dense<0.000000e+00> : vector<128xf32>
    %64 = vector.multi_reduction <add>, %63, %cst_17 [1] : vector<128x128xf32> to vector<128xf32>
    %65 = vector.shape_cast %64 : vector<128xf32> to vector<128x1xf32>
    %cst_18 = arith.constant 9.99999971E-10 : f32
    %66 = vector.broadcast %cst_18 : f32 to vector<128x1xf32>
    %67 = arith.addf %65, %66 : vector<128x1xf32>
    %68 = tpu.reciprocal %67 {approx = true} : vector<128x1xf32> -> vector<128x1xf32>
    %69 = arith.mulf %53, %68 : vector<128x1xf32>
    %70 = vector.broadcast %69 : vector<128x1xf32> to vector<128x128xf32>
    %71 = arith.mulf %63, %70 : vector<128x128xf32>
    %cst_19 = arith.constant dense<0.000000e+00> : vector<128xf32>
    %72 = vector.multi_reduction <add>, %71, %cst_19 [0] : vector<128x128xf32> to vector<128xf32>
    %73 = vector.shape_cast %72 : vector<128xf32> to vector<1x128xf32>
    %cst_20 = arith.constant 9.99999971E-10 : f32
    %74 = vector.broadcast %cst_20 : f32 to vector<1x128xf32>
    %75 = arith.addf %73, %74 : vector<1x128xf32>
    %76 = arith.divf %57, %75 : vector<1x128xf32>
    %cst_21 = arith.constant 1.000000e+00 : f32
    %77 = vector.broadcast %cst_21 : f32 to vector<1x128xf32>
    %78 = arith.minimumf %76, %77 : vector<1x128xf32>
    %79 = vector.broadcast %78 : vector<1x128xf32> to vector<128x128xf32>
    %80 = arith.mulf %71, %79 : vector<128x128xf32>
    %cst_22 = arith.constant dense<0.000000e+00> : vector<128xf32>
    %81 = vector.multi_reduction <add>, %80, %cst_22 [1] : vector<128x128xf32> to vector<128xf32>
    %82 = vector.shape_cast %81 : vector<128xf32> to vector<128x1xf32>
    %83 = arith.subf %53, %82 : vector<128x1xf32>
    %cst_23 = arith.constant 0.000000e+00 : f32
    %84 = vector.broadcast %cst_23 : f32 to vector<128x1xf32>
    %85 = arith.maximumf %83, %84 : vector<128x1xf32>
    %86 = arith.mulf %73, %78 : vector<1x128xf32>
    %87 = arith.subf %57, %86 : vector<1x128xf32>
    %cst_24 = arith.constant 0.000000e+00 : f32
    %88 = vector.broadcast %cst_24 : f32 to vector<1x128xf32>
    %89 = arith.maximumf %87, %88 : vector<1x128xf32>
    %90 = arith.addf %58, %80 : vector<128x128xf32>
    %cst_25 = arith.constant -4.096000e+03 : f32
    %91 = vector.broadcast %cst_25 : f32 to vector<128x128xf32>
    %92 = arith.mulf %91, %23 : vector<128x128xf32>
    %93 = math.exp %92 : vector<128x128xf32>
    %94 = vector.broadcast %89 : vector<1x128xf32> to vector<128x128xf32>
    %95 = arith.mulf %93, %94 : vector<128x128xf32>
    %cst_26 = arith.constant dense<0.000000e+00> : vector<128xf32>
    %96 = vector.multi_reduction <add>, %95, %cst_26 [1] : vector<128x128xf32> to vector<128xf32>
    %97 = vector.shape_cast %96 : vector<128xf32> to vector<128x1xf32>
    %cst_27 = arith.constant 9.99999971E-10 : f32
    %98 = vector.broadcast %cst_27 : f32 to vector<128x1xf32>
    %99 = arith.addf %97, %98 : vector<128x1xf32>
    %100 = tpu.reciprocal %99 {approx = true} : vector<128x1xf32> -> vector<128x1xf32>
    %101 = arith.mulf %85, %100 : vector<128x1xf32>
    %102 = vector.broadcast %101 : vector<128x1xf32> to vector<128x128xf32>
    %103 = arith.mulf %95, %102 : vector<128x128xf32>
    %cst_28 = arith.constant dense<0.000000e+00> : vector<128xf32>
    %104 = vector.multi_reduction <add>, %103, %cst_28 [0] : vector<128x128xf32> to vector<128xf32>
    %105 = vector.shape_cast %104 : vector<128xf32> to vector<1x128xf32>
    %cst_29 = arith.constant 9.99999971E-10 : f32
    %106 = vector.broadcast %cst_29 : f32 to vector<1x128xf32>
    %107 = arith.addf %105, %106 : vector<1x128xf32>
    %108 = arith.divf %89, %107 : vector<1x128xf32>
    %cst_30 = arith.constant 1.000000e+00 : f32
    %109 = vector.broadcast %cst_30 : f32 to vector<1x128xf32>
    %110 = arith.minimumf %108, %109 : vector<1x128xf32>
    %111 = vector.broadcast %110 : vector<1x128xf32> to vector<128x128xf32>
    %112 = arith.mulf %103, %111 : vector<128x128xf32>
    %cst_31 = arith.constant dense<0.000000e+00> : vector<128xf32>
    %113 = vector.multi_reduction <add>, %112, %cst_31 [1] : vector<128x128xf32> to vector<128xf32>
    %114 = vector.shape_cast %113 : vector<128xf32> to vector<128x1xf32>
    %115 = arith.subf %85, %114 : vector<128x1xf32>
    %cst_32 = arith.constant 0.000000e+00 : f32
    %116 = vector.broadcast %cst_32 : f32 to vector<128x1xf32>
    %117 = arith.maximumf %115, %116 : vector<128x1xf32>
    %118 = arith.mulf %105, %110 : vector<1x128xf32>
    %119 = arith.subf %89, %118 : vector<1x128xf32>
    %cst_33 = arith.constant 0.000000e+00 : f32
    %120 = vector.broadcast %cst_33 : f32 to vector<1x128xf32>
    %121 = arith.maximumf %119, %120 : vector<1x128xf32>
    %122 = arith.addf %90, %112 : vector<128x128xf32>
    %cst_34 = arith.constant -1.024000e+03 : f32
    %123 = vector.broadcast %cst_34 : f32 to vector<128x128xf32>
    %124 = arith.mulf %123, %23 : vector<128x128xf32>
    %125 = math.exp %124 : vector<128x128xf32>
    %126 = vector.broadcast %121 : vector<1x128xf32> to vector<128x128xf32>
    %127 = arith.mulf %125, %126 : vector<128x128xf32>
    %cst_35 = arith.constant dense<0.000000e+00> : vector<128xf32>
    %128 = vector.multi_reduction <add>, %127, %cst_35 [1] : vector<128x128xf32> to vector<128xf32>
    %129 = vector.shape_cast %128 : vector<128xf32> to vector<128x1xf32>
    %cst_36 = arith.constant 9.99999971E-10 : f32
    %130 = vector.broadcast %cst_36 : f32 to vector<128x1xf32>
    %131 = arith.addf %129, %130 : vector<128x1xf32>
    %132 = tpu.reciprocal %131 {approx = true} : vector<128x1xf32> -> vector<128x1xf32>
    %133 = arith.mulf %117, %132 : vector<128x1xf32>
    %134 = vector.broadcast %133 : vector<128x1xf32> to vector<128x128xf32>
    %135 = arith.mulf %127, %134 : vector<128x128xf32>
    %cst_37 = arith.constant dense<0.000000e+00> : vector<128xf32>
    %136 = vector.multi_reduction <add>, %135, %cst_37 [0] : vector<128x128xf32> to vector<128xf32>
    %137 = vector.shape_cast %136 : vector<128xf32> to vector<1x128xf32>
    %cst_38 = arith.constant 9.99999971E-10 : f32
    %138 = vector.broadcast %cst_38 : f32 to vector<1x128xf32>
    %139 = arith.addf %137, %138 : vector<1x128xf32>
    %140 = arith.divf %121, %139 : vector<1x128xf32>
    %cst_39 = arith.constant 1.000000e+00 : f32
    %141 = vector.broadcast %cst_39 : f32 to vector<1x128xf32>
    %142 = arith.minimumf %140, %141 : vector<1x128xf32>
    %143 = vector.broadcast %142 : vector<1x128xf32> to vector<128x128xf32>
    %144 = arith.mulf %135, %143 : vector<128x128xf32>
    %cst_40 = arith.constant dense<0.000000e+00> : vector<128xf32>
    %145 = vector.multi_reduction <add>, %144, %cst_40 [1] : vector<128x128xf32> to vector<128xf32>
    %146 = vector.shape_cast %145 : vector<128xf32> to vector<128x1xf32>
    %147 = arith.subf %117, %146 : vector<128x1xf32>
    %cst_41 = arith.constant 0.000000e+00 : f32
    %148 = vector.broadcast %cst_41 : f32 to vector<128x1xf32>
    %149 = arith.maximumf %147, %148 : vector<128x1xf32>
    %150 = arith.mulf %137, %142 : vector<1x128xf32>
    %151 = arith.subf %121, %150 : vector<1x128xf32>
    %cst_42 = arith.constant 0.000000e+00 : f32
    %152 = vector.broadcast %cst_42 : f32 to vector<1x128xf32>
    %153 = arith.maximumf %151, %152 : vector<1x128xf32>
    %154 = arith.addf %122, %144 : vector<128x128xf32>
    %cst_43 = arith.constant -2.560000e+02 : f32
    %155 = vector.broadcast %cst_43 : f32 to vector<128x128xf32>
    %156 = arith.mulf %155, %23 : vector<128x128xf32>
    %157 = math.exp %156 : vector<128x128xf32>
    %158 = vector.broadcast %153 : vector<1x128xf32> to vector<128x128xf32>
    %159 = arith.mulf %157, %158 : vector<128x128xf32>
    %cst_44 = arith.constant dense<0.000000e+00> : vector<128xf32>
    %160 = vector.multi_reduction <add>, %159, %cst_44 [1] : vector<128x128xf32> to vector<128xf32>
    %161 = vector.shape_cast %160 : vector<128xf32> to vector<128x1xf32>
    %cst_45 = arith.constant 9.99999971E-10 : f32
    %162 = vector.broadcast %cst_45 : f32 to vector<128x1xf32>
    %163 = arith.addf %161, %162 : vector<128x1xf32>
    %164 = tpu.reciprocal %163 {approx = true} : vector<128x1xf32> -> vector<128x1xf32>
    %165 = arith.mulf %149, %164 : vector<128x1xf32>
    %166 = vector.broadcast %165 : vector<128x1xf32> to vector<128x128xf32>
    %167 = arith.mulf %159, %166 : vector<128x128xf32>
    %cst_46 = arith.constant dense<0.000000e+00> : vector<128xf32>
    %168 = vector.multi_reduction <add>, %167, %cst_46 [0] : vector<128x128xf32> to vector<128xf32>
    %169 = vector.shape_cast %168 : vector<128xf32> to vector<1x128xf32>
    %cst_47 = arith.constant 9.99999971E-10 : f32
    %170 = vector.broadcast %cst_47 : f32 to vector<1x128xf32>
    %171 = arith.addf %169, %170 : vector<1x128xf32>
    %172 = arith.divf %153, %171 : vector<1x128xf32>
    %cst_48 = arith.constant 1.000000e+00 : f32
    %173 = vector.broadcast %cst_48 : f32 to vector<1x128xf32>
    %174 = arith.minimumf %172, %173 : vector<1x128xf32>
    %175 = vector.broadcast %174 : vector<1x128xf32> to vector<128x128xf32>
    %176 = arith.mulf %167, %175 : vector<128x128xf32>
    %cst_49 = arith.constant dense<0.000000e+00> : vector<128xf32>
    %177 = vector.multi_reduction <add>, %176, %cst_49 [1] : vector<128x128xf32> to vector<128xf32>
    %178 = vector.shape_cast %177 : vector<128xf32> to vector<128x1xf32>
    %179 = arith.subf %149, %178 : vector<128x1xf32>
    %cst_50 = arith.constant 0.000000e+00 : f32
    %180 = vector.broadcast %cst_50 : f32 to vector<128x1xf32>
    %181 = arith.maximumf %179, %180 : vector<128x1xf32>
    %182 = arith.mulf %169, %174 : vector<1x128xf32>
    %183 = arith.subf %153, %182 : vector<1x128xf32>
    %cst_51 = arith.constant 0.000000e+00 : f32
    %184 = vector.broadcast %cst_51 : f32 to vector<1x128xf32>
    %185 = arith.maximumf %183, %184 : vector<1x128xf32>
    %186 = arith.addf %154, %176 : vector<128x128xf32>
    %cst_52 = arith.constant -6.400000e+01 : f32
    %187 = vector.broadcast %cst_52 : f32 to vector<128x128xf32>
    %188 = arith.mulf %187, %23 : vector<128x128xf32>
    %189 = math.exp %188 : vector<128x128xf32>
    %190 = vector.broadcast %185 : vector<1x128xf32> to vector<128x128xf32>
    %191 = arith.mulf %189, %190 : vector<128x128xf32>
    %cst_53 = arith.constant dense<0.000000e+00> : vector<128xf32>
    %192 = vector.multi_reduction <add>, %191, %cst_53 [1] : vector<128x128xf32> to vector<128xf32>
    %193 = vector.shape_cast %192 : vector<128xf32> to vector<128x1xf32>
    %cst_54 = arith.constant 9.99999971E-10 : f32
    %194 = vector.broadcast %cst_54 : f32 to vector<128x1xf32>
    %195 = arith.addf %193, %194 : vector<128x1xf32>
    %196 = tpu.reciprocal %195 {approx = true} : vector<128x1xf32> -> vector<128x1xf32>
    %197 = arith.mulf %181, %196 : vector<128x1xf32>
    %198 = vector.broadcast %197 : vector<128x1xf32> to vector<128x128xf32>
    %199 = arith.mulf %191, %198 : vector<128x128xf32>
    %cst_55 = arith.constant dense<0.000000e+00> : vector<128xf32>
    %200 = vector.multi_reduction <add>, %199, %cst_55 [0] : vector<128x128xf32> to vector<128xf32>
    %201 = vector.shape_cast %200 : vector<128xf32> to vector<1x128xf32>
    %cst_56 = arith.constant 9.99999971E-10 : f32
    %202 = vector.broadcast %cst_56 : f32 to vector<1x128xf32>
    %203 = arith.addf %201, %202 : vector<1x128xf32>
    %204 = arith.divf %185, %203 : vector<1x128xf32>
    %cst_57 = arith.constant 1.000000e+00 : f32
    %205 = vector.broadcast %cst_57 : f32 to vector<1x128xf32>
    %206 = arith.minimumf %204, %205 : vector<1x128xf32>
    %207 = vector.broadcast %206 : vector<1x128xf32> to vector<128x128xf32>
    %208 = arith.mulf %199, %207 : vector<128x128xf32>
    %cst_58 = arith.constant dense<0.000000e+00> : vector<128xf32>
    %209 = vector.multi_reduction <add>, %208, %cst_58 [1] : vector<128x128xf32> to vector<128xf32>
    %210 = vector.shape_cast %209 : vector<128xf32> to vector<128x1xf32>
    %211 = arith.subf %181, %210 : vector<128x1xf32>
    %cst_59 = arith.constant 0.000000e+00 : f32
    %212 = vector.broadcast %cst_59 : f32 to vector<128x1xf32>
    %213 = arith.maximumf %211, %212 : vector<128x1xf32>
    %214 = arith.mulf %201, %206 : vector<1x128xf32>
    %215 = arith.subf %185, %214 : vector<1x128xf32>
    %cst_60 = arith.constant 0.000000e+00 : f32
    %216 = vector.broadcast %cst_60 : f32 to vector<1x128xf32>
    %217 = arith.maximumf %215, %216 : vector<1x128xf32>
    %218 = arith.addf %186, %208 : vector<128x128xf32>
    %cst_61 = arith.constant -1.600000e+01 : f32
    %219 = vector.broadcast %cst_61 : f32 to vector<128x128xf32>
    %220 = arith.mulf %219, %23 : vector<128x128xf32>
    %221 = math.exp %220 : vector<128x128xf32>
    %222 = vector.broadcast %217 : vector<1x128xf32> to vector<128x128xf32>
    %223 = arith.mulf %221, %222 : vector<128x128xf32>
    %cst_62 = arith.constant dense<0.000000e+00> : vector<128xf32>
    %224 = vector.multi_reduction <add>, %223, %cst_62 [1] : vector<128x128xf32> to vector<128xf32>
    %225 = vector.shape_cast %224 : vector<128xf32> to vector<128x1xf32>
    %cst_63 = arith.constant 9.99999971E-10 : f32
    %226 = vector.broadcast %cst_63 : f32 to vector<128x1xf32>
    %227 = arith.addf %225, %226 : vector<128x1xf32>
    %228 = tpu.reciprocal %227 {approx = true} : vector<128x1xf32> -> vector<128x1xf32>
    %229 = arith.mulf %213, %228 : vector<128x1xf32>
    %230 = vector.broadcast %229 : vector<128x1xf32> to vector<128x128xf32>
    %231 = arith.mulf %223, %230 : vector<128x128xf32>
    %cst_64 = arith.constant dense<0.000000e+00> : vector<128xf32>
    %232 = vector.multi_reduction <add>, %231, %cst_64 [0] : vector<128x128xf32> to vector<128xf32>
    %233 = vector.shape_cast %232 : vector<128xf32> to vector<1x128xf32>
    %cst_65 = arith.constant 9.99999971E-10 : f32
    %234 = vector.broadcast %cst_65 : f32 to vector<1x128xf32>
    %235 = arith.addf %233, %234 : vector<1x128xf32>
    %236 = arith.divf %217, %235 : vector<1x128xf32>
    %cst_66 = arith.constant 1.000000e+00 : f32
    %237 = vector.broadcast %cst_66 : f32 to vector<1x128xf32>
    %238 = arith.minimumf %236, %237 : vector<1x128xf32>
    %239 = vector.broadcast %238 : vector<1x128xf32> to vector<128x128xf32>
    %240 = arith.mulf %231, %239 : vector<128x128xf32>
    %cst_67 = arith.constant dense<0.000000e+00> : vector<128xf32>
    %241 = vector.multi_reduction <add>, %240, %cst_67 [1] : vector<128x128xf32> to vector<128xf32>
    %242 = vector.shape_cast %241 : vector<128xf32> to vector<128x1xf32>
    %243 = arith.subf %213, %242 : vector<128x1xf32>
    %cst_68 = arith.constant 0.000000e+00 : f32
    %244 = vector.broadcast %cst_68 : f32 to vector<128x1xf32>
    %245 = arith.maximumf %243, %244 : vector<128x1xf32>
    %246 = arith.mulf %233, %238 : vector<1x128xf32>
    %247 = arith.subf %217, %246 : vector<1x128xf32>
    %cst_69 = arith.constant 0.000000e+00 : f32
    %248 = vector.broadcast %cst_69 : f32 to vector<1x128xf32>
    %249 = arith.maximumf %247, %248 : vector<1x128xf32>
    %250 = arith.addf %218, %240 : vector<128x128xf32>
    %cst_70 = arith.constant -4.000000e+00 : f32
    %251 = vector.broadcast %cst_70 : f32 to vector<128x128xf32>
    %252 = arith.mulf %251, %23 : vector<128x128xf32>
    %253 = math.exp %252 : vector<128x128xf32>
    %254 = vector.broadcast %249 : vector<1x128xf32> to vector<128x128xf32>
    %255 = arith.mulf %253, %254 : vector<128x128xf32>
    %cst_71 = arith.constant dense<0.000000e+00> : vector<128xf32>
    %256 = vector.multi_reduction <add>, %255, %cst_71 [1] : vector<128x128xf32> to vector<128xf32>
    %257 = vector.shape_cast %256 : vector<128xf32> to vector<128x1xf32>
    %cst_72 = arith.constant 9.99999971E-10 : f32
    %258 = vector.broadcast %cst_72 : f32 to vector<128x1xf32>
    %259 = arith.addf %257, %258 : vector<128x1xf32>
    %260 = tpu.reciprocal %259 {approx = true} : vector<128x1xf32> -> vector<128x1xf32>
    %261 = arith.mulf %245, %260 : vector<128x1xf32>
    %262 = vector.broadcast %261 : vector<128x1xf32> to vector<128x128xf32>
    %263 = arith.mulf %255, %262 : vector<128x128xf32>
    %cst_73 = arith.constant dense<0.000000e+00> : vector<128xf32>
    %264 = vector.multi_reduction <add>, %263, %cst_73 [0] : vector<128x128xf32> to vector<128xf32>
    %265 = vector.shape_cast %264 : vector<128xf32> to vector<1x128xf32>
    %cst_74 = arith.constant 9.99999971E-10 : f32
    %266 = vector.broadcast %cst_74 : f32 to vector<1x128xf32>
    %267 = arith.addf %265, %266 : vector<1x128xf32>
    %268 = arith.divf %249, %267 : vector<1x128xf32>
    %cst_75 = arith.constant 1.000000e+00 : f32
    %269 = vector.broadcast %cst_75 : f32 to vector<1x128xf32>
    %270 = arith.minimumf %268, %269 : vector<1x128xf32>
    %271 = vector.broadcast %270 : vector<1x128xf32> to vector<128x128xf32>
    %272 = arith.mulf %263, %271 : vector<128x128xf32>
    %cst_76 = arith.constant dense<0.000000e+00> : vector<128xf32>
    %273 = vector.multi_reduction <add>, %272, %cst_76 [1] : vector<128x128xf32> to vector<128xf32>
    %274 = vector.shape_cast %273 : vector<128xf32> to vector<128x1xf32>
    %275 = arith.subf %245, %274 : vector<128x1xf32>
    %cst_77 = arith.constant 0.000000e+00 : f32
    %276 = vector.broadcast %cst_77 : f32 to vector<128x1xf32>
    %277 = arith.maximumf %275, %276 : vector<128x1xf32>
    %278 = arith.mulf %265, %270 : vector<1x128xf32>
    %279 = arith.subf %249, %278 : vector<1x128xf32>
    %cst_78 = arith.constant 0.000000e+00 : f32
    %280 = vector.broadcast %cst_78 : f32 to vector<1x128xf32>
    %281 = arith.maximumf %279, %280 : vector<1x128xf32>
    %282 = arith.addf %250, %272 : vector<128x128xf32>
    %cst_79 = arith.constant -1.000000e+00 : f32
    %283 = vector.broadcast %cst_79 : f32 to vector<128x128xf32>
    %284 = arith.mulf %283, %23 : vector<128x128xf32>
    %285 = math.exp %284 : vector<128x128xf32>
    %286 = vector.broadcast %281 : vector<1x128xf32> to vector<128x128xf32>
    %287 = arith.mulf %285, %286 : vector<128x128xf32>
    %cst_80 = arith.constant dense<0.000000e+00> : vector<128xf32>
    %288 = vector.multi_reduction <add>, %287, %cst_80 [1] : vector<128x128xf32> to vector<128xf32>
    %289 = vector.shape_cast %288 : vector<128xf32> to vector<128x1xf32>
    %cst_81 = arith.constant 9.99999971E-10 : f32
    %290 = vector.broadcast %cst_81 : f32 to vector<128x1xf32>
    %291 = arith.addf %289, %290 : vector<128x1xf32>
    %292 = tpu.reciprocal %291 {approx = true} : vector<128x1xf32> -> vector<128x1xf32>
    %293 = arith.mulf %277, %292 : vector<128x1xf32>
    %294 = vector.broadcast %293 : vector<128x1xf32> to vector<128x128xf32>
    %295 = arith.mulf %287, %294 : vector<128x128xf32>
    %cst_82 = arith.constant dense<0.000000e+00> : vector<128xf32>
    %296 = vector.multi_reduction <add>, %295, %cst_82 [0] : vector<128x128xf32> to vector<128xf32>
    %297 = vector.shape_cast %296 : vector<128xf32> to vector<1x128xf32>
    %cst_83 = arith.constant 9.99999971E-10 : f32
    %298 = vector.broadcast %cst_83 : f32 to vector<1x128xf32>
    %299 = arith.addf %297, %298 : vector<1x128xf32>
    %300 = arith.divf %281, %299 : vector<1x128xf32>
    %cst_84 = arith.constant 1.000000e+00 : f32
    %301 = vector.broadcast %cst_84 : f32 to vector<1x128xf32>
    %302 = arith.minimumf %300, %301 : vector<1x128xf32>
    %303 = vector.broadcast %302 : vector<1x128xf32> to vector<128x128xf32>
    %304 = arith.mulf %295, %303 : vector<128x128xf32>
    %cst_85 = arith.constant dense<0.000000e+00> : vector<128xf32>
    %305 = vector.multi_reduction <add>, %304, %cst_85 [1] : vector<128x128xf32> to vector<128xf32>
    %306 = vector.shape_cast %305 : vector<128xf32> to vector<128x1xf32>
    %307 = arith.subf %277, %306 : vector<128x1xf32>
    %cst_86 = arith.constant 0.000000e+00 : f32
    %308 = vector.broadcast %cst_86 : f32 to vector<128x1xf32>
    %309 = arith.maximumf %307, %308 : vector<128x1xf32>
    %310 = arith.mulf %297, %302 : vector<1x128xf32>
    %311 = arith.subf %281, %310 : vector<1x128xf32>
    %cst_87 = arith.constant 0.000000e+00 : f32
    %312 = vector.broadcast %cst_87 : f32 to vector<1x128xf32>
    %313 = arith.maximumf %311, %312 : vector<1x128xf32>
    %314 = arith.addf %282, %304 : vector<128x128xf32>
    %cst_88 = arith.constant -2.500000e-01 : f32
    %315 = vector.broadcast %cst_88 : f32 to vector<128x128xf32>
    %316 = arith.mulf %315, %23 : vector<128x128xf32>
    %317 = math.exp %316 : vector<128x128xf32>
    %318 = vector.broadcast %313 : vector<1x128xf32> to vector<128x128xf32>
    %319 = arith.mulf %317, %318 : vector<128x128xf32>
    %cst_89 = arith.constant dense<0.000000e+00> : vector<128xf32>
    %320 = vector.multi_reduction <add>, %319, %cst_89 [1] : vector<128x128xf32> to vector<128xf32>
    %321 = vector.shape_cast %320 : vector<128xf32> to vector<128x1xf32>
    %cst_90 = arith.constant 9.99999971E-10 : f32
    %322 = vector.broadcast %cst_90 : f32 to vector<128x1xf32>
    %323 = arith.addf %321, %322 : vector<128x1xf32>
    %324 = tpu.reciprocal %323 {approx = true} : vector<128x1xf32> -> vector<128x1xf32>
    %325 = arith.mulf %309, %324 : vector<128x1xf32>
    %326 = vector.broadcast %325 : vector<128x1xf32> to vector<128x128xf32>
    %327 = arith.mulf %319, %326 : vector<128x128xf32>
    %cst_91 = arith.constant dense<0.000000e+00> : vector<128xf32>
    %328 = vector.multi_reduction <add>, %327, %cst_91 [0] : vector<128x128xf32> to vector<128xf32>
    %329 = vector.shape_cast %328 : vector<128xf32> to vector<1x128xf32>
    %cst_92 = arith.constant 9.99999971E-10 : f32
    %330 = vector.broadcast %cst_92 : f32 to vector<1x128xf32>
    %331 = arith.addf %329, %330 : vector<1x128xf32>
    %332 = arith.divf %313, %331 : vector<1x128xf32>
    %cst_93 = arith.constant 1.000000e+00 : f32
    %333 = vector.broadcast %cst_93 : f32 to vector<1x128xf32>
    %334 = arith.minimumf %332, %333 : vector<1x128xf32>
    %335 = vector.broadcast %334 : vector<1x128xf32> to vector<128x128xf32>
    %336 = arith.mulf %327, %335 : vector<128x128xf32>
    %cst_94 = arith.constant dense<0.000000e+00> : vector<128xf32>
    %337 = vector.multi_reduction <add>, %336, %cst_94 [1] : vector<128x128xf32> to vector<128xf32>
    %338 = vector.shape_cast %337 : vector<128xf32> to vector<128x1xf32>
    %339 = arith.subf %309, %338 : vector<128x1xf32>
    %cst_95 = arith.constant 0.000000e+00 : f32
    %340 = vector.broadcast %cst_95 : f32 to vector<128x1xf32>
    %341 = arith.maximumf %339, %340 : vector<128x1xf32>
    %342 = arith.mulf %329, %334 : vector<1x128xf32>
    %343 = arith.subf %313, %342 : vector<1x128xf32>
    %cst_96 = arith.constant 0.000000e+00 : f32
    %344 = vector.broadcast %cst_96 : f32 to vector<1x128xf32>
    %345 = arith.maximumf %343, %344 : vector<1x128xf32>
    %346 = arith.addf %314, %336 : vector<128x128xf32>
    %347 = vector.shape_cast %345 : vector<1x128xf32> to vector<1x128xf32>
    %348 = vector.broadcast %347 : vector<1x128xf32> to vector<128x128xf32>
    %cst_97 = arith.constant dense<0.000000e+00> : vector<128xf32>
    %349 = vector.multi_reduction <add>, %348, %cst_97 [1] : vector<128x128xf32> to vector<128xf32>
    %350 = vector.shape_cast %349 : vector<128xf32> to vector<128x1xf32>
    %cst_98 = arith.constant 9.99999971E-10 : f32
    %351 = vector.broadcast %cst_98 : f32 to vector<128x1xf32>
    %352 = arith.addf %350, %351 : vector<128x1xf32>
    %353 = tpu.reciprocal %352 {approx = true} : vector<128x1xf32> -> vector<128x1xf32>
    %354 = arith.mulf %341, %353 : vector<128x1xf32>
    %355 = vector.broadcast %354 : vector<128x1xf32> to vector<128x128xf32>
    %356 = arith.mulf %348, %355 : vector<128x128xf32>
    %cst_99 = arith.constant dense<0.000000e+00> : vector<128xf32>
    %357 = vector.multi_reduction <add>, %356, %cst_99 [0] : vector<128x128xf32> to vector<128xf32>
    %358 = vector.shape_cast %357 : vector<128xf32> to vector<1x128xf32>
    %cst_100 = arith.constant 9.99999971E-10 : f32
    %359 = vector.broadcast %cst_100 : f32 to vector<1x128xf32>
    %360 = arith.addf %358, %359 : vector<1x128xf32>
    %361 = arith.divf %345, %360 : vector<1x128xf32>
    %cst_101 = arith.constant 1.000000e+00 : f32
    %362 = vector.broadcast %cst_101 : f32 to vector<1x128xf32>
    %363 = arith.minimumf %361, %362 : vector<1x128xf32>
    %364 = vector.broadcast %363 : vector<1x128xf32> to vector<128x128xf32>
    %365 = arith.mulf %356, %364 : vector<128x128xf32>
    %366 = arith.addf %346, %365 : vector<128x128xf32>
    %cst_102 = arith.constant 0.000000e+00 : f32
    %367 = vector.broadcast %cst_102 : f32 to vector<128x128xf32>
    %368 = arith.maximumf %23, %367 : vector<128x128xf32>
    %369 = math.sqrt %368 : vector<128x128xf32>
    %370 = arith.mulf %369, %366 : vector<128x128xf32>
    %371 = vector.shape_cast %370 : vector<128x128xf32> to vector<1x128x128xf32>
    %cst_103 = arith.constant dense<0.000000e+00> : vector<1xf32>
    %372 = vector.multi_reduction <add>, %371, %cst_103 [1, 2] : vector<1x128x128xf32> to vector<1xf32>
    %373 = vector.shape_cast %372 : vector<1xf32> to vector<1x1x1xf32>
    %374 = vector.extract %373[0, 0, 0] : f32 from vector<1x1x1xf32>
    %375 = vector.broadcast %374 : f32 to vector<1x1x1xf32>
    %c0_104 = arith.constant 0 : index
    %c0_105 = arith.constant 0 : index
    %c0_106 = arith.constant 0 : index
    %376 = vector.load %arg3[%c0_104, %c0_105, %c0_106] : memref<1x1x1xf32, #tpu.memory_space<vmem>>, vector<1x1x1xf32>
    tpu.vector_store %arg3[%c0_104, %c0_105, %c0_106], %375 {strides = array<i32>} : memref<1x1x1xf32, #tpu.memory_space<vmem>>, vector<1x1x1xf32>,
    return
  }
  func.func @transform_0(%arg0: i32) -> (i32, i32, i32) {
    %c0_i32 = arith.constant 0 : i32
    %c0_i32_0 = arith.constant 0 : i32
    %c0_i32_1 = arith.constant 0 : i32
    return %arg0, %c0_i32, %c0_i32_0 : i32, i32, i32
  }
  func.func @transform_1(%arg0: i32) -> (i32, i32, i32) {
    %c0_i32 = arith.constant 0 : i32
    %c0_i32_0 = arith.constant 0 : i32
    %c0_i32_1 = arith.constant 0 : i32
    return %arg0, %c0_i32, %c0_i32_0 : i32, i32, i32
  }
  func.func @transform_2(%arg0: i32) -> (i32, i32, i32) {
    %c0_i32 = arith.constant 0 : i32
    %c0_i32_0 = arith.constant 0 : i32
    %c0_i32_1 = arith.constant 0 : i32
    return %arg0, %c0_i32, %c0_i32_0 : i32, i32, i32
  }
}

</mosaic_0001>

<bundles_post_ra>
// kernel: tpu_custom_call.1
= control target key start
LH: loop header
LB: loop body
LE: loop exit
PB: predicated region body
PF: predicated region fallthrough
CT: control target
= control target key end

     0   :  { %s4429_s9 = smov 0   ;;  %s7980_s0 = inlined_call_operand.vmem [shape: f32[2,128,3], index: 0, kind: input, shape index: {}]   ;;  %s7981_s1 = inlined_call_operand.vmem [shape: f32[2,3,128], index: 1, kind: input, shape index: {}]   ;;  %s7982_s2 = inlined_call_operand.vmem [shape: f32[2,1,1], index: 2, kind: output, shape index: {}]  }
   0x1 LB: > { %s3653_s10 = sadd.s32 4294967295, %s4409_s9   ;;  %p3657_p0 = scmp.ge.s32.totalorder %s4409_s9, 1  ;;  %s4409_s9 = sphi %s4429_s9, %s12_s9  }
   0x2   : > { %p121_p1 = scmp.lt.s32.totalorder %s4409_s9, 3 }
   0x4   : > { %p122_p2 = pnand %p3657_p0, %p121_p1 }
   0x6   : > { %125 = sbr.rel (%p122_p2) target bundleno = 3186 (0xc72), region = 28 }
   0xd   : > { %p145_p3 = scmp.lt.s32.totalorder %s3653_s10, 1  ;;  %v4411_v0 = vmov 2   ;;  %v4412_v1 = vmov 1   ;;  %v4413_v10 = vmov 0   ;;  %v254_v33 = vlaneseq }
   0xe   : > { %3678 = vset.pattern.permute.xlu0 %v4411_v0  ;;  %3677 = vset.pattern.permute.xlu1 %v4412_v1 }
   0xf   : > { %s8405_s10 = smov (!%p145_p3, %s3653_s10), 1  ;;  %v255_v35 = vshrl.u32 %v254_v33, 7 }
  0x10   : > { %s3663_s11 = sshll.u32 %s8405_s10, 7  ;;  %s3660_s15 = sshll.u32 %s8405_s10, 2 }
  0x11   : > { %s4445_s14 = scalar_lea.vmem %s7980_s0, %s3663_s11  ;;  %s153_s18 = scalar_lea.vmem %s7981_s1, %s3660_s15  ;;  %v356_v38 = vsub.s32 1, %v255_v35  ;;  %v472_v42 = vsub.s32 2, %v255_v35  ;;  %v256_v43 = vsub.s32 0, %v255_v35 }
  0x12   : > { %v157_v2 = vld [vmem:[%s4445_s14] sm:$0xff]  ;;  %v162_v3 = vld [vmem:[%s4445_s14 + $0x28] sm:$0xff]  ;;  %v163_v5 = vld [vmem:[%s4445_s14 + $0x30] sm:$0xff]  ;;  %s156_s21 = scalar_lea.vmem %s7982_s2, %s8405_s10 }
  0x13   : > { %407 = vperm.xlu0 %3678, %v157_v2   ;;  %291 = vperm.xlu1 %3677, %v157_v2   ;;  %v158_v4 = vld [vmem:[%s4445_s14 + $0x8] sm:$0xff]  ;;  %v159_v6 = vld [vmem:[%s4445_s14 + $0x10] sm:$0xff]  ;;  %v168_v8 = vld [vmem:[%s4445_s14 + $0x58] sm:$0xff] }
  0x14   : > { %v167_v7 = vld [vmem:[%s4445_s14 + $0x50] sm:$0xff]  ;;  %v160_v9 = vld [vmem:[%s4445_s14 + $0x18] sm:$0xff]  ;;  %v161_v11 = vld [vmem:[%s4445_s14 + $0x20] sm:$0xff] }
  0x15   : > { %v165_v12 = vld [vmem:[%s4445_s14 + $0x40] sm:$0xff]  ;;  %v166_v13 = vld [vmem:[%s4445_s14 + $0x48] sm:$0xff]  ;;  %v171_v15 = vld [vmem:[%s4445_s14 + $0x70] sm:$0xff] }
  0x16   : > { %v170_v14 = vld [vmem:[%s4445_s14 + $0x68] sm:$0xff]  ;;  %v164_v16 = vld [vmem:[%s4445_s14 + $0x38] sm:$0xff]  ;;  %v169_v18 = vld [vmem:[%s4445_s14 + $0x60] sm:$0xff] }
  0x17   : > { %427 = vperm.xlu0 %3678, %v162_v3   ;;  %295 = vperm.xlu1 %3677, %v158_v4   ;;  %v172_v17 = vld [vmem:[%s4445_s14 + $0x78] sm:$0xff]  ;;  %v173_v40 = vld [vmem:[%s153_s18] sm:$0x7] }
  0x18   : > { %v4509_v44 = vrot.slane %v173_v40, %v356_v38  ;;  %v4513_v46 = vrot.slane %v173_v40, %v472_v42  ;;  %v4515_v48 = vrot.slane %v173_v40, %v256_v43 }
  0x1b   : > { %431 = vperm.xlu0 %3678, %v163_v5   ;;  %299 = vperm.xlu1 %3677, %v159_v6  }
  0x1f   : > { %447 = vperm.xlu0 %3678, %v167_v7   ;;  %3679 = vset.pattern.permute.xlu1 %v4411_v0 }
  0x20   : > { %411 = vperm.xlu1 %3679, %v158_v4  }
  0x23   : > { %451 = vperm.xlu0 %3678, %v168_v8  }
  0x24   : > { %3680 = vset.pattern.permute.xlu1 %v4413_v10 }
  0x25   : > { %191 = vperm.xlu1 %3680, %v160_v9  }
  0x27   : > { %3698 = vset.pattern.permute.xlu0 %v4412_v1 }
  0x28   : > { %303 = vperm.xlu0 %3698, %v160_v9  }
  0x29   : > { %3681 = vset.pattern.permute.xlu1 %v4411_v0 }
  0x2a   : > { %415 = vperm.xlu1 %3681, %v159_v6  }
  0x2c   : > { %307 = vperm.xlu0 %3698, %v161_v11  }
  0x2e   : > { %3682 = vset.pattern.permute.xlu1 %v4413_v10 }
  0x2f   : > { %196 = vperm.xlu1 %3682, %v161_v11  }
  0x30   : > { %323 = vperm.xlu0 %3698, %v165_v12  }
  0x33   : > { %3683 = vset.pattern.permute.xlu1 %v4411_v0 }
  0x34   : > { %327 = vperm.xlu0 %3698, %v166_v13   ;;  %419 = vperm.xlu1 %3683, %v160_v9  }
  0x38   : > { %343 = vperm.xlu0 %3698, %v170_v14   ;;  %3684 = vset.pattern.permute.xlu1 %v4412_v1 }
  0x39   : > { %311 = vperm.xlu1 %3684, %v162_v3  }
  0x3c   : > { %347 = vperm.xlu0 %3698, %v171_v15  }
  0x3d   : > { %3685 = vset.pattern.permute.xlu1 %v4411_v0 }
  0x3e   : > { %423 = vperm.xlu1 %3685, %v161_v11  }
  0x40   : > { %3702 = vset.pattern.permute.xlu0 %v4413_v10 }
  0x41   : > { %176 = vperm.xlu0 %3702, %v157_v2  }
  0x42   : > { %3686 = vset.pattern.permute.xlu1 %v4412_v1 }
  0x43   : > { %315 = vperm.xlu1 %3686, %v163_v5  }
  0x45   : > { %181 = vperm.xlu0 %3702, %v158_v4  }
  0x47   : > { %3687 = vset.pattern.permute.xlu1 %v4413_v10 }
  0x48   : > { %211 = vperm.xlu1 %3687, %v164_v16  }
  0x49   : > { %186 = vperm.xlu0 %3702, %v159_v6  }
  0x4c   : > { %3688 = vset.pattern.permute.xlu1 %v4412_v1 }
  0x4d   : > { %201 = vperm.xlu0 %3702, %v162_v3   ;;  %319 = vperm.xlu1 %3688, %v164_v16  }
  0x51   : > { %206 = vperm.xlu0 %3702, %v163_v5   ;;  %3689 = vset.pattern.permute.xlu1 %v4413_v10 }
  0x52   : > { %216 = vperm.xlu1 %3689, %v165_v12  }
  0x55   : > { %226 = vperm.xlu0 %3702, %v167_v7  }
  0x56   : > { %3690 = vset.pattern.permute.xlu1 %v4411_v0 }
  0x57   : > { %435 = vperm.xlu1 %3690, %v164_v16  }
  0x59   : > { %231 = vperm.xlu0 %3702, %v168_v8  }
  0x5b   : > { %3691 = vset.pattern.permute.xlu1 %v4413_v10 }
  0x5c   : > { %221 = vperm.xlu1 %3691, %v166_v13  }
  0x5d   : > { %251 = vperm.xlu0 %3702, %v172_v17  }
  0x60   : > { %3692 = vset.pattern.permute.xlu1 %v4411_v0 }
  0x61   : > { %439 = vperm.xlu1 %3692, %v165_v12   ;;  %3706 = vset.pattern.permute.xlu0 %v4411_v0 }
  0x62   : > { %467 = vperm.xlu0 %3706, %v172_v17  }
  0x65   : > { %3693 = vset.pattern.permute.xlu1 %v4412_v1 }
  0x66   : > { %331 = vperm.xlu1 %3693, %v167_v7  }
  0x6a   : > { %3694 = vset.pattern.permute.xlu1 %v4411_v0 }
  0x6b   : > { %443 = vperm.xlu1 %3694, %v166_v13  }
  0x6f   : > { %3695 = vset.pattern.permute.xlu1 %v4412_v1 }
  0x70   : > { %335 = vperm.xlu1 %3695, %v168_v8  }
  0x74   : > { %3696 = vset.pattern.permute.xlu1 %v4413_v10 }
  0x75   : > { %236 = vperm.xlu1 %3696, %v169_v18  }
  0x79   : > { %3697 = vset.pattern.permute.xlu1 %v4412_v1 }
  0x7a   : > { %339 = vperm.xlu1 %3697, %v169_v18  }
  0x7e   : > { %3699 = vset.pattern.permute.xlu1 %v4413_v10 }
  0x7f   : > { %241 = vperm.xlu1 %3699, %v170_v14  }
  0x83   : > { %3700 = vset.pattern.permute.xlu1 %v4411_v0 }
  0x84   : > { %455 = vperm.xlu1 %3700, %v169_v18  }
  0x88   : > { %3701 = vset.pattern.permute.xlu1 %v4413_v10 }
  0x89   : > { %246 = vperm.xlu1 %3701, %v171_v15  }
  0x8d   : > { %3703 = vset.pattern.permute.xlu1 %v4411_v0 }
  0x8e   : > { %459 = vperm.xlu1 %3703, %v170_v14  }
  0x92   : > { %3704 = vset.pattern.permute.xlu1 %v4412_v1  ;;  %v292_v19 = vpop.permute.xlu1 %291  ;;  %v408_v20 = vpop.permute.xlu0 %407 }
  0x93   : > { %351 = vperm.xlu1 %3704, %v172_v17   ;;  %v358_v49 = vsub.f32 %v292_v19, %v4509_v44  ;;  %v474_v50 = vsub.f32 %v408_v20, %v4513_v46 }
  0x95   : > { %v374_v59 = vmul.f32 %v358_v49, %v358_v49  ;;  %v490_v60 = vmul.f32 %v474_v50, %v474_v50 }
  0x96   : > { %v296_v21 = vpop.permute.xlu1 %295  ;;  %v4490_v22 = vpop.permute.xlu0 %427 }
  0x97   : > { %3705 = vset.pattern.permute.xlu1 %v4411_v0  ;;  %v359_v61 = vsub.f32 %v296_v21, %v4509_v44  ;;  %v479_v35 = vsub.f32 %v4490_v22, %v4513_v46 }
  0x98   : > { %463 = vperm.xlu1 %3705, %v171_v15  }
  0x99   : > { %v375_v10 = vmul.f32 %v359_v61, %v359_v61  ;;  %v495_v22 = vmul.f32 %v479_v35, %v479_v35 }
  0x9a   : > { %v300_v23 = vpop.permute.xlu1 %299  ;;  %v4493_v24 = vpop.permute.xlu0 %431 }
  0x9b   : > { %v360_v3 = vsub.f32 %v300_v23, %v4509_v44 }
  0x9d   : > { %v376_v23 = vmul.f32 %v360_v3, %v360_v3 }
  0x9e   : > { %v4495_v25 = vpop.permute.xlu0 %447 }
  0x9f   : > { %v412_v26 = vpop.permute.xlu1 %411 }
  0xa0   : > { %v475_v63 = vsub.f32 %v412_v26, %v4513_v46 }
  0xa2   : > { %v4497_v27 = vpop.permute.xlu0 %451  ;;  %v491_v14 = vmul.f32 %v475_v63, %v475_v63 }
  0xa4   : > { %v192_v28 = vpop.permute.xlu1 %191 }
  0xa5   : > { %v261_v54 = vsub.f32 %v192_v28, %v4515_v48 }
  0xa7   : > { %v304_v29 = vpop.permute.xlu0 %303  ;;  %v277_v6 = vmul.f32 %v261_v54, %v261_v54 }
  0xa8   : > { %v361_v51 = vsub.f32 %v304_v29, %v4509_v44 }
  0xa9   : > { %v416_v30 = vpop.permute.xlu1 %415 }
  0xaa   : > { %v377_v0 = vmul.f32 %v361_v51, %v361_v51  ;;  %v476_v18 = vsub.f32 %v416_v30, %v4513_v46 }
  0xab   : > { %v308_v31 = vpop.permute.xlu0 %307 }
  0xac   : > { %v362_v55 = vsub.f32 %v308_v31, %v4509_v44  ;;  %v393_v15 = vadd.f32 %v377_v0, %v277_v6  ;;  %v492_v40 = vmul.f32 %v476_v18, %v476_v18 }
  0xae   : > { %v197_v32 = vpop.permute.xlu1 %196  ;;  %v378_v7 = vmul.f32 %v362_v55, %v362_v55 }
  0xaf   : > { %v4499_v34 = vpop.permute.xlu0 %323  ;;  %v262_v56 = vsub.f32 %v197_v32, %v4515_v48 }
  0xb0   : > { %v366_v18 = vsub.f32 %v4499_v34, %v4509_v44 }
  0xb1   : > { %v278_v8 = vmul.f32 %v262_v56, %v262_v56 }
  0xb3   : > { %v420_v36 = vpop.permute.xlu1 %419  ;;  %v4502_v37 = vpop.permute.xlu0 %327  ;;  %v394_v26 = vadd.f32 %v378_v7, %v278_v8 }
  0xb4   : > { %v477_v57 = vsub.f32 %v420_v36, %v4513_v46 }
  0xb6   : > { %v493_v9 = vmul.f32 %v477_v57, %v477_v57 }
  0xb7   : > { %v4507_v39 = vpop.permute.xlu0 %343 }
  0xb8   : > { %v312_v41 = vpop.permute.xlu1 %311  ;;  %v4535_v28 = vadd.f32 %v493_v9, %v393_v15 }
  0xb9   : > { %v363_v29 = vsub.f32 %v312_v41, %v4509_v44 }
  0xba   : > { %8046 = vst [vmem:[#allocation3_spill] sm:$0xff] %v4535_v28  ;;  %v525_v49 = vmul.f32 -65536.0, %v4535_v28 }
  0xbb   : > { %v4511_v45 = vpop.permute.xlu0 %347  ;;  %v379_v50 = vmul.f32 %v363_v29, %v363_v29 }
  0xbc   : > { %v544_v63 = vmul.f32 1.442695, %v525_v49 }
  0xbd   : > { %v424_v47 = vpop.permute.xlu1 %423 }
  0xbe   : > { %v478_v1 = vsub.f32 %v424_v47, %v4513_v46 }
  0xc0   : > { %v177_v52 = vpop.permute.xlu0 %176  ;;  %v494_v16 = vmul.f32 %v478_v1, %v478_v1 }
  0xc1   : > { %v258_v53 = vsub.f32 %v177_v52, %v4515_v48 }
  0xc2   : > { %v316_v58 = vpop.permute.xlu1 %315  ;;  %v4542_v36 = vadd.f32 %v494_v16, %v394_v26 }
  0xc3   : > { %v274_v62 = vmul.f32 %v258_v53, %v258_v53  ;;  %v364_v47 = vsub.f32 %v316_v58, %v4509_v44  ;;  %v480_v53 = vsub.f32 %v4493_v24, %v4513_v46 }
  0xc4   : > { %v182_v2 = vpop.permute.xlu0 %181  ;;  %8048 = vst [vmem:[#allocation5_spill] sm:$0xff] %v4542_v36  ;;  %v526_v56 = vmul.f32 -65536.0, %v4542_v36 }
  0xc5   : > { %v390_v4 = vadd.f32 %v374_v59, %v274_v62  ;;  %v259_v5 = vsub.f32 %v182_v2, %v4515_v48  ;;  %v380_v62 = vmul.f32 %v364_v47, %v364_v47  ;;  %v496_v3 = vmul.f32 %v480_v53, %v480_v53 }
  0xc7   : > { %v4530_v11 = vadd.f32 %v490_v60, %v390_v4  ;;  %v275_v12 = vmul.f32 %v259_v5, %v259_v5  ;;  %v212_v13 = vpop.permute.xlu1 %211  ;;  %v546_v4 = vmul.f32 1.442695, %v526_v56 }
  0xc8   : > { %v187_v17 = vpop.permute.xlu0 %186  ;;  %v265_v0 = vsub.f32 %v212_v13, %v4515_v48 }
  0xc9   : > { %8045 = vst [vmem:[#allocation2_spill] sm:$0xff] %v4530_v11  ;;  %v391_v19 = vadd.f32 %v375_v10, %v275_v12  ;;  %v260_v20 = vsub.f32 %v187_v17, %v4515_v48  ;;  %v522_v21 = vmul.f32 -65536.0, %v4530_v11 }
  0xca   : > { %v281_v10 = vmul.f32 %v265_v0, %v265_v0 }
  0xcb   : > { %v4538_v31 = vadd.f32 %v491_v14, %v391_v19  ;;  %v276_v32 = vmul.f32 %v260_v20, %v260_v20  ;;  %v538_v33 = vmul.f32 1.442695, %v522_v21 }
  0xcc   : > { %v202_v30 = vpop.permute.xlu0 %201  ;;  %v320_v38 = vpop.permute.xlu1 %319 }
  0xcd   : > { %8047 = vst [vmem:[#allocation4_spill] sm:$0xff] %v4538_v31  ;;  %v392_v42 = vadd.f32 %v376_v23, %v276_v32  ;;  %v263_v43 = vsub.f32 %v202_v30, %v4515_v48  ;;  %3707 = vpow2.f32 %v538_v33  ;;  %v523_v41 = vmul.f32 -65536.0, %v4538_v31 }
  0xce   : > { %v365_v59 = vsub.f32 %v320_v38, %v4509_v44  ;;  %v382_v33 = vmul.f32 %v366_v18, %v366_v18 }
  0xcf   : > { %v4548_v51 = vadd.f32 %v492_v40, %v392_v42  ;;  %v279_v52 = vmul.f32 %v263_v43, %v263_v43  ;;  %v540_v55 = vmul.f32 1.442695, %v523_v41 }
  0xd0   : > { %v207_v54 = vpop.permute.xlu0 %206  ;;  %v381_v5 = vmul.f32 %v365_v59, %v365_v59 }
  0xd1   : > { %8049 = vst [vmem:[#allocation6_spill] sm:$0xff] %v4548_v51  ;;  %v395_v57 = vadd.f32 %v379_v50, %v279_v52  ;;  %v264_v58 = vsub.f32 %v207_v54, %v4515_v48  ;;  %v217_v60 = vpop.permute.xlu1 %216  ;;  %v524_v61 = vmul.f32 -65536.0, %v4548_v51  ;;  %3709 = vpow2.f32 %v540_v55 }
  0xd2   : > { %v397_v15 = vadd.f32 %v381_v5, %v281_v10  ;;  %v266_v19 = vsub.f32 %v217_v60, %v4515_v48  ;;  %v367_v52 = vsub.f32 %v4502_v37, %v4509_v44  ;;  %v484_v55 = vsub.f32 %v4495_v25, %v4513_v46 }
  0xd3   : > { %v4557_v1 = vadd.f32 %v495_v22, %v395_v57  ;;  %v280_v24 = vmul.f32 %v264_v58, %v264_v58  ;;  %v542_v2 = vmul.f32 1.442695, %v524_v61 }
  0xd4   : > { %v282_v35 = vmul.f32 %v266_v19, %v266_v19  ;;  %v227_v30 = vpop.permute.xlu0 %226  ;;  %v383_v37 = vmul.f32 %v367_v52, %v367_v52  ;;  %v500_v0 = vmul.f32 %v484_v55, %v484_v55 }
  0xd5   : > { %8050 = vst [vmem:[#allocation7_spill] sm:$0xff] %v4557_v1  ;;  %v396_v6 = vadd.f32 %v380_v62, %v280_v24  ;;  %3711 = vpow2.f32 %v542_v2  ;;  %v527_v7 = vmul.f32 -65536.0, %v4557_v1  ;;  %v268_v47 = vsub.f32 %v227_v30, %v4515_v48 }
  0xd6   : > { %v436_v8 = vpop.permute.xlu1 %435  ;;  %3713 = vpow2.f32 %v544_v63  ;;  %v398_v49 = vadd.f32 %v382_v33, %v282_v35 }
  0xd7   : > { %v4560_v9 = vpop.eup %3707  ;;  %v4562_v12 = vadd.f32 %v496_v3, %v396_v6  ;;  %v481_v13 = vsub.f32 %v436_v8, %v4513_v46  ;;  %v548_v14 = vmul.f32 1.442695, %v527_v7  ;;  %3715 = vpow2.f32 %v546_v4 }
  0xd8   : > { %570 = vadd.xlane.f32.xlu1 %v4560_v9  ;;  %v284_v56 = vmul.f32 %v268_v47, %v268_v47  ;;  %v232_v62 = vpop.permute.xlu0 %231 }
  0xd9   : > { %8051 = vst [vmem:[#allocation8_spill] sm:$0xff] %v4562_v12  ;;  %v497_v16 = vmul.f32 %v481_v13, %v481_v13  ;;  %3717 = vpow2.f32 %v548_v14  ;;  %v528_v17 = vmul.f32 -65536.0, %v4562_v12  ;;  %v269_v5 = vsub.f32 %v232_v62, %v4515_v48 }
  0xda   : > { %v485_v14 = vsub.f32 %v4497_v27, %v4513_v46 }
  0xdb   : > { %v4570_v20 = vadd.f32 %v497_v16, %v397_v15  ;;  %v222_v21 = vpop.permute.xlu1 %221  ;;  %v550_v23 = vmul.f32 1.442695, %v528_v17  ;;  %v4572_v26 = vpop.eup %3709  ;;  %v285_v15 = vmul.f32 %v269_v5, %v269_v5 }
  0xdc   : > { %572 = vadd.xlane.f32.xlu0 %v4572_v26  ;;  %v267_v22 = vsub.f32 %v222_v21, %v4515_v48 }
  0xdd   : > { %8052 = vst [vmem:[#allocation9_spill] sm:$0xff] %v4570_v20  ;;  %3719 = vpow2.f32 %v550_v23  ;;  %v529_v29 = vmul.f32 -65536.0, %v4570_v20  ;;  %v501_v23 = vmul.f32 %v485_v14, %v485_v14 }
  0xde   : > { %v283_v61 = vmul.f32 %v267_v22, %v267_v22 }
  0xdf   : > { %v4576_v32 = vpop.eup %3711  ;;  %v552_v38 = vmul.f32 1.442695, %v529_v29 }
  0xe0   : > { %v4578_v34 = vpop.eup %3713  ;;  %574 = vadd.xlane.f32.xlu1 %v4576_v32  ;;  %v440_v40 = vpop.permute.xlu1 %439  ;;  %v399_v6 = vadd.f32 %v383_v37, %v283_v61 }
  0xe1   : > { %576 = vadd.xlane.f32.xlu0 %v4578_v34  ;;  %v482_v42 = vsub.f32 %v440_v40, %v4513_v46  ;;  %3721 = vpow2.f32 %v552_v38  ;;  %v4583_v43 = vpop.eup %3715 }
  0xe3   : > { %v4586_v41 = vpop.eup %3717  ;;  %v498_v50 = vmul.f32 %v482_v42, %v482_v42 }
  0xe4   : > { %578 = vadd.xlane.f32.xlu1 %v4583_v43 }
  0xe5   : > { %v4592_v53 = vadd.f32 %v498_v50, %v398_v49  ;;  %580 = vadd.xlane.f32.xlu0 %v4586_v41  ;;  %v332_v54 = vpop.permute.xlu1 %331 }
  0xe6   : > { %v368_v57 = vsub.f32 %v332_v54, %v4509_v44 }
  0xe7   : > { %8053 = vst [vmem:[#allocation10_spill] sm:$0xff] %v4592_v53  ;;  %v4598_v59 = vpop.eup %3719  ;;  %v530_v58 = vmul.f32 -65536.0, %v4592_v53 }
  0xe8   : > { %v384_v60 = vmul.f32 %v368_v57, %v368_v57  ;;  %582 = vadd.xlane.f32.xlu1 %v4598_v59 }
  0xe9   : > { %v554_v63 = vmul.f32 1.442695, %v530_v58 }
  0xea   : > { %v400_v24 = vadd.f32 %v384_v60, %v284_v56  ;;  %v444_v2 = vpop.permute.xlu1 %443 }
  0xeb   : > { %v4602_v3 = vpop.eup %3721  ;;  %v483_v25 = vsub.f32 %v444_v2, %v4513_v46  ;;  %3723 = vpow2.f32 %v554_v63  ;;  %v371_v63 = vsub.f32 %v4507_v39, %v4509_v44 }
  0xec   : > { %v4605_v4 = vadd.f32 %v500_v0, %v400_v24  ;;  %584 = vadd.xlane.f32.xlu0 %v4602_v3  ;;  %v252_v0 = vpop.permute.xlu0 %251 }
  0xed   : > { %v499_v7 = vmul.f32 %v483_v25, %v483_v25 }
  0xee   : > { %8054 = vst [vmem:[#allocation11_spill] sm:$0xff] %v4605_v4  ;;  %v532_v8 = vmul.f32 -65536.0, %v4605_v4 }
  0xef   : > { %v4610_v10 = vadd.f32 %v499_v7, %v399_v6  ;;  %v336_v13 = vpop.permute.xlu1 %335  ;;  %v387_v6 = vmul.f32 %v371_v63, %v371_v63 }
  0xf0   : > { %v369_v16 = vsub.f32 %v336_v13, %v4509_v44  ;;  %v558_v17 = vmul.f32 1.442695, %v532_v8  ;;  %v468_v8 = vpop.permute.xlu0 %467 }
  0xf1   : > { %8055 = vst [vmem:[#allocation12_spill] sm:$0xff] %v4610_v10  ;;  %v531_v18 = vmul.f32 -65536.0, %v4610_v10 }
  0xf2   : > { %v385_v19 = vmul.f32 %v369_v16, %v369_v16  ;;  %3725 = vpow2.f32 %v558_v17  ;;  %v489_v16 = vsub.f32 %v468_v8, %v4513_v46 }
  0xf3   : > { %v556_v21 = vmul.f32 1.442695, %v531_v18 }
  0xf4   : > { %v401_v29 = vadd.f32 %v385_v19, %v285_v15  ;;  %v237_v33 = vpop.permute.xlu1 %236  ;;  %v273_v15 = vsub.f32 %v252_v0, %v4515_v48 }
  0xf5   : > { %v4616_v35 = vpop.eup %3723  ;;  %3727 = vpow2.f32 %v556_v21  ;;  %v270_v52 = vsub.f32 %v237_v33, %v4515_v48  ;;  %v372_v21 = vsub.f32 %v4511_v45, %v4509_v44 }
  0xf6   : > { %v4618_v30 = vadd.f32 %v501_v23, %v401_v29  ;;  %586 = vadd.xlane.f32.xlu1 %v4616_v35  ;;  %v289_v29 = vmul.f32 %v273_v15, %v273_v15 }
  0xf7   : > { %v286_v55 = vmul.f32 %v270_v52, %v270_v52 }
  0xf8   : > { %8056 = vst [vmem:[#allocation13_spill] sm:$0xff] %v4618_v30  ;;  %v533_v27 = vmul.f32 -65536.0, %v4618_v30 }
  0xf9   : > { %v340_v38 = vpop.permute.xlu1 %339 }
  0xfa   : > { %v560_v40 = vmul.f32 1.442695, %v533_v27  ;;  %v370_v47 = vsub.f32 %v340_v38, %v4509_v44  ;;  %v505_v27 = vmul.f32 %v489_v16, %v489_v16 }
  0xfc   : > { %v4622_v42 = vpop.eup %3725  ;;  %3729 = vpow2.f32 %v560_v40  ;;  %v386_v22 = vmul.f32 %v370_v47, %v370_v47 }
  0xfd   : > { %590 = vadd.xlane.f32.xlu1 %v4622_v42 }
  0xfe   : > { %v242_v49 = vpop.permute.xlu1 %241  ;;  %v402_v58 = vadd.f32 %v386_v22, %v286_v55 }
  0xff   : > { %v4626_v50 = vpop.eup %3727  ;;  %v271_v37 = vsub.f32 %v242_v49, %v4515_v48 }
 0x100   : > { %588 = vadd.xlane.f32.xlu0 %v4626_v50 }
 0x101   : > { %v287_v2 = vmul.f32 %v271_v37, %v271_v37 }
 0x103   : > { %v456_v54 = vpop.permute.xlu1 %455  ;;  %v403_v13 = vadd.f32 %v387_v6, %v287_v2 }
 0x104   : > { %v486_v56 = vsub.f32 %v456_v54, %v4513_v46 }
 0x106   : > { %v4631_v57 = vpop.eup %3729  ;;  %v502_v60 = vmul.f32 %v486_v56, %v486_v56 }
 0x107   : > { %592 = vadd.xlane.f32.xlu0 %v4631_v57 }
 0x108   : > { %v4635_v61 = vadd.f32 %v502_v60, %v402_v58  ;;  %v247_v62 = vpop.permute.xlu1 %246 }
 0x109   : > { %v272_v17 = vsub.f32 %v247_v62, %v4515_v48  ;;  %v388_v48 = vmul.f32 %v372_v21, %v372_v21 }
 0x10a   : > { %8057 = vst [vmem:[#allocation14_spill] sm:$0xff] %v4635_v61  ;;  %v534_v24 = vmul.f32 -65536.0, %v4635_v61 }
 0x10b   : > { %v288_v38 = vmul.f32 %v272_v17, %v272_v17 }
 0x10c   : > { %v562_v25 = vmul.f32 1.442695, %v534_v24 }
 0x10d   : > { %v460_v5 = vpop.permute.xlu1 %459 }
 0x10e   : > { %v487_v7 = vsub.f32 %v460_v5, %v4513_v46  ;;  %3731 = vpow2.f32 %v562_v25 }
 0x110   : > { %v503_v14 = vmul.f32 %v487_v7, %v487_v7 }
 0x112   : > { %v4644_v39 = vadd.f32 %v503_v14, %v403_v13  ;;  %v352_v18 = vpop.permute.xlu1 %351 }
 0x113   : > { %v373_v19 = vsub.f32 %v352_v18, %v4509_v44  ;;  %v404_v44 = vadd.f32 %v388_v48, %v288_v38 }
 0x114   : > { %8058 = vst [vmem:[#allocation15_spill] sm:$0xff] %v4644_v39  ;;  %v535_v23 = vmul.f32 -65536.0, %v4644_v39 }
 0x115   : > { %v389_v33 = vmul.f32 %v373_v19, %v373_v19 }
 0x116   : > { %v564_v40 = vmul.f32 1.442695, %v535_v23 }
 0x117   : > { %v405_v47 = vadd.f32 %v389_v33, %v289_v29  ;;  %v464_v49 = vpop.permute.xlu1 %463 }
 0x118   : > { %v4650_v52 = vpop.eup %3731  ;;  %v488_v22 = vsub.f32 %v464_v49, %v4513_v46  ;;  %3733 = vpow2.f32 %v564_v40 }
 0x119   : > { %v4653_v54 = vadd.f32 %v505_v27, %v405_v47  ;;  %594 = vadd.xlane.f32.xlu1 %v4650_v52 }
 0x11a   : > { %v504_v45 = vmul.f32 %v488_v22, %v488_v22 }
 0x11b   : > { %8059 = vst [vmem:[#allocation16_spill] sm:$0xff] %v4653_v54  ;;  %v537_v55 = vmul.f32 -65536.0, %v4653_v54 }
 0x11c   : > { %v4657_v56 = vadd.f32 %v504_v45, %v404_v44 }
 0x11d   : > { %v568_v58 = vmul.f32 1.442695, %v537_v55 }
 0x11e   : > { %8060 = vst [vmem:[#allocation17_spill] sm:$0xff] %v4657_v56  ;;  %v536_v60 = vmul.f32 -65536.0, %v4657_v56 }
 0x11f   : > { %3735 = vpow2.f32 %v568_v58 }
 0x120   : > { %v566_v37 = vmul.f32 1.442695, %v536_v60 }
 0x122   : > { %v4660_v62 = vpop.eup %3733  ;;  %3737 = vpow2.f32 %v566_v37 }
 0x123   : > { %596 = vadd.xlane.f32.xlu0 %v4660_v62 }
 0x129   : > { %v4663_v46 = vpop.eup %3735 }
 0x12a   : > { %600 = vadd.xlane.f32.xlu0 %v4663_v46 }
 0x12c   : > { %v4666_v63 = vpop.eup %3737 }
 0x12d   : > { %598 = vadd.xlane.f32.xlu1 %v4666_v63 }
 0x165   : > { %v571_v0 = vpop.xlane.xlu1 %570 }
 0x166   : > { %v602_v5 = vadd.f32 1e-09, %v571_v0 }
 0x169   : > { %v573_v24 = vpop.xlane.xlu0 %572 }
 0x16a   : > { %v603_v25 = vadd.f32 1e-09, %v573_v24 }
 0x16c   : > { %3739 = vrcp.f32 %v603_v25 }
 0x16d   : > { %v575_v2 = vpop.xlane.xlu1 %574  ;;  %3741 = vrcp.f32 %v602_v5 }
 0x16e   : > { %v604_v6 = vadd.f32 1e-09, %v575_v2  ;;  %v577_v7 = vpop.xlane.xlu0 %576 }
 0x16f   : > { %v605_v13 = vadd.f32 1e-09, %v577_v7 }
 0x170   : > { %3743 = vrcp.f32 %v604_v6 }
 0x171   : > { %v579_v8 = vpop.xlane.xlu1 %578  ;;  %3745 = vrcp.f32 %v605_v13 }
 0x172   : > { %v606_v14 = vadd.f32 1e-09, %v579_v8  ;;  %v581_v15 = vpop.xlane.xlu0 %580 }
 0x173   : > { %v607_v21 = vadd.f32 1e-09, %v581_v15 }
 0x174   : > { %3747 = vrcp.f32 %v606_v14 }
 0x175   : > { %v583_v18 = vpop.xlane.xlu1 %582  ;;  %3749 = vrcp.f32 %v607_v21 }
 0x176   : > { %v3740_v16 = vpop.eup %3739  ;;  %v608_v33 = vadd.f32 1e-09, %v583_v18 }
 0x177   : > { %v3742_v17 = vpop.eup %3741  ;;  %v4670_v29 = vmul.f32 %v3740_v16, %v4572_v26 }
 0x178   : > { %v4673_v38 = vmul.f32 %v3742_v17, %v4560_v9  ;;  %3751 = vrcp.f32 %v608_v33 }
 0x179   : > { %v585_v23 = vpop.xlane.xlu0 %584 }
 0x17a   : > { %v3744_v19 = vpop.eup %3743  ;;  %v609_v47 = vadd.f32 1e-09, %v585_v23  ;;  %v650_v48 = vadd.f32 %v4670_v29, %v4673_v38 }
 0x17b   : > { %v4676_v40 = vmul.f32 %v3744_v19, %v4576_v32  ;;  %v3746_v22 = vpop.eup %3745 }
 0x17c   : > { %3753 = vrcp.f32 %v609_v47  ;;  %v4682_v9 = vmul.f32 %v3746_v22, %v4578_v34 }
 0x17d   : > { %v651_v26 = vadd.f32 %v650_v48, %v4676_v40 }
 0x17e   : > { %v3748_v45 = vpop.eup %3747 }
 0x17f   : > { %v4685_v32 = vmul.f32 %v3748_v45, %v4583_v43  ;;  %v652_v37 = vadd.f32 %v651_v26, %v4682_v9  ;;  %v3750_v2 = vpop.eup %3749 }
 0x180   : > { %v4690_v34 = vmul.f32 %v3750_v2, %v4586_v41 }
 0x181   : > { %v653_v6 = vadd.f32 %v652_v37, %v4685_v32 }
 0x182   : > { %v3752_v7 = vpop.eup %3751 }
 0x183   : > { %v587_v27 = vpop.xlane.xlu1 %586  ;;  %v4693_v14 = vmul.f32 %v3752_v7, %v4598_v59  ;;  %v654_v15 = vadd.f32 %v653_v6, %v4690_v34 }
 0x184   : > { %v610_v44 = vadd.f32 1e-09, %v587_v27 }
 0x185   : > { %v655_v23 = vadd.f32 %v654_v15, %v4693_v14 }
 0x186   : > { %3755 = vrcp.f32 %v610_v44  ;;  %v3754_v13 = vpop.eup %3753 }
 0x187   : > { %v4697_v17 = vmul.f32 %v3754_v13, %v4602_v3 }
 0x189   : > { %v656_v27 = vadd.f32 %v655_v23, %v4697_v17 }
 0x18a   : > { %v591_v58 = vpop.xlane.xlu1 %590 }
 0x18b   : > { %v612_v0 = vadd.f32 1e-09, %v591_v58 }
 0x18d   : > { %v589_v49 = vpop.xlane.xlu0 %588 }
 0x18e   : > { %v611_v55 = vadd.f32 1e-09, %v589_v49 }
 0x190   : > { %3757 = vrcp.f32 %v611_v55  ;;  %v3756_v16 = vpop.eup %3755 }
 0x191   : > { %3759 = vrcp.f32 %v612_v0  ;;  %v4700_v41 = vmul.f32 %v3756_v16, %v4616_v35  ;;  %v776_v16 = vmul.f32 -16384.0, %v4548_v51 }
 0x193   : > { %v657_v3 = vadd.f32 %v656_v27, %v4700_v41 }
 0x194   : > { %v593_v60 = vpop.xlane.xlu0 %592 }
 0x195   : > { %v613_v25 = vadd.f32 1e-09, %v593_v60 }
 0x197   : > { %3761 = vrcp.f32 %v613_v25 }
 0x19a   : > { %v3758_v18 = vpop.eup %3757 }
 0x19b   : > { %v4704_v33 = vmul.f32 %v3758_v18, %v4626_v50  ;;  %v3760_v49 = vpop.eup %3759  ;;  %v778_v18 = vmul.f32 -16384.0, %v4542_v36 }
 0x19c   : > { %v4710_v44 = vmul.f32 %v3760_v49, %v4622_v42 }
 0x19d   : > { %v658_v22 = vadd.f32 %v657_v3, %v4704_v33  ;;  %v798_v23 = vmul.f32 1.442695, %v778_v18  ;;  %v775_v3 = vmul.f32 -16384.0, %v4538_v31 }
 0x19f   : > { %v659_v55 = vadd.f32 %v658_v22, %v4710_v44 }
 0x1a1   : > { %v3762_v48 = vpop.eup %3761 }
 0x1a2   : > { %v4713_v26 = vmul.f32 %v3762_v48, %v4631_v57 }
 0x1a4   : > { %v660_v60 = vadd.f32 %v659_v55, %v4713_v26 }
 0x1a6   : > { %v595_v24 = vpop.xlane.xlu1 %594 }
 0x1a7   : > { %v614_v8 = vadd.f32 1e-09, %v595_v24 }
 0x1a9   : > { %3763 = vrcp.f32 %v614_v8 }
 0x1b0   : > { %v597_v5 = vpop.xlane.xlu0 %596 }
 0x1b1   : > { %v615_v43 = vadd.f32 1e-09, %v597_v5 }
 0x1b3   : > { %3765 = vrcp.f32 %v615_v43  ;;  %v3764_v35 = vpop.eup %3763 }
 0x1b4   : > { %v4716_v45 = vmul.f32 %v3764_v35, %v4650_v52  ;;  %v781_v35 = vmul.f32 -16384.0, %v4570_v20 }
 0x1b6   : > { %v661_v0 = vadd.f32 %v660_v60, %v4716_v45  ;;  %v777_v60 = vmul.f32 -16384.0, %v4535_v28 }
 0x1b7   : > { %v601_v19 = vpop.xlane.xlu0 %600 }
 0x1b8   : > { %v617_v21 = vadd.f32 1e-09, %v601_v19 }
 0x1ba   : > { %v599_v59 = vpop.xlane.xlu1 %598  ;;  %3767 = vrcp.f32 %v617_v21 }
 0x1bb   : > { %v616_v47 = vadd.f32 1e-09, %v599_v59  ;;  %v780_v59 = vmul.f32 -16384.0, %v4562_v12 }
 0x1bd   : > { %3769 = vrcp.f32 %v616_v47  ;;  %v3766_v50 = vpop.eup %3765  ;;  %v802_v22 = vmul.f32 1.442695, %v780_v59 }
 0x1be   : > { %v4720_v58 = vmul.f32 %v3766_v50, %v4660_v62 }
 0x1c0   : > { %v662_v57 = vadd.f32 %v661_v0, %v4720_v58  ;;  %v804_v0 = vmul.f32 1.442695, %v781_v35 }
 0x1c4   : > { %v3768_v37 = vpop.eup %3767 }
 0x1c5   : > { %v4729_v2 = vmul.f32 %v3768_v37, %v4663_v46  ;;  %v794_v46 = vmul.f32 1.442695, %v776_v16 }
 0x1c7   : > { %v3770_v24 = vpop.eup %3769 }
 0x1c8   : > { %v4725_v42 = vmul.f32 %v3770_v24, %v4666_v63  ;;  %v774_v63 = vmul.f32 -16384.0, %v4530_v11  ;;  %v782_v24 = vmul.f32 -16384.0, %v4592_v53 }
 0x1ca   : > { %v663_v52 = vadd.f32 %v662_v57, %v4725_v42  ;;  %v790_v15 = vmul.f32 1.442695, %v774_v63  ;;  %v784_v63 = vmul.f32 -16384.0, %v4605_v4 }
 0x1cc   : > { %v664_v25 = vadd.f32 %v663_v52, %v4729_v2  ;;  %v796_v52 = vmul.f32 1.442695, %v777_v60  ;;  %v810_v18 = vmul.f32 1.442695, %v784_v63  ;;  %v789_v63 = vmul.f32 -16384.0, %v4653_v54 }
 0x1ce   : > { %v665_v62 = vrot.slane %v664_v25, 4 }
 0x1d0   : > { %v666_v5 = vadd.f32 %v665_v62, %v664_v25  ;;  %v779_v25 = vmul.f32 -16384.0, %v4557_v1 }
 0x1d2   : > { %v667_v6 = vrot.slane %v666_v5, 2 }
 0x1d4   : > { %v668_v7 = vadd.f32 %v667_v6, %v666_v5  ;;  %v806_v5 = vmul.f32 1.442695, %v782_v24  ;;  %v783_v6 = vmul.f32 -16384.0, %v4610_v10 }
 0x1d6   : > { %v669_v8 = vrot.slane %v668_v7, 1 }
 0x1d8   : > { %v670_v13 = vadd.f32 %v669_v8, %v668_v7  ;;  %v800_v8 = vmul.f32 1.442695, %v779_v25 }
 0x1da   : > { %v671_v43 = vadd.f32 1e-09, %v670_v13 }
 0x1dc   : > { %3771 = vrcp.f32 %v671_v43  ;;  %v808_v43 = vmul.f32 1.442695, %v783_v6 }
 0x1dd   : > { %3773 = vpow2.f32 %v790_v15 }
 0x1de   : > { %3775 = vpow2.f32 %v794_v46 }
 0x1df   : > { %3777 = vpow2.f32 %v798_v23 }
 0x1e0   : > { %3779 = vpow2.f32 %v802_v22 }
 0x1e6   : > { %v3772_v19 = vpop.eup %3771 }
 0x1e7   : > { %v4736_v21 = vmin.f32 %v3772_v19, 1.0  ;;  %v3774_v55 = vpop.eup %3773  ;;  %v785_v19 = vmul.f32 -16384.0, %v4618_v30 }
 0x1e9   : > { %v4741_v27 = vmul.f32 %v4736_v21, %v4670_v29  ;;  %v755_v47 = vmul.f32 %v4736_v21, %v670_v13  ;;  %v4746_v49 = vmul.f32 %v4736_v21, %v4673_v38  ;;  %v4756_v29 = vmul.f32 %v4736_v21, %v4676_v40  ;;  %v3776_v40 = vpop.eup %3775 }
 0x1ea   : > { %v792_v38 = vmul.f32 1.442695, %v775_v3  ;;  %v4767_v57 = vmul.f32 %v4736_v21, %v4682_v9  ;;  %v4778_v9 = vmul.f32 %v4736_v21, %v4685_v32  ;;  %v3778_v7 = vpop.eup %3777  ;;  %v4788_v15 = vmul.f32 %v4736_v21, %v4690_v34 }
 0x1eb   : > { %8061 = vst [vmem:[#allocation18_spill] sm:$0xff] %v4741_v27  ;;  %8062 = vst [vmem:[#allocation19_spill] sm:$0xff] %v4746_v49  ;;  %v756_v48 = vsub.f32 1.0, %v755_v47  ;;  %693 = vadd.xlane.f32.xlu0 %v4741_v27  ;;  %691 = vadd.xlane.f32.xlu1 %v4746_v49  ;;  %v3780_v32 = vpop.eup %3779  ;;  %v812_v3 = vmul.f32 1.442695, %v785_v19  ;;  %v4825_v6 = vmul.f32 %v4736_v21, %v4693_v14 }
 0x1ec   : > { %8063 = vst [vmem:[#allocation20_spill] sm:$0xff] %v4756_v29  ;;  %8064 = vst [vmem:[#allocation21_spill] sm:$0xff] %v4767_v57  ;;  %3781 = vpow2.f32 %v792_v38  ;;  %v4844_v19 = vmul.f32 %v4736_v21, %v4700_v41  ;;  %v4862_v41 = vmul.f32 %v4736_v21, %v4710_v44  ;;  %v4880_v44 = vmul.f32 %v4736_v21, %v4720_v58 }
 0x1ed   : > { %v4752_v50 = vmax.f32 %v756_v48, 0.0  ;;  %3783 = vpow2.f32 %v804_v0  ;;  %8065 = vst [vmem:[#allocation22_spill] sm:$0xff] %v4778_v9  ;;  %8066 = vst [vmem:[#allocation23_spill] sm:$0xff] %v4788_v15  ;;  %v786_v48 = vmul.f32 -16384.0, %v4635_v61  ;;  %v787_v0 = vmul.f32 -16384.0, %v4644_v39 }
 0x1ee   : > { %3785 = vpow2.f32 %v796_v52  ;;  %8067 = vst [vmem:[#allocation24_spill] sm:$0xff] %v4825_v6  ;;  %8069 = vst [vmem:[#allocation26_spill] sm:$0xff] %v4844_v19 }
 0x1ef   : > { %695 = vadd.xlane.f32.xlu0 %v4756_v29  ;;  %v4761_v37 = vmul.f32 %v3774_v55, %v4752_v50  ;;  %v4772_v62 = vmul.f32 %v3776_v40, %v4752_v50  ;;  %v4782_v13 = vmul.f32 %v3778_v7, %v4752_v50  ;;  %3787 = vpow2.f32 %v806_v5  ;;  %8071 = vst [vmem:[#allocation28_spill] sm:$0xff] %v4862_v41 }
 0x1f0   : > { %3789 = vpow2.f32 %v800_v8  ;;  %v4792_v16 = vmul.f32 %v3780_v32, %v4752_v50  ;;  %v814_v60 = vmul.f32 1.442695, %v786_v48  ;;  %v816_v25 = vmul.f32 1.442695, %v787_v0  ;;  %8073 = vst [vmem:[#allocation30_spill] sm:$0xff] %v4880_v44 }
 0x1f1   : > { %838 = vadd.xlane.f32.xlu1 %v4761_v37  ;;  %3791 = vpow2.f32 %v808_v43  ;;  %v788_v5 = vmul.f32 -16384.0, %v4657_v56  ;;  %v4835_v32 = vmul.f32 %v4736_v21, %v4697_v17 }
 0x1f2   : > { %3793 = vpow2.f32 %v810_v18  ;;  %v820_v18 = vmul.f32 1.442695, %v789_v63 }
 0x1f3   : > { %697 = vadd.xlane.f32.xlu0 %v4767_v57  ;;  %3795 = vpow2.f32 %v812_v3  ;;  %v818_v43 = vmul.f32 1.442695, %v788_v5  ;;  %8068 = vst [vmem:[#allocation25_spill] sm:$0xff] %v4835_v32 }
 0x1f4   : > { %3797 = vpow2.f32 %v814_v60 }
 0x1f5   : > { %842 = vadd.xlane.f32.xlu1 %v4772_v62  ;;  %3799 = vpow2.f32 %v816_v25  ;;  %v4895_v25 = vmul.f32 %v4736_v21, %v4725_v42 }
 0x1f6   : > { %v3782_v46 = vpop.eup %3781  ;;  %3801 = vpow2.f32 %v818_v43 }
 0x1f7   : > { %699 = vadd.xlane.f32.xlu0 %v4778_v9  ;;  %v4797_v23 = vmul.f32 %v3782_v46, %v4752_v50  ;;  %v3784_v59 = vpop.eup %3783  ;;  %3803 = vpow2.f32 %v820_v18  ;;  %8076 = vst [vmem:[#allocation33_spill] sm:$0xff] %v4895_v25 }
 0x1f8   : > { %v4801_v34 = vmul.f32 %v3784_v59, %v4752_v50  ;;  %v3786_v47 = vpop.eup %3785 }
 0x1f9   : > { %846 = vadd.xlane.f32.xlu1 %v4782_v13  ;;  %v4806_v22 = vmul.f32 %v3786_v47, %v4752_v50  ;;  %v3788_v35 = vpop.eup %3787  ;;  %v4853_v47 = vmul.f32 %v4736_v21, %v4704_v33  ;;  %v4871_v33 = vmul.f32 %v4736_v21, %v4713_v26  ;;  %v4890_v26 = vmul.f32 %v4736_v21, %v4729_v2 }
 0x1fa   : > { %v4810_v55 = vmul.f32 %v3788_v35, %v4752_v50  ;;  %v3790_v38 = vpop.eup %3789 }
 0x1fb   : > { %701 = vadd.xlane.f32.xlu0 %v4788_v15  ;;  %v4815_v24 = vmul.f32 %v3790_v38, %v4752_v50  ;;  %v3792_v40 = vpop.eup %3791  ;;  %8070 = vst [vmem:[#allocation27_spill] sm:$0xff] %v4853_v47  ;;  %8072 = vst [vmem:[#allocation29_spill] sm:$0xff] %v4871_v33 }
 0x1fc   : > { %v4819_v52 = vmul.f32 %v3792_v40, %v4752_v50  ;;  %v3794_v7 = vpop.eup %3793  ;;  %v4885_v40 = vmul.f32 %v4736_v21, %v4716_v45  ;;  %8075 = vst [vmem:[#allocation32_spill] sm:$0xff] %v4890_v26 }
 0x1fd   : > { %850 = vadd.xlane.f32.xlu1 %v4792_v16  ;;  %v4829_v8 = vmul.f32 %v3794_v7, %v4752_v50  ;;  %v3796_v46 = vpop.eup %3795 }
 0x1fe   : > { %v4839_v14 = vmul.f32 %v3796_v46, %v4752_v50  ;;  %v3798_v59 = vpop.eup %3797  ;;  %8074 = vst [vmem:[#allocation31_spill] sm:$0xff] %v4885_v40 }
 0x1ff   : > { %840 = vadd.xlane.f32.xlu0 %v4797_v23  ;;  %v4848_v17 = vmul.f32 %v3798_v59, %v4752_v50  ;;  %v3800_v3 = vpop.eup %3799 }
 0x200   : > { %v4857_v48 = vmul.f32 %v3800_v3, %v4752_v50  ;;  %v3802_v35 = vpop.eup %3801 }
 0x201   : > { %852 = vadd.xlane.f32.xlu1 %v4801_v34  ;;  %v4866_v38 = vmul.f32 %v3802_v35, %v4752_v50  ;;  %v3804_v60 = vpop.eup %3803 }
 0x202   : > { %v4875_v0 = vmul.f32 %v3804_v60, %v4752_v50 }
 0x203   : > { %844 = vadd.xlane.f32.xlu0 %v4806_v22 }
 0x205   : > { %854 = vadd.xlane.f32.xlu1 %v4810_v55 }
 0x207   : > { %848 = vadd.xlane.f32.xlu0 %v4815_v24 }
 0x209   : > { %856 = vadd.xlane.f32.xlu1 %v4819_v52 }
 0x20b   : > { %703 = vadd.xlane.f32.xlu0 %v4825_v6 }
 0x20d   : > { %858 = vadd.xlane.f32.xlu1 %v4829_v8 }
 0x20f   : > { %705 = vadd.xlane.f32.xlu0 %v4835_v32 }
 0x211   : > { %860 = vadd.xlane.f32.xlu1 %v4839_v14 }
 0x213   : > { %707 = vadd.xlane.f32.xlu0 %v4844_v19 }
 0x215   : > { %862 = vadd.xlane.f32.xlu1 %v4848_v17 }
 0x217   : > { %709 = vadd.xlane.f32.xlu0 %v4853_v47 }
 0x219   : > { %864 = vadd.xlane.f32.xlu1 %v4857_v48 }
 0x21b   : > { %711 = vadd.xlane.f32.xlu0 %v4862_v41 }
 0x21d   : > { %866 = vadd.xlane.f32.xlu1 %v4866_v38 }
 0x21f   : > { %713 = vadd.xlane.f32.xlu0 %v4871_v33 }
 0x221   : > { %868 = vadd.xlane.f32.xlu1 %v4875_v0 }
 0x223   : > { %717 = vadd.xlane.f32.xlu0 %v4880_v44 }
 0x225   : > { %715 = vadd.xlane.f32.xlu1 %v4885_v40 }
 0x227   : > { %721 = vadd.xlane.f32.xlu0 %v4890_v26 }
 0x229   : > { %719 = vadd.xlane.f32.xlu1 %v4895_v25 }
 0x278   : > { %v694_v58 = vpop.xlane.xlu0 %693  ;;  %v692_v5 = vpop.xlane.xlu1 %691 }
 0x279   : > { %v723_v44 = vsub.f32 1.0, %v692_v5  ;;  %v724_v19 = vsub.f32 1.0, %v694_v58 }
 0x27c   : > { %v696_v7 = vpop.xlane.xlu0 %695 }
 0x27d   : > { %v725_v47 = vsub.f32 1.0, %v696_v7 }
 0x27e   : > { %v839_v43 = vpop.xlane.xlu1 %838 }
 0x27f   : > { %v870_v59 = vadd.f32 1e-09, %v839_v43 }
 0x280   : > { %v698_v45 = vpop.xlane.xlu0 %697 }
 0x281   : > { %3805 = vrcp.f32 %v870_v59  ;;  %v4898_v59 = vmax.f32 %v723_v44, 0.0  ;;  %v726_v5 = vsub.f32 1.0, %v698_v45 }
 0x282   : > { %v843_v63 = vpop.xlane.xlu1 %842 }
 0x283   : > { %v872_v3 = vadd.f32 1e-09, %v843_v63 }
 0x284   : > { %v700_v46 = vpop.xlane.xlu0 %699 }
 0x285   : > { %3807 = vrcp.f32 %v872_v3  ;;  %v4900_v3 = vmax.f32 %v725_v47, 0.0 }
 0x286   : > { %v847_v18 = vpop.xlane.xlu1 %846 }
 0x287   : > { %v874_v60 = vadd.f32 1e-09, %v847_v18 }
 0x288   : > { %v702_v2 = vpop.xlane.xlu0 %701 }
 0x28a   : > { %v851_v35 = vpop.xlane.xlu1 %850 }
 0x28b   : > { %v876_v33 = vadd.f32 1e-09, %v851_v35  ;;  %v3806_v63 = vpop.eup %3805 }
 0x28c   : > { %v841_v26 = vpop.xlane.xlu0 %840 }
 0x28d   : > { %v871_v42 = vadd.f32 1e-09, %v841_v26 }
 0x28e   : > { %v853_v21 = vpop.xlane.xlu1 %852 }
 0x28f   : > { %3809 = vrcp.f32 %v871_v42  ;;  %v3808_v6 = vpop.eup %3807  ;;  %v877_v18 = vadd.f32 1e-09, %v853_v21 }
 0x290   : > { %3811 = vrcp.f32 %v874_v60  ;;  %v845_v25 = vpop.xlane.xlu0 %844  ;;  %v727_v60 = vsub.f32 1.0, %v700_v46  ;;  %v904_v7 = vmul.f32 %v3808_v6, %v4900_v3 }
 0x291   : > { %v873_v40 = vadd.f32 1e-09, %v845_v25  ;;  %v4902_v25 = vmax.f32 %v724_v19, 0.0  ;;  %v728_v19 = vsub.f32 1.0, %v702_v2 }
 0x292   : > { %v855_v41 = vpop.xlane.xlu1 %854  ;;  %v4907_v47 = vmax.f32 %v727_v60, 0.0 }
 0x293   : > { %3813 = vrcp.f32 %v873_v40  ;;  %v902_v40 = vmul.f32 %v3806_v63, %v4898_v59  ;;  %v878_v44 = vadd.f32 1e-09, %v855_v41 }
 0x294   : > { %v849_v43 = vpop.xlane.xlu0 %848  ;;  %3815 = vrcp.f32 %v876_v33 }
 0x295   : > { %v875_v32 = vadd.f32 1e-09, %v849_v43  ;;  %v4912_v15 = vmul.f32 %v902_v40, %v4761_v37 }
 0x296   : > { %v857_v26 = vpop.xlane.xlu1 %856 }
 0x297   : > { %3817 = vrcp.f32 %v875_v32  ;;  %v879_v46 = vadd.f32 1e-09, %v857_v26  ;;  %v4909_v32 = vmax.f32 %v726_v5, 0.0 }
 0x298   : > { %v704_v35 = vpop.xlane.xlu0 %703  ;;  %3819 = vrcp.f32 %v877_v18 }
 0x299   : > { %v3810_v58 = vpop.eup %3809  ;;  %v729_v43 = vsub.f32 1.0, %v704_v35  ;;  %v4919_v35 = vmul.f32 %v904_v7, %v4772_v62  ;;  %3821 = vrcp.f32 %v878_v44 }
 0x29a   : > { %v3812_v42 = vpop.eup %3811  ;;  %v859_v33 = vpop.xlane.xlu1 %858  ;;  %v903_v21 = vmul.f32 %v3810_v58, %v4902_v25  ;;  %3823 = vrcp.f32 %v879_v46 }
 0x29b   : > { %v906_v41 = vmul.f32 %v3812_v42, %v4907_v47  ;;  %v4922_v26 = vmax.f32 %v729_v43, 0.0  ;;  %v880_v40 = vadd.f32 1e-09, %v859_v33 }
 0x29c   : > { %v706_v45 = vpop.xlane.xlu0 %705  ;;  %v4915_v63 = vmul.f32 %v903_v21, %v4797_v23  ;;  %v4926_v23 = vmax.f32 %v728_v19, 0.0 }
 0x29d   : > { %v3814_v6 = vpop.eup %3813  ;;  %v730_v18 = vsub.f32 1.0, %v706_v45  ;;  %v4935_v43 = vmul.f32 %v906_v41, %v4782_v13  ;;  %3825 = vrcp.f32 %v880_v40 }
 0x29e   : > { %v905_v60 = vmul.f32 %v3814_v6, %v4909_v32  ;;  %v861_v2 = vpop.xlane.xlu1 %860  ;;  %v934_v37 = vadd.f32 %v4915_v63, %v4912_v15  ;;  %v3816_v5 = vpop.eup %3815 }
 0x29f   : > { %v4932_v21 = vmax.f32 %v730_v18, 0.0  ;;  %v908_v46 = vmul.f32 %v3816_v5, %v4922_v26  ;;  %v881_v19 = vadd.f32 1e-09, %v861_v2 }
 0x2a0   : > { %v708_v58 = vpop.xlane.xlu0 %707  ;;  %v4929_v42 = vmul.f32 %v905_v60, %v4806_v22  ;;  %v935_v62 = vadd.f32 %v934_v37, %v4919_v35 }
 0x2a1   : > { %v3818_v7 = vpop.eup %3817  ;;  %v731_v44 = vsub.f32 1.0, %v708_v58  ;;  %v4948_v58 = vmul.f32 %v908_v46, %v4792_v16  ;;  %3827 = vrcp.f32 %v881_v19 }
 0x2a2   : > { %v907_v45 = vmul.f32 %v3818_v7, %v4926_v23  ;;  %v863_v6 = vpop.xlane.xlu1 %862  ;;  %v936_v33 = vadd.f32 %v935_v62, %v4929_v42  ;;  %v3820_v9 = vpop.eup %3819 }
 0x2a3   : > { %v909_v37 = vmul.f32 %v3820_v9, %v4932_v21  ;;  %v4945_v13 = vmax.f32 %v731_v44, 0.0  ;;  %v3822_v7 = vpop.eup %3821  ;;  %v882_v40 = vadd.f32 1e-09, %v863_v6 }
 0x2a4   : > { %v4941_v22 = vmul.f32 %v907_v45, %v4815_v24  ;;  %v710_v60 = vpop.xlane.xlu0 %709  ;;  %v937_v18 = vadd.f32 %v936_v33, %v4935_v43  ;;  %v3824_v57 = vpop.eup %3823 }
 0x2a5   : > { %v732_v41 = vsub.f32 1.0, %v710_v60  ;;  %v4955_v9 = vmul.f32 %v909_v37, %v4801_v34  ;;  %v910_v44 = vmul.f32 %v3822_v7, %v4945_v13 }
 0x2a6   : > { %v865_v2 = vpop.xlane.xlu1 %864  ;;  %v938_v5 = vadd.f32 %v937_v18, %v4941_v22 }
 0x2a7   : > { %v4951_v62 = vmax.f32 %v732_v41, 0.0  ;;  %v883_v24 = vadd.f32 1e-09, %v865_v2  ;;  %v4963_v2 = vmul.f32 %v910_v44, %v4810_v55  ;;  %v3826_v34 = vpop.eup %3825 }
 0x2a8   : > { %v712_v45 = vpop.xlane.xlu0 %711  ;;  %v939_v33 = vadd.f32 %v938_v5, %v4948_v58 }
 0x2a9   : > { %v733_v16 = vsub.f32 1.0, %v712_v45  ;;  %v911_v46 = vmul.f32 %v3824_v57, %v4951_v62  ;;  %3829 = vrcp.f32 %v883_v24 }
 0x2aa   : > { %v867_v19 = vpop.xlane.xlu1 %866  ;;  %v940_v18 = vadd.f32 %v939_v33, %v4955_v9  ;;  %3831 = vrcp.f32 %v882_v40 }
 0x2ab   : > { %v4959_v60 = vmax.f32 %v733_v16, 0.0  ;;  %v884_v6 = vadd.f32 1e-09, %v867_v19  ;;  %v4966_v37 = vmul.f32 %v911_v46, %v4819_v52  ;;  %v3828_v33 = vpop.eup %3827 }
 0x2ac   : > { %v714_v41 = vpop.xlane.xlu0 %713  ;;  %v941_v16 = vadd.f32 %v940_v18, %v4963_v2 }
 0x2ad   : > { %v734_v5 = vsub.f32 1.0, %v714_v41  ;;  %v912_v57 = vmul.f32 %v3826_v34, %v4959_v60  ;;  %3833 = vrcp.f32 %v884_v6 }
 0x2ae   : > { %v869_v7 = vpop.xlane.xlu1 %868 }
 0x2af   : > { %v4969_v24 = vmax.f32 %v734_v5, 0.0  ;;  %v885_v45 = vadd.f32 1e-09, %v869_v7  ;;  %v4974_v41 = vmul.f32 %v912_v57, %v4829_v8  ;;  %v942_v5 = vadd.f32 %v941_v16, %v4966_v37 }
 0x2b0   : > { %v718_v40 = vpop.xlane.xlu0 %717 }
 0x2b1   : > { %v913_v19 = vmul.f32 %v3828_v33, %v4969_v24  ;;  %3835 = vrcp.f32 %v885_v45  ;;  %v736_v55 = vsub.f32 1.0, %v718_v40 }
 0x2b2   : > { %v716_v44 = vpop.xlane.xlu1 %715 }
 0x2b3   : > { %v4976_v52 = vmax.f32 %v736_v55, 0.0  ;;  %v735_v46 = vsub.f32 1.0, %v716_v44  ;;  %v3830_v34 = vpop.eup %3829  ;;  %v4980_v18 = vmul.f32 %v913_v19, %v4839_v14  ;;  %v943_v55 = vadd.f32 %v942_v5, %v4974_v41 }
 0x2b4   : > { %v722_v7 = vpop.xlane.xlu0 %721  ;;  %v3832_v29 = vpop.eup %3831 }
 0x2b5   : > { %v4982_v6 = vmax.f32 %v735_v46, 0.0  ;;  %v738_v33 = vsub.f32 1.0, %v722_v7  ;;  %v915_v40 = vmul.f32 %v3830_v34, %v4976_v52  ;;  %v944_v14 = vadd.f32 %v943_v55, %v4980_v18 }
 0x2b6   : > { %v720_v45 = vpop.xlane.xlu1 %719 }
 0x2b7   : > { %v914_v8 = vmul.f32 %v3832_v29, %v4982_v6  ;;  %v737_v57 = vsub.f32 1.0, %v720_v45  ;;  %v3834_v19 = vpop.eup %3833  ;;  %v4993_v46 = vmax.f32 %v738_v33, 0.0  ;;  %v4996_v7 = vmul.f32 %v915_v40, %v4857_v48 }
 0x2b9   : > { %v4988_v44 = vmul.f32 %v914_v8, %v4848_v17  ;;  %v4990_v16 = vmax.f32 %v737_v57, 0.0 }
 0x2bb   : > { %8077 = vst [vmem:[#allocation34_spill] sm:$0xff] %v4990_v16  ;;  %v3836_v49 = vpop.eup %3835  ;;  %v916_v34 = vmul.f32 %v3834_v19, %v4990_v16  ;;  %v945_v29 = vadd.f32 %v944_v14, %v4988_v44 }
 0x2bc   : > { %v917_v5 = vmul.f32 %v3836_v49, %v4993_v46  ;;  %v1058_v49 = vmul.f32 -4096.0, %v4530_v11 }
 0x2bd   : > { %v5002_v17 = vmul.f32 %v916_v34, %v4866_v38  ;;  %v946_v45 = vadd.f32 %v945_v29, %v4996_v7  ;;  %v1060_v34 = vmul.f32 -4096.0, %v4548_v51 }
 0x2be   : > { %v5006_v8 = vmul.f32 %v917_v5, %v4875_v0  ;;  %v1074_v38 = vmul.f32 1.442695, %v1058_v49  ;;  %v1062_v5 = vmul.f32 -4096.0, %v4542_v36 }
 0x2bf   : > { %v947_v33 = vadd.f32 %v946_v45, %v5002_v17  ;;  %v1078_v0 = vmul.f32 1.442695, %v1060_v34 }
 0x2c1   : > { %v948_v57 = vadd.f32 %v947_v33, %v5006_v8 }
 0x2c3   : > { %v949_v48 = vrot.slane %v948_v57, 4 }
 0x2c5   : > { %v950_v40 = vadd.f32 %v949_v48, %v948_v57  ;;  %v1082_v57 = vmul.f32 1.442695, %v1062_v5  ;;  %v1066_v5 = vmul.f32 -4096.0, %v4592_v53 }
 0x2c7   : > { %v951_v55 = vrot.slane %v950_v40, 2 }
 0x2c9   : > { %v952_v19 = vadd.f32 %v951_v55, %v950_v40  ;;  %v1059_v55 = vmul.f32 -4096.0, %v4538_v31 }
 0x2cb   : > { %v953_v27 = vrot.slane %v952_v19, 1  ;;  %v1076_v34 = vmul.f32 1.442695, %v1059_v55  ;;  %v1090_v55 = vmul.f32 1.442695, %v1066_v5 }
 0x2cd   : > { %v954_v14 = vadd.f32 %v953_v27, %v952_v19  ;;  %v1064_v27 = vmul.f32 -4096.0, %v4562_v12 }
 0x2cf   : > { %v955_v16 = vadd.f32 1e-09, %v954_v14  ;;  %v1086_v49 = vmul.f32 1.442695, %v1064_v27  ;;  %v1063_v27 = vmul.f32 -4096.0, %v4557_v1 }
 0x2d1   : > { %3837 = vrcp.f32 %v955_v16 }
 0x2d2   : > { %3839 = vpow2.f32 %v1074_v38  ;;  %v1065_v38 = vmul.f32 -4096.0, %v4570_v20 }
 0x2d3   : > { %3841 = vpow2.f32 %v1078_v0 }
 0x2d4   : > { %3843 = vpow2.f32 %v1082_v57  ;;  %v1088_v0 = vmul.f32 1.442695, %v1065_v38  ;;  %v1084_v38 = vmul.f32 1.442695, %v1063_v27  ;;  %v1069_v27 = vmul.f32 -4096.0, %v4618_v30 }
 0x2d5   : > { %3845 = vpow2.f32 %v1086_v49 }
 0x2d6   : > { %3847 = vpow2.f32 %v1076_v34 }
 0x2d7   : > { %3849 = vpow2.f32 %v1088_v0 }
 0x2db   : > { %v3838_v29 = vpop.eup %3837 }
 0x2dc   : > { %v957_v45 = vmul.f32 %v3838_v29, %v4752_v50  ;;  %v1061_v29 = vmul.f32 -4096.0, %v4535_v28 }
 0x2de   : > { %v5014_v33 = vmin.f32 %v957_v45, 1.0  ;;  %v1080_v57 = vmul.f32 1.442695, %v1061_v29  ;;  %v1068_v29 = vmul.f32 -4096.0, %v4605_v4  ;;  %v1071_v4 = vmul.f32 -4096.0, %v4644_v39 }
 0x2e0   : > { %v5019_v16 = vmul.f32 %v5014_v33, %v4915_v63  ;;  %v1039_v48 = vmul.f32 %v5014_v33, %v954_v14  ;;  %v5024_v40 = vmul.f32 %v5014_v33, %v4912_v15  ;;  %v5035_v14 = vmul.f32 %v5014_v33, %v4919_v35  ;;  %v3840_v15 = vpop.eup %3839 }
 0x2e1   : > { %v5046_v45 = vmul.f32 %v5014_v33, %v4929_v42  ;;  %v3842_v35 = vpop.eup %3841  ;;  %v5057_v42 = vmul.f32 %v5014_v33, %v4935_v43  ;;  %3851 = vpow2.f32 %v1080_v57  ;;  %v5067_v0 = vmul.f32 %v5014_v33, %v4941_v22 }
 0x2e2   : > { %v1040_v19 = vsub.f32 %v4752_v50, %v1039_v48  ;;  %977 = vadd.xlane.f32.xlu0 %v5019_v16  ;;  %975 = vadd.xlane.f32.xlu1 %v5024_v40  ;;  %8078 = vst [vmem:[#allocation35_spill] sm:$0xff] %v5035_v14  ;;  %v3844_v49 = vpop.eup %3843  ;;  %3853 = vpow2.f32 %v1090_v55  ;;  %v1094_v57 = vmul.f32 1.442695, %v1068_v29 }
 0x2e3   : > { %8079 = vst [vmem:[#allocation36_spill] sm:$0xff] %v5046_v45  ;;  %8080 = vst [vmem:[#allocation37_spill] sm:$0xff] %v5057_v42  ;;  %v3846_v43 = vpop.eup %3845  ;;  %3855 = vpow2.f32 %v1084_v38  ;;  %v1096_v38 = vmul.f32 1.442695, %v1069_v27 }
 0x2e4   : > { %v5031_v63 = vmax.f32 %v1040_v19, 0.0  ;;  %v1067_v19 = vmul.f32 -4096.0, %v4610_v10  ;;  %8081 = vst [vmem:[#allocation38_spill] sm:$0xff] %v5067_v0 }
 0x2e6   : > { %979 = vadd.xlane.f32.xlu0 %v5035_v14  ;;  %v5040_v50 = vmul.f32 %v3840_v15, %v5031_v63  ;;  %v5051_v48 = vmul.f32 %v3842_v35, %v5031_v63  ;;  %v5061_v15 = vmul.f32 %v3844_v49, %v5031_v63  ;;  %v1092_v34 = vmul.f32 1.442695, %v1067_v19  ;;  %v3848_v35 = vpop.eup %3847 }
 0x2e7   : > { %v5071_v5 = vmul.f32 %v3846_v43, %v5031_v63  ;;  %v5076_v55 = vmul.f32 %v3848_v35, %v5031_v63  ;;  %v3850_v19 = vpop.eup %3849  ;;  %v1070_v43 = vmul.f32 -4096.0, %v4635_v61  ;;  %v1100_v61 = vmul.f32 1.442695, %v1071_v4 }
 0x2e8   : > { %1122 = vadd.xlane.f32.xlu1 %v5040_v50  ;;  %3857 = vpow2.f32 %v1092_v34  ;;  %v5080_v22 = vmul.f32 %v3850_v19, %v5031_v63  ;;  %v5114_v4 = vmul.f32 %v5014_v33, %v4955_v9 }
 0x2e9   : > { %3859 = vpow2.f32 %v1094_v57  ;;  %v1098_v19 = vmul.f32 1.442695, %v1070_v43 }
 0x2ea   : > { %981 = vadd.xlane.f32.xlu0 %v5046_v45  ;;  %3861 = vpow2.f32 %v1096_v38  ;;  %v5104_v38 = vmul.f32 %v5014_v33, %v4948_v58  ;;  %8083 = vst [vmem:[#allocation40_spill] sm:$0xff] %v5114_v4 }
 0x2eb   : > { %v3852_v49 = vpop.eup %3851  ;;  %3863 = vpow2.f32 %v1098_v19 }
 0x2ec   : > { %1126 = vadd.xlane.f32.xlu1 %v5051_v48  ;;  %v5085_v34 = vmul.f32 %v3852_v49, %v5031_v63  ;;  %v3854_v29 = vpop.eup %3853  ;;  %8082 = vst [vmem:[#allocation39_spill] sm:$0xff] %v5104_v38  ;;  %3865 = vpow2.f32 %v1100_v61  ;;  %v5123_v61 = vmul.f32 %v5014_v33, %v4963_v2  ;;  %v5141_v2 = vmul.f32 %v5014_v33, %v4974_v41 }
 0x2ed   : > { %v5089_v35 = vmul.f32 %v3854_v29, %v5031_v63  ;;  %v3856_v30 = vpop.eup %3855  ;;  %v1072_v29 = vmul.f32 -4096.0, %v4657_v56  ;;  %v5159_v41 = vmul.f32 %v5014_v33, %v4996_v7 }
 0x2ee   : > { %983 = vadd.xlane.f32.xlu0 %v5057_v42  ;;  %v5094_v57 = vmul.f32 %v3856_v30, %v5031_v63  ;;  %8084 = vst [vmem:[#allocation41_spill] sm:$0xff] %v5123_v61  ;;  %8086 = vst [vmem:[#allocation43_spill] sm:$0xff] %v5141_v2 }
 0x2ef   : > { %v1102_v39 = vmul.f32 1.442695, %v1072_v29  ;;  %8088 = vst [vmem:[#allocation45_spill] sm:$0xff] %v5159_v41 }
 0x2f0   : > { %1130 = vadd.xlane.f32.xlu1 %v5061_v15 }
 0x2f1   : > { %3867 = vpow2.f32 %v1102_v39 }
 0x2f2   : > { %985 = vadd.xlane.f32.xlu0 %v5067_v0  ;;  %v3858_v27 = vpop.eup %3857 }
 0x2f3   : > { %v5098_v49 = vmul.f32 %v3858_v27, %v5031_v63  ;;  %v3860_v43 = vpop.eup %3859  ;;  %v1073_v27 = vmul.f32 -4096.0, %v4653_v54 }
 0x2f4   : > { %1134 = vadd.xlane.f32.xlu1 %v5071_v5  ;;  %v5108_v30 = vmul.f32 %v3860_v43, %v5031_v63  ;;  %v3862_v19 = vpop.eup %3861  ;;  %v5132_v43 = vmul.f32 %v5014_v33, %v4966_v37  ;;  %v5150_v37 = vmul.f32 %v5014_v33, %v4980_v18  ;;  %v5169_v18 = vmul.f32 %v5014_v33, %v5006_v8 }
 0x2f5   : > { %v5118_v58 = vmul.f32 %v3862_v19, %v5031_v63  ;;  %v1104_v56 = vmul.f32 1.442695, %v1073_v27  ;;  %v3864_v29 = vpop.eup %3863 }
 0x2f6   : > { %1124 = vadd.xlane.f32.xlu0 %v5076_v55  ;;  %v5127_v9 = vmul.f32 %v3864_v29, %v5031_v63  ;;  %8085 = vst [vmem:[#allocation42_spill] sm:$0xff] %v5132_v43  ;;  %v3866_v39 = vpop.eup %3865  ;;  %8087 = vst [vmem:[#allocation44_spill] sm:$0xff] %v5150_v37 }
 0x2f7   : > { %3869 = vpow2.f32 %v1104_v56  ;;  %v5136_v27 = vmul.f32 %v3866_v39, %v5031_v63  ;;  %8090 = vst [vmem:[#allocation47_spill] sm:$0xff] %v5169_v18 }
 0x2f8   : > { %1136 = vadd.xlane.f32.xlu1 %v5080_v22 }
 0x2fa   : > { %1128 = vadd.xlane.f32.xlu0 %v5085_v34 }
 0x2fb   : > { %v3868_v19 = vpop.eup %3867 }
 0x2fc   : > { %1138 = vadd.xlane.f32.xlu1 %v5089_v35  ;;  %v5145_v56 = vmul.f32 %v3868_v19, %v5031_v63  ;;  %v5164_v19 = vmul.f32 %v5014_v33, %v4988_v44 }
 0x2fe   : > { %1132 = vadd.xlane.f32.xlu0 %v5094_v57  ;;  %8089 = vst [vmem:[#allocation46_spill] sm:$0xff] %v5164_v19 }
 0x300   : > { %1140 = vadd.xlane.f32.xlu1 %v5098_v49 }
 0x301   : > { %v3870_v29 = vpop.eup %3869 }
 0x302   : > { %987 = vadd.xlane.f32.xlu0 %v5104_v38  ;;  %v5154_v39 = vmul.f32 %v3870_v29, %v5031_v63  ;;  %v5174_v29 = vmul.f32 %v5014_v33, %v5002_v17 }
 0x304   : > { %1142 = vadd.xlane.f32.xlu1 %v5108_v30  ;;  %8091 = vst [vmem:[#allocation48_spill] sm:$0xff] %v5174_v29 }
 0x306   : > { %989 = vadd.xlane.f32.xlu0 %v5114_v4 }
 0x308   : > { %1144 = vadd.xlane.f32.xlu1 %v5118_v58 }
 0x30a   : > { %991 = vadd.xlane.f32.xlu0 %v5123_v61 }
 0x30c   : > { %1146 = vadd.xlane.f32.xlu1 %v5127_v9 }
 0x30e   : > { %993 = vadd.xlane.f32.xlu0 %v5132_v43 }
 0x310   : > { %1148 = vadd.xlane.f32.xlu1 %v5136_v27 }
 0x312   : > { %995 = vadd.xlane.f32.xlu0 %v5141_v2 }
 0x314   : > { %1150 = vadd.xlane.f32.xlu1 %v5145_v56 }
 0x316   : > { %997 = vadd.xlane.f32.xlu0 %v5150_v37 }
 0x318   : > { %1152 = vadd.xlane.f32.xlu1 %v5154_v39 }
 0x31a   : > { %1001 = vadd.xlane.f32.xlu0 %v5159_v41 }
 0x31c   : > { %999 = vadd.xlane.f32.xlu1 %v5164_v19 }
 0x31e   : > { %1005 = vadd.xlane.f32.xlu0 %v5169_v18 }
 0x320   : > { %1003 = vadd.xlane.f32.xlu1 %v5174_v29 }
 0x36f   : > { %v978_v7 = vpop.xlane.xlu0 %977  ;;  %v976_v54 = vpop.xlane.xlu1 %975 }
 0x370   : > { %v1007_v38 = vsub.f32 %v4898_v59, %v976_v54 }
 0x372   : > { %v5180_v14 = vmax.f32 %v1007_v38, 0.0 }
 0x373   : > { %v980_v10 = vpop.xlane.xlu0 %979 }
 0x374   : > { %v1009_v45 = vsub.f32 %v4900_v3, %v980_v10 }
 0x375   : > { %v1123_v41 = vpop.xlane.xlu1 %1122 }
 0x376   : > { %v1154_v43 = vadd.f32 1e-09, %v1123_v41 }
 0x377   : > { %v982_v44 = vpop.xlane.xlu0 %981 }
 0x378   : > { %3871 = vrcp.f32 %v1154_v43 }
 0x379   : > { %v1127_v37 = vpop.xlane.xlu1 %1126 }
 0x37a   : > { %v1156_v61 = vadd.f32 1e-09, %v1127_v37  ;;  %v1008_v37 = vsub.f32 %v4902_v25, %v978_v7 }
 0x37b   : > { %v984_v2 = vpop.xlane.xlu0 %983 }
 0x37c   : > { %3873 = vrcp.f32 %v1156_v61  ;;  %v1011_v54 = vsub.f32 %v4907_v47, %v984_v2  ;;  %v5185_v59 = vmax.f32 %v1008_v37, 0.0 }
 0x37d   : > { %v1131_v19 = vpop.xlane.xlu1 %1130 }
 0x37e   : > { %v1158_v18 = vadd.f32 1e-09, %v1131_v19  ;;  %v5192_v47 = vmax.f32 %v1011_v54, 0.0 }
 0x37f   : > { %v986_v8 = vpop.xlane.xlu0 %985 }
 0x381   : > { %v1135_v4 = vpop.xlane.xlu1 %1134 }
 0x382   : > { %v1160_v0 = vadd.f32 1e-09, %v1135_v4  ;;  %v3872_v43 = vpop.eup %3871 }
 0x383   : > { %v1125_v1 = vpop.xlane.xlu0 %1124  ;;  %v1186_v3 = vmul.f32 %v3872_v43, %v5180_v14 }
 0x384   : > { %v1155_v17 = vadd.f32 1e-09, %v1125_v1 }
 0x385   : > { %v1137_v33 = vpop.xlane.xlu1 %1136  ;;  %v5198_v37 = vmul.f32 %v1186_v3, %v5040_v50 }
 0x386   : > { %3875 = vrcp.f32 %v1155_v17  ;;  %v3874_v19 = vpop.eup %3873  ;;  %v1161_v1 = vadd.f32 1e-09, %v1137_v33  ;;  %v5182_v17 = vmax.f32 %v1009_v45, 0.0 }
 0x387   : > { %3877 = vrcp.f32 %v1158_v18  ;;  %v1129_v29 = vpop.xlane.xlu0 %1128 }
 0x388   : > { %v1157_v53 = vadd.f32 1e-09, %v1129_v29  ;;  %v1188_v4 = vmul.f32 %v3874_v19, %v5182_v17 }
 0x389   : > { %v1139_v42 = vpop.xlane.xlu1 %1138 }
 0x38a   : > { %3879 = vrcp.f32 %v1157_v53  ;;  %v1010_v53 = vsub.f32 %v4909_v32, %v982_v44  ;;  %v1012_v32 = vsub.f32 %v4926_v23, %v986_v8 }
 0x38b   : > { %v1133_v41 = vpop.xlane.xlu0 %1132  ;;  %3881 = vrcp.f32 %v1160_v0  ;;  %v1162_v0 = vadd.f32 1e-09, %v1139_v42 }
 0x38c   : > { %v1159_v61 = vadd.f32 1e-09, %v1133_v41  ;;  %v5194_v33 = vmax.f32 %v1010_v53, 0.0  ;;  %v5213_v8 = vmax.f32 %v1012_v32, 0.0 }
 0x38d   : > { %v1141_v18 = vpop.xlane.xlu1 %1140 }
 0x38e   : > { %3883 = vrcp.f32 %v1159_v61  ;;  %v1163_v2 = vadd.f32 1e-09, %v1141_v18  ;;  %v5206_v61 = vmul.f32 %v1188_v4, %v5051_v48 }
 0x38f   : > { %v988_v10 = vpop.xlane.xlu0 %987  ;;  %3885 = vrcp.f32 %v1161_v1 }
 0x390   : > { %v3876_v25 = vpop.eup %3875  ;;  %v1013_v29 = vsub.f32 %v4922_v26, %v988_v10  ;;  %3887 = vrcp.f32 %v1162_v0 }
 0x391   : > { %v3878_v38 = vpop.eup %3877  ;;  %v1143_v45 = vpop.xlane.xlu1 %1142  ;;  %v1187_v7 = vmul.f32 %v3876_v25, %v5185_v59  ;;  %3889 = vrcp.f32 %v1163_v2 }
 0x392   : > { %v1190_v26 = vmul.f32 %v3878_v38, %v5192_v47  ;;  %v5209_v1 = vmax.f32 %v1013_v29, 0.0  ;;  %v1164_v18 = vadd.f32 1e-09, %v1143_v45 }
 0x393   : > { %v990_v44 = vpop.xlane.xlu0 %989  ;;  %v5201_v41 = vmul.f32 %v1187_v7, %v5076_v55 }
 0x394   : > { %v3880_v42 = vpop.eup %3879  ;;  %v1014_v43 = vsub.f32 %v4932_v21, %v990_v44  ;;  %v5220_v10 = vmul.f32 %v1190_v26, %v5061_v15  ;;  %3891 = vrcp.f32 %v1164_v18 }
 0x395   : > { %v1189_v19 = vmul.f32 %v3880_v42, %v5194_v33  ;;  %v1145_v23 = vpop.xlane.xlu1 %1144  ;;  %v1218_v50 = vadd.f32 %v5201_v41, %v5198_v37  ;;  %v3882_v55 = vpop.eup %3881 }
 0x396   : > { %v5222_v3 = vmax.f32 %v1014_v43, 0.0  ;;  %v1192_v38 = vmul.f32 %v3882_v55, %v5209_v1  ;;  %v1165_v0 = vadd.f32 1e-09, %v1145_v23 }
 0x397   : > { %v992_v54 = vpop.xlane.xlu0 %991  ;;  %v5216_v21 = vmul.f32 %v1189_v19, %v5085_v34  ;;  %v1219_v48 = vadd.f32 %v1218_v50, %v5206_v61 }
 0x398   : > { %v3884_v53 = vpop.eup %3883  ;;  %v1015_v25 = vsub.f32 %v4945_v13, %v992_v54  ;;  %v5237_v42 = vmul.f32 %v1192_v38, %v5071_v5  ;;  %3893 = vrcp.f32 %v1165_v0 }
 0x399   : > { %v1191_v4 = vmul.f32 %v3884_v53, %v5213_v8  ;;  %v1147_v29 = vpop.xlane.xlu1 %1146  ;;  %v1220_v45 = vadd.f32 %v1219_v48, %v5216_v21  ;;  %v3886_v34 = vpop.eup %3885 }
 0x39a   : > { %v1193_v32 = vmul.f32 %v3886_v34, %v5222_v3  ;;  %v5233_v44 = vmax.f32 %v1015_v25, 0.0  ;;  %v3888_v23 = vpop.eup %3887  ;;  %v1166_v50 = vadd.f32 1e-09, %v1147_v29 }
 0x39b   : > { %v5229_v7 = vmul.f32 %v1191_v4, %v5094_v57  ;;  %v994_v2 = vpop.xlane.xlu0 %993  ;;  %v1221_v15 = vadd.f32 %v1220_v45, %v5220_v10  ;;  %v3890_v54 = vpop.eup %3889 }
 0x39c   : > { %v1016_v13 = vsub.f32 %v4951_v62, %v994_v2  ;;  %v5244_v48 = vmul.f32 %v1193_v32, %v5080_v22  ;;  %v1194_v62 = vmul.f32 %v3888_v23, %v5233_v44 }
 0x39d   : > { %v1149_v26 = vpop.xlane.xlu1 %1148  ;;  %v1222_v43 = vadd.f32 %v1221_v15, %v5229_v7 }
 0x39e   : > { %v5240_v19 = vmax.f32 %v1016_v13, 0.0  ;;  %v1167_v57 = vadd.f32 1e-09, %v1149_v26  ;;  %v5253_v45 = vmul.f32 %v1194_v62, %v5089_v35  ;;  %v3892_v34 = vpop.eup %3891 }
 0x39f   : > { %v996_v55 = vpop.xlane.xlu0 %995  ;;  %v1223_v18 = vadd.f32 %v1222_v43, %v5237_v42 }
 0x3a0   : > { %v1017_v5 = vsub.f32 %v4959_v60, %v996_v55  ;;  %v1195_v53 = vmul.f32 %v3890_v54, %v5240_v19  ;;  %3895 = vrcp.f32 %v1167_v57 }
 0x3a1   : > { %v1151_v25 = vpop.xlane.xlu1 %1150  ;;  %v1224_v38 = vadd.f32 %v1223_v18, %v5244_v48  ;;  %3897 = vrcp.f32 %v1166_v50 }
 0x3a2   : > { %v5249_v4 = vmax.f32 %v1017_v5, 0.0  ;;  %v1168_v0 = vadd.f32 1e-09, %v1151_v25  ;;  %v5257_v2 = vmul.f32 %v1195_v53, %v5098_v49  ;;  %v3894_v43 = vpop.eup %3893 }
 0x3a3   : > { %v998_v29 = vpop.xlane.xlu0 %997  ;;  %v1225_v26 = vadd.f32 %v1224_v38, %v5253_v45 }
 0x3a4   : > { %v1018_v22 = vsub.f32 %v4969_v24, %v998_v29  ;;  %v1196_v15 = vmul.f32 %v3892_v34, %v5249_v4  ;;  %3899 = vrcp.f32 %v1168_v0  ;;  %v8092_v29 = vld [vmem:[#allocation34_spill] sm:$0xff] }
 0x3a5   : > { %v1153_v60 = vpop.xlane.xlu1 %1152  ;;  %v1226_v18 = vadd.f32 %v1225_v26, %v5257_v2 }
 0x3a6   : > { %v5260_v32 = vmax.f32 %v1018_v22, 0.0  ;;  %v1169_v13 = vadd.f32 1e-09, %v1153_v60  ;;  %v5266_v49 = vmul.f32 %v1196_v15, %v5108_v30 }
 0x3a7   : > { %v1002_v57 = vpop.xlane.xlu0 %1001 }
 0x3a8   : > { %v1197_v35 = vmul.f32 %v3894_v43, %v5260_v32  ;;  %3901 = vrcp.f32 %v1169_v13  ;;  %v1020_v24 = vsub.f32 %v4976_v52, %v1002_v57 }
 0x3a9   : > { %v1000_v23 = vpop.xlane.xlu1 %999 }
 0x3aa   : > { %v5268_v50 = vmax.f32 %v1020_v24, 0.0  ;;  %v1019_v55 = vsub.f32 %v4982_v6, %v1000_v23  ;;  %v3896_v54 = vpop.eup %3895  ;;  %v5273_v5 = vmul.f32 %v1197_v35, %v5118_v58  ;;  %v1227_v6 = vadd.f32 %v1226_v18, %v5266_v49 }
 0x3ab   : > { %v1006_v62 = vpop.xlane.xlu0 %1005  ;;  %v3898_v25 = vpop.eup %3897 }
 0x3ac   : > { %v5275_v53 = vmax.f32 %v1019_v55, 0.0  ;;  %v1022_v52 = vsub.f32 %v4993_v46, %v1006_v62  ;;  %v1199_v30 = vmul.f32 %v3896_v54, %v5268_v50  ;;  %v1228_v58 = vadd.f32 %v1227_v6, %v5273_v5 }
 0x3ad   : > { %v1004_v38 = vpop.xlane.xlu1 %1003  ;;  %v1345_v6 = vmul.f32 -1024.0, %v4535_v28  ;;  %v8100_v28 = vld [vmem:[#allocation37_spill] sm:$0xff] }
 0x3ae   : > { %v1198_v0 = vmul.f32 %v3898_v25, %v5275_v53  ;;  %v1021_v22 = vsub.f32 %v8092_v29, %v1004_v38  ;;  %v3900_v15 = vpop.eup %3899  ;;  %v5288_v13 = vmax.f32 %v1022_v52, 0.0  ;;  %v5291_v26 = vmul.f32 %v1199_v30, %v5136_v27 }
 0x3af   : > { %v1346_v29 = vmul.f32 -1024.0, %v4542_v36 }
 0x3b0   : > { %v5283_v34 = vmul.f32 %v1198_v0, %v5127_v9  ;;  %v5285_v60 = vmax.f32 %v1021_v22, 0.0  ;;  %v1344_v0 = vmul.f32 -1024.0, %v4548_v51 }
 0x3b2   : > { %v3902_v46 = vpop.eup %3901  ;;  %v1200_v43 = vmul.f32 %v3900_v15, %v5285_v60  ;;  %v1229_v57 = vadd.f32 %v1228_v58, %v5283_v34  ;;  %v1362_v22 = vmul.f32 1.442695, %v1344_v0  ;;  %v1366_v58 = vmul.f32 1.442695, %v1346_v29 }
 0x3b3   : > { %v1201_v35 = vmul.f32 %v3902_v46, %v5288_v13  ;;  %v1348_v15 = vmul.f32 -1024.0, %v4562_v12  ;;  %v1343_v46 = vmul.f32 -1024.0, %v4538_v31  ;;  %v8104_v31 = vld [vmem:[#allocation39_spill] sm:$0xff] }
 0x3b4   : > { %v5297_v9 = vmul.f32 %v1200_v43, %v5145_v56  ;;  %v1230_v24 = vadd.f32 %v1229_v57, %v5291_v26  ;;  %v1342_v56 = vmul.f32 -1024.0, %v4530_v11  ;;  %v1349_v43 = vmul.f32 -1024.0, %v4570_v20  ;;  %v8103_v20 = vld [vmem:[#allocation24_spill] sm:$0xff] }
 0x3b5   : > { %v5301_v23 = vmul.f32 %v1201_v35, %v5154_v39 }
 0x3b6   : > { %v1231_v55 = vadd.f32 %v1230_v24, %v5297_v9  ;;  %v1358_v39 = vmul.f32 1.442695, %v1342_v56  ;;  %v5313_v24 = vmul.f32 1.442695, %v1345_v6  ;;  %v8096_v56 = vld [vmem:[#allocation35_spill] sm:$0xff]  ;;  %v8099_v6 = vld [vmem:[#allocation22_spill] sm:$0xff] }
 0x3b8   : > { %v1232_v18 = vadd.f32 %v1231_v55, %v5301_v23  ;;  %v1370_v55 = vmul.f32 1.442695, %v1348_v15  ;;  %v8101_v15 = vld [vmem:[#allocation23_spill] sm:$0xff] }
 0x3ba   : > { %v1233_v27 = vrot.slane %v1232_v18, 4 }
 0x3bc   : > { %v1234_v54 = vadd.f32 %v1233_v27, %v1232_v18  ;;  %v1360_v18 = vmul.f32 1.442695, %v1343_v46  ;;  %v1372_v27 = vmul.f32 1.442695, %v1349_v43  ;;  %v8102_v46 = vld [vmem:[#allocation38_spill] sm:$0xff] }
 0x3bd   : > { %v1047_v43 = vadd.f32 %v8102_v46, %v8101_v15  ;;  %v8111_v15 = vld [vmem:[#allocation40_spill] sm:$0xff] }
 0x3be   : > { %v1235_v62 = vrot.slane %v1234_v54, 2 }
 0x3c0   : > { %v1236_v25 = vadd.f32 %v1235_v62, %v1234_v54  ;;  %v8093_v54 = vld [vmem:[#allocation18_spill] sm:$0xff] }
 0x3c1   : > { %v1043_v62 = vadd.f32 %v5019_v16, %v8093_v54  ;;  %v1048_v16 = vadd.f32 %v8104_v31, %v8103_v20 }
 0x3c2   : > { %v1237_v52 = vrot.slane %v1236_v25, 1 }
 0x3c4   : > { %v1238_v38 = vadd.f32 %v1237_v52, %v1236_v25  ;;  %v8094_v25 = vld [vmem:[#allocation19_spill] sm:$0xff] }
 0x3c5   : > { %v1042_v52 = vadd.f32 %v5024_v40, %v8094_v25 }
 0x3c6   : > { %v1239_v30 = vadd.f32 1e-09, %v1238_v38 }
 0x3c8   : > { %3903 = vrcp.f32 %v1239_v30  ;;  %v8095_v30 = vld [vmem:[#allocation20_spill] sm:$0xff] }
 0x3c9   : > { %3905 = vpow2.f32 %v1358_v39  ;;  %v1044_v0 = vadd.f32 %v8096_v56, %v8095_v30  ;;  %v8097_v39 = vld [vmem:[#allocation21_spill] sm:$0xff]  ;;  %v8107_v56 = vld [vmem:[#allocation10_spill] sm:$0xff] }
 0x3ca   : > { %3907 = vpow2.f32 %v1362_v22 }
 0x3cb   : > { %3909 = vpow2.f32 %v1366_v58  ;;  %v1046_v58 = vadd.f32 %v8100_v28, %v8099_v6 }
 0x3cc   : > { %3911 = vpow2.f32 %v1370_v55 }
 0x3cd   : > { %3913 = vpow2.f32 %v1360_v18 }
 0x3ce   : > { %3915 = vpow2.f32 %v1372_v27  ;;  %v8123_v27 = vld [vmem:[#allocation12_spill] sm:$0xff] }
 0x3cf   : > { %3917 = vpow2.f32 %v5313_v24 }
 0x3d2   : > { %v3904_v57 = vpop.eup %3903 }
 0x3d3   : > { %v1241_v35 = vmul.f32 %v3904_v57, %v5031_v63  ;;  %v8098_v57 = vld [vmem:[#allocation36_spill] sm:$0xff]  ;;  %v3906_v55 = vpop.eup %3905 }
 0x3d4   : > { %v1045_v22 = vadd.f32 %v8098_v57, %v8097_v39  ;;  %v3908_v6 = vpop.eup %3907 }
 0x3d5   : > { %v5321_v29 = vmin.f32 %v1241_v35, 1.0 }
 0x3d7   : > { %v1244_v40 = vmul.f32 %v5321_v29, %v5201_v41  ;;  %v1323_v54 = vmul.f32 %v5321_v29, %v1238_v38  ;;  %v1243_v35 = vmul.f32 %v5321_v29, %v5198_v37  ;;  %v1245_v25 = vmul.f32 %v5321_v29, %v5206_v61 }
 0x3d8   : > { %v1246_v28 = vmul.f32 %v5321_v29, %v5216_v21  ;;  %v1247_v30 = vmul.f32 %v5321_v29, %v5220_v10  ;;  %v5344_v31 = vmul.f32 %v5321_v29, %v5229_v7  ;;  %v5348_v20 = vmul.f32 %v5321_v29, %v5237_v42 }
 0x3d9   : > { %v1324_v41 = vsub.f32 %v5031_v63, %v1323_v54  ;;  %1261 = vadd.xlane.f32.xlu0 %v1244_v40  ;;  %v5351_v37 = vadd.f32 %v1244_v40, %v1043_v62  ;;  %1259 = vadd.xlane.f32.xlu1 %v1243_v35  ;;  %v5353_v61 = vadd.f32 %v1243_v35, %v1042_v52  ;;  %v1350_v63 = vmul.f32 -1024.0, %v8107_v56  ;;  %v8114_v54 = vld [vmem:[#allocation27_spill] sm:$0xff]  ;;  %v8115_v35 = vld [vmem:[#allocation42_spill] sm:$0xff] }
 0x3da   : > { %v5355_v21 = vadd.f32 %v1245_v25, %v1044_v0  ;;  %v5357_v10 = vadd.f32 %v1246_v28, %v1045_v22  ;;  %v5359_v38 = vadd.f32 %v1247_v30, %v1046_v58  ;;  %v5362_v7 = vadd.f32 %v5344_v31, %v1047_v43  ;;  %v8109_v0 = vld [vmem:[#allocation7_spill] sm:$0xff]  ;;  %v8110_v58 = vld [vmem:[#allocation25_spill] sm:$0xff]  ;;  %v3910_v43 = vpop.eup %3909 }
 0x3db   : > { %v5364_v42 = vmax.f32 %v1324_v41, 0.0  ;;  %v5368_v62 = vadd.f32 %v5348_v20, %v1048_v16  ;;  %v5372_v52 = vmul.f32 %v5321_v29, %v5244_v48  ;;  %v1347_v39 = vmul.f32 -1024.0, %v8109_v0  ;;  %v8112_v16 = vld [vmem:[#allocation26_spill] sm:$0xff]  ;;  %v8119_v0 = vld [vmem:[#allocation44_spill] sm:$0xff] }
 0x3dc   : > { %8105 = vst [vmem:[#allocation34_spill] sm:$0xff] %v5359_v38  ;;  %8106 = vst [vmem:[#allocation18_spill] sm:$0xff] %v5362_v7  ;;  %v5377_v57 = vmul.f32 %v5321_v29, %v5253_v45  ;;  %v5381_v22 = vmul.f32 %v5321_v29, %v5257_v2  ;;  %v1049_v46 = vadd.f32 %v8111_v15, %v8110_v58  ;;  %v8113_v2 = vld [vmem:[#allocation41_spill] sm:$0xff]  ;;  %v8117_v58 = vld [vmem:[#allocation43_spill] sm:$0xff] }
 0x3dd   : > { %8108 = vst [vmem:[#allocation19_spill] sm:$0xff] %v5368_v62  ;;  %1263 = vadd.xlane.f32.xlu0 %v1245_v25  ;;  %v5386_v48 = vmul.f32 %v3906_v55, %v5364_v42  ;;  %v5390_v18 = vmul.f32 %v5321_v29, %v5266_v49  ;;  %v5394_v45 = vmul.f32 %v5321_v29, %v5273_v5  ;;  %v8116_v55 = vld [vmem:[#allocation28_spill] sm:$0xff]  ;;  %v8118_v15 = vld [vmem:[#allocation29_spill] sm:$0xff]  ;;  %v1374_v5 = vmul.f32 1.442695, %v1350_v63 }
 0x3de   : > { %v1050_v40 = vadd.f32 %v8113_v2, %v8112_v16  ;;  %v1051_v41 = vadd.f32 %v8115_v35, %v8114_v54  ;;  %v5402_v25 = vmul.f32 %v5321_v29, %v5291_v26  ;;  %v1052_v49 = vadd.f32 %v8117_v58, %v8116_v55  ;;  %v8121_v16 = vld [vmem:[#allocation30_spill] sm:$0xff]  ;;  %v8122_v2 = vld [vmem:[#allocation45_spill] sm:$0xff]  ;;  %v8126_v55 = vld [vmem:[#allocation31_spill] sm:$0xff] }
 0x3df   : > { %v1053_v56 = vadd.f32 %v8119_v0, %v8118_v15  ;;  %1406 = vadd.xlane.f32.xlu1 %v5386_v48  ;;  %v5410_v62 = vadd.f32 %v5372_v52, %v1049_v46  ;;  %v1055_v54 = vadd.f32 %v8122_v2, %v8121_v16  ;;  %v1351_v35 = vmul.f32 -1024.0, %v8123_v27  ;;  %v8127_v58 = vld [vmem:[#allocation46_spill] sm:$0xff]  ;;  %v8130_v16 = vld [vmem:[#allocation32_spill] sm:$0xff]  ;;  %v8131_v2 = vld [vmem:[#allocation47_spill] sm:$0xff] }
 0x3e0   : > { %v5416_v26 = vadd.f32 %v5377_v57, %v1050_v40  ;;  %v5419_v7 = vadd.f32 %v5381_v22, %v1051_v41  ;;  %v1054_v0 = vadd.f32 %v8127_v58, %v8126_v55  ;;  %v5424_v63 = vmul.f32 %v3908_v6, %v5364_v42  ;;  %v3912_v6 = vpop.eup %3911  ;;  %v8134_v55 = vld [vmem:[#allocation48_spill] sm:$0xff] }
 0x3e1   : > { %8120 = vst [vmem:[#allocation20_spill] sm:$0xff] %v5410_v62  ;;  %1265 = vadd.xlane.f32.xlu0 %v1246_v28  ;;  %v5427_v46 = vadd.f32 %v5390_v18, %v1052_v49  ;;  %v5430_v15 = vadd.f32 %v5394_v45, %v1053_v56  ;;  %v1057_v40 = vadd.f32 %v8131_v2, %v8130_v16  ;;  %v8133_v49 = vld [vmem:[#allocation33_spill] sm:$0xff]  ;;  %3919 = vpow2.f32 %v1374_v5 }
 0x3e2   : > { %8124 = vst [vmem:[#allocation35_spill] sm:$0xff] %v5416_v26  ;;  %8125 = vst [vmem:[#allocation21_spill] sm:$0xff] %v5419_v7  ;;  %v5435_v27 = vadd.f32 %v5402_v25, %v1055_v54  ;;  %v5439_v41 = vmul.f32 %v5321_v29, %v5283_v34  ;;  %v5443_v28 = vmul.f32 %v5321_v29, %v5301_v23  ;;  %v1368_v54 = vmul.f32 1.442695, %v1347_v39 }
 0x3e3   : > { %8128 = vst [vmem:[#allocation36_spill] sm:$0xff] %v5427_v46  ;;  %8129 = vst [vmem:[#allocation22_spill] sm:$0xff] %v5430_v15  ;;  %v1056_v58 = vadd.f32 %v8134_v55, %v8133_v49  ;;  %1410 = vadd.xlane.f32.xlu1 %v5424_v63  ;;  %v5450_v56 = vmul.f32 %v5321_v29, %v5297_v9  ;;  %v5460_v23 = vmul.f32 %v3910_v43, %v5364_v42  ;;  %v3914_v49 = vpop.eup %3913  ;;  %v8138_v29 = vld [vmem:[#allocation11_spill] sm:$0xff]  ;;  %v8139_v43 = vld [vmem:[#allocation13_spill] sm:$0xff] }
 0x3e4   : > { %8132 = vst [vmem:[#allocation37_spill] sm:$0xff] %v5435_v27  ;;  %v5454_v34 = vadd.f32 %v5439_v41, %v1054_v0  ;;  %v5457_v16 = vadd.f32 %v5443_v28, %v1057_v40  ;;  %v1376_v9 = vmul.f32 1.442695, %v1351_v35  ;;  %v1352_v55 = vmul.f32 -1024.0, %v8138_v29  ;;  %v3916_v24 = vpop.eup %3915 }
 0x3e5   : > { %1267 = vadd.xlane.f32.xlu0 %v1247_v30  ;;  %v5463_v2 = vadd.f32 %v5450_v56, %v1056_v58  ;;  %3921 = vpow2.f32 %v1368_v54  ;;  %v5469_v39 = vmul.f32 %v3912_v6, %v5364_v42  ;;  %v1353_v0 = vmul.f32 -1024.0, %v8139_v43  ;;  %v3918_v40 = vpop.eup %3917  ;;  %v8140_v58 = vld [vmem:[#allocation14_spill] sm:$0xff]  ;;  %v8141_v43 = vld [vmem:[#allocation15_spill] sm:$0xff] }
 0x3e6   : > { %8135 = vst [vmem:[#allocation23_spill] sm:$0xff] %v5454_v34  ;;  %8136 = vst [vmem:[#allocation38_spill] sm:$0xff] %v5457_v16  ;;  %3923 = vpow2.f32 %v1376_v9  ;;  %v1378_v30 = vmul.f32 1.442695, %v1352_v55  ;;  %v5474_v5 = vmul.f32 %v3914_v49, %v5364_v42  ;;  %v5478_v35 = vmul.f32 %v3916_v24, %v5364_v42 }
 0x3e7   : > { %8137 = vst [vmem:[#allocation24_spill] sm:$0xff] %v5463_v2  ;;  %1414 = vadd.xlane.f32.xlu1 %v5460_v23  ;;  %v1354_v6 = vmul.f32 -1024.0, %v8140_v58  ;;  %v5483_v54 = vmul.f32 %v3918_v40, %v5364_v42  ;;  %v1355_v29 = vmul.f32 -1024.0, %v8141_v43  ;;  %v8143_v43 = vld [vmem:[#allocation16_spill] sm:$0xff] }
 0x3e8   : > { %3925 = vpow2.f32 %v1378_v30  ;;  %v1357_v16 = vmul.f32 -1024.0, %v8143_v43 }
 0x3e9   : > { %1269 = vadd.xlane.f32.xlu0 %v5344_v31  ;;  %v1380_v31 = vmul.f32 1.442695, %v1353_v0  ;;  %v1382_v24 = vmul.f32 1.442695, %v1354_v6  ;;  %v1384_v58 = vmul.f32 1.442695, %v1355_v29 }
 0x3eb   : > { %1418 = vadd.xlane.f32.xlu1 %v5469_v39  ;;  %v3920_v9 = vpop.eup %3919  ;;  %3927 = vpow2.f32 %v1380_v31 }
 0x3ec   : > { %v5487_v49 = vmul.f32 %v3920_v9, %v5364_v42  ;;  %3929 = vpow2.f32 %v1382_v24  ;;  %v8142_v9 = vld [vmem:[#allocation17_spill] sm:$0xff]  ;;  %v1388_v24 = vmul.f32 1.442695, %v1357_v16 }
 0x3ed   : > { %1408 = vadd.xlane.f32.xlu0 %v5474_v5  ;;  %v1356_v2 = vmul.f32 -1024.0, %v8142_v9  ;;  %3931 = vpow2.f32 %v1384_v58 }
 0x3ef   : > { %1420 = vadd.xlane.f32.xlu1 %v5478_v35  ;;  %v3922_v55 = vpop.eup %3921 }
 0x3f0   : > { %v5492_v30 = vmul.f32 %v3922_v55, %v5364_v42  ;;  %v3924_v0 = vpop.eup %3923  ;;  %v1386_v55 = vmul.f32 1.442695, %v1356_v2 }
 0x3f1   : > { %1412 = vadd.xlane.f32.xlu0 %v5483_v54  ;;  %v5496_v40 = vmul.f32 %v3924_v0, %v5364_v42 }
 0x3f2   : > { %v3926_v31 = vpop.eup %3925  ;;  %3933 = vpow2.f32 %v1386_v55 }
 0x3f3   : > { %1422 = vadd.xlane.f32.xlu1 %v5487_v49  ;;  %v5502_v6 = vmul.f32 %v3926_v31, %v5364_v42  ;;  %3935 = vpow2.f32 %v1388_v24 }
 0x3f5   : > { %1416 = vadd.xlane.f32.xlu0 %v5492_v30  ;;  %v3928_v0 = vpop.eup %3927 }
 0x3f6   : > { %v5508_v29 = vmul.f32 %v3928_v0, %v5364_v42 }
 0x3f7   : > { %1424 = vadd.xlane.f32.xlu1 %v5496_v40 }
 0x3f9   : > { %1271 = vadd.xlane.f32.xlu0 %v5348_v20  ;;  %v3930_v20 = vpop.eup %3929 }
 0x3fa   : > { %v5513_v58 = vmul.f32 %v3930_v20, %v5364_v42  ;;  %v3932_v2 = vpop.eup %3931 }
 0x3fb   : > { %1426 = vadd.xlane.f32.xlu1 %v5502_v6 }
 0x3fc   : > { %v3934_v16 = vpop.eup %3933 }
 0x3fd   : > { %1273 = vadd.xlane.f32.xlu0 %v5372_v52  ;;  %v5518_v52 = vmul.f32 %v3932_v2, %v5364_v42  ;;  %v5523_v31 = vmul.f32 %v3934_v16, %v5364_v42 }
 0x3ff   : > { %1428 = vadd.xlane.f32.xlu1 %v5508_v29 }
 0x401   : > { %1275 = vadd.xlane.f32.xlu0 %v5377_v57  ;;  %v3936_v57 = vpop.eup %3935 }
 0x402   : > { %v5528_v55 = vmul.f32 %v3936_v57, %v5364_v42 }
 0x403   : > { %1430 = vadd.xlane.f32.xlu1 %v5513_v58 }
 0x405   : > { %1277 = vadd.xlane.f32.xlu0 %v5381_v22 }
 0x407   : > { %1432 = vadd.xlane.f32.xlu1 %v5518_v52 }
 0x409   : > { %1279 = vadd.xlane.f32.xlu0 %v5390_v18 }
 0x40b   : > { %1434 = vadd.xlane.f32.xlu1 %v5523_v31 }
 0x40d   : > { %1281 = vadd.xlane.f32.xlu0 %v5394_v45 }
 0x40f   : > { %1436 = vadd.xlane.f32.xlu1 %v5528_v55 }
 0x411   : > { %1285 = vadd.xlane.f32.xlu0 %v5402_v25 }
 0x413   : > { %1283 = vadd.xlane.f32.xlu1 %v5439_v41 }
 0x415   : > { %1289 = vadd.xlane.f32.xlu0 %v5443_v28 }
 0x417   : > { %1287 = vadd.xlane.f32.xlu1 %v5450_v56 }
 0x466   : > { %v1262_v22 = vpop.xlane.xlu0 %1261  ;;  %v1260_v18 = vpop.xlane.xlu1 %1259 }
 0x467   : > { %v1291_v46 = vsub.f32 %v5180_v14, %v1260_v18 }
 0x469   : > { %v5538_v38 = vmax.f32 %v1291_v46, 0.0 }
 0x46a   : > { %v1264_v0 = vpop.xlane.xlu0 %1263 }
 0x46b   : > { %v1293_v62 = vsub.f32 %v5182_v17, %v1264_v0 }
 0x46c   : > { %v1407_v24 = vpop.xlane.xlu1 %1406 }
 0x46d   : > { %v1438_v57 = vadd.f32 1e-09, %v1407_v24  ;;  %v1292_v24 = vsub.f32 %v5185_v59, %v1262_v22 }
 0x46e   : > { %v1266_v20 = vpop.xlane.xlu0 %1265 }
 0x46f   : > { %3937 = vrcp.f32 %v1438_v57  ;;  %v1294_v17 = vsub.f32 %v5194_v33, %v1266_v20 }
 0x470   : > { %v1411_v2 = vpop.xlane.xlu1 %1410 }
 0x471   : > { %v1440_v43 = vadd.f32 1e-09, %v1411_v2 }
 0x472   : > { %v1268_v45 = vpop.xlane.xlu0 %1267 }
 0x473   : > { %3939 = vrcp.f32 %v1440_v43  ;;  %v1295_v14 = vsub.f32 %v5192_v47, %v1268_v45 }
 0x474   : > { %v1415_v16 = vpop.xlane.xlu1 %1414 }
 0x475   : > { %v1442_v25 = vadd.f32 1e-09, %v1415_v16  ;;  %v5550_v47 = vmax.f32 %v1295_v14, 0.0 }
 0x476   : > { %v1270_v9 = vpop.xlane.xlu0 %1269 }
 0x477   : > { %v1296_v33 = vsub.f32 %v5213_v8, %v1270_v9 }
 0x478   : > { %v1419_v34 = vpop.xlane.xlu1 %1418 }
 0x479   : > { %v1444_v7 = vadd.f32 1e-09, %v1419_v34  ;;  %v3938_v57 = vpop.eup %3937  ;;  %v5543_v34 = vmax.f32 %v1292_v24, 0.0  ;;  %v5571_v9 = vmax.f32 %v1296_v33, 0.0 }
 0x47a   : > { %v1409_v41 = vpop.xlane.xlu0 %1408  ;;  %v1470_v59 = vmul.f32 %v3938_v57, %v5538_v38 }
 0x47b   : > { %v1439_v27 = vadd.f32 1e-09, %v1409_v41  ;;  %v5540_v41 = vmax.f32 %v1293_v62, 0.0 }
 0x47c   : > { %v1421_v28 = vpop.xlane.xlu1 %1420  ;;  %v5556_v24 = vmul.f32 %v1470_v59, %v5386_v48 }
 0x47d   : > { %3941 = vrcp.f32 %v1439_v27  ;;  %v3940_v16 = vpop.eup %3939  ;;  %v1445_v27 = vadd.f32 1e-09, %v1421_v28 }
 0x47e   : > { %3943 = vrcp.f32 %v1442_v25  ;;  %v1413_v56 = vpop.xlane.xlu0 %1412  ;;  %v1472_v18 = vmul.f32 %v3940_v16, %v5540_v41 }
 0x47f   : > { %v1441_v15 = vadd.f32 1e-09, %v1413_v56  ;;  %v5552_v56 = vmax.f32 %v1294_v17, 0.0 }
 0x480   : > { %v1423_v26 = vpop.xlane.xlu1 %1422 }
 0x481   : > { %3945 = vrcp.f32 %v1441_v15 }
 0x482   : > { %v1417_v2 = vpop.xlane.xlu0 %1416  ;;  %3947 = vrcp.f32 %v1444_v7  ;;  %v1446_v7 = vadd.f32 1e-09, %v1423_v26 }
 0x483   : > { %v1443_v43 = vadd.f32 1e-09, %v1417_v2 }
 0x484   : > { %v1425_v25 = vpop.xlane.xlu1 %1424 }
 0x485   : > { %3949 = vrcp.f32 %v1443_v43  ;;  %v1447_v45 = vadd.f32 1e-09, %v1425_v25  ;;  %v5564_v43 = vmul.f32 %v1472_v18, %v5424_v63 }
 0x486   : > { %v1272_v15 = vpop.xlane.xlu0 %1271  ;;  %3951 = vrcp.f32 %v1445_v27 }
 0x487   : > { %v3942_v22 = vpop.eup %3941  ;;  %v1297_v0 = vsub.f32 %v5209_v1, %v1272_v15  ;;  %3953 = vrcp.f32 %v1446_v7 }
 0x488   : > { %v3944_v46 = vpop.eup %3943  ;;  %v1427_v62 = vpop.xlane.xlu1 %1426  ;;  %v1471_v28 = vmul.f32 %v3942_v22, %v5543_v34  ;;  %3955 = vrcp.f32 %v1447_v45 }
 0x489   : > { %v1474_v1 = vmul.f32 %v3944_v46, %v5550_v47  ;;  %v5567_v27 = vmax.f32 %v1297_v0, 0.0  ;;  %v1448_v25 = vadd.f32 1e-09, %v1427_v62 }
 0x48a   : > { %v1274_v20 = vpop.xlane.xlu0 %1273  ;;  %v5559_v2 = vmul.f32 %v1471_v28, %v5474_v5 }
 0x48b   : > { %v3946_v26 = vpop.eup %3945  ;;  %v1298_v57 = vsub.f32 %v5222_v3, %v1274_v20  ;;  %v5578_v15 = vmul.f32 %v1474_v1, %v5460_v23  ;;  %3957 = vrcp.f32 %v1448_v25 }
 0x48c   : > { %v1473_v16 = vmul.f32 %v3946_v26, %v5552_v56  ;;  %v1429_v8 = vpop.xlane.xlu1 %1428  ;;  %v1502_v48 = vadd.f32 %v5559_v2, %v5556_v24  ;;  %v3948_v5 = vpop.eup %3947 }
 0x48d   : > { %v5580_v59 = vmax.f32 %v1298_v57, 0.0  ;;  %v1476_v46 = vmul.f32 %v3948_v5, %v5567_v27  ;;  %v1449_v7 = vadd.f32 1e-09, %v1429_v8 }
 0x48e   : > { %v1276_v14 = vpop.xlane.xlu0 %1275  ;;  %v5574_v3 = vmul.f32 %v1473_v16, %v5483_v54  ;;  %v1503_v63 = vadd.f32 %v1502_v48, %v5564_v43 }
 0x48f   : > { %v3950_v17 = vpop.eup %3949  ;;  %v1299_v22 = vsub.f32 %v5233_v44, %v1276_v14  ;;  %v5595_v26 = vmul.f32 %v1476_v46, %v5469_v39  ;;  %3959 = vrcp.f32 %v1449_v7 }
 0x490   : > { %v1475_v18 = vmul.f32 %v3950_v17, %v5571_v9  ;;  %v1431_v0 = vpop.xlane.xlu1 %1430  ;;  %v1504_v62 = vadd.f32 %v1503_v63, %v5574_v3  ;;  %v3952_v54 = vpop.eup %3951 }
 0x491   : > { %v1477_v33 = vmul.f32 %v3952_v54, %v5580_v59  ;;  %v5591_v20 = vmax.f32 %v1299_v22, 0.0  ;;  %v3954_v8 = vpop.eup %3953  ;;  %v1450_v48 = vadd.f32 1e-09, %v1431_v0 }
 0x492   : > { %v5587_v28 = vmul.f32 %v1475_v18, %v5492_v30  ;;  %v1278_v45 = vpop.xlane.xlu0 %1277  ;;  %v1505_v23 = vadd.f32 %v1504_v62, %v5578_v15  ;;  %v3956_v14 = vpop.eup %3955 }
 0x493   : > { %v1300_v44 = vsub.f32 %v5240_v19, %v1278_v45  ;;  %v5602_v63 = vmul.f32 %v1477_v33, %v5478_v35  ;;  %v1478_v19 = vmul.f32 %v3954_v8, %v5591_v20 }
 0x494   : > { %v1433_v1 = vpop.xlane.xlu1 %1432  ;;  %v1506_v57 = vadd.f32 %v1505_v23, %v5587_v28 }
 0x495   : > { %v5598_v16 = vmax.f32 %v1300_v44, 0.0  ;;  %v1451_v30 = vadd.f32 1e-09, %v1433_v1  ;;  %v5611_v62 = vmul.f32 %v1478_v19, %v5487_v49  ;;  %v3958_v54 = vpop.eup %3957 }
 0x496   : > { %v1280_v5 = vpop.xlane.xlu0 %1279  ;;  %v1507_v25 = vadd.f32 %v1506_v57, %v5595_v26 }
 0x497   : > { %v1301_v39 = vsub.f32 %v5249_v4, %v1280_v5  ;;  %v1479_v17 = vmul.f32 %v3956_v14, %v5598_v16  ;;  %3961 = vrcp.f32 %v1451_v30 }
 0x498   : > { %v1435_v22 = vpop.xlane.xlu1 %1434  ;;  %v1508_v46 = vadd.f32 %v1507_v25, %v5602_v63  ;;  %3963 = vrcp.f32 %v1450_v48 }
 0x499   : > { %v5607_v18 = vmax.f32 %v1301_v39, 0.0  ;;  %v1452_v7 = vadd.f32 1e-09, %v1435_v22  ;;  %v5615_v45 = vmul.f32 %v1479_v17, %v5496_v40  ;;  %v3960_v57 = vpop.eup %3959 }
 0x49a   : > { %v1282_v0 = vpop.xlane.xlu0 %1281  ;;  %v1509_v1 = vadd.f32 %v1508_v46, %v5611_v62 }
 0x49b   : > { %v1302_v35 = vsub.f32 %v5260_v32, %v1282_v0  ;;  %v1480_v23 = vmul.f32 %v3958_v54, %v5607_v18  ;;  %3965 = vrcp.f32 %v1452_v7 }
 0x49c   : > { %v1437_v4 = vpop.xlane.xlu1 %1436  ;;  %v1510_v25 = vadd.f32 %v1509_v1, %v5615_v45 }
 0x49d   : > { %v5618_v33 = vmax.f32 %v1302_v35, 0.0  ;;  %v1453_v44 = vadd.f32 1e-09, %v1437_v4  ;;  %v5624_v40 = vmul.f32 %v1480_v23, %v5502_v6 }
 0x49e   : > { %v1286_v30 = vpop.xlane.xlu0 %1285 }
 0x49f   : > { %v1481_v49 = vmul.f32 %v3960_v57, %v5618_v33  ;;  %3967 = vrcp.f32 %v1453_v44  ;;  %v1304_v32 = vsub.f32 %v5268_v50, %v1286_v30 }
 0x4a0   : > { %v1284_v8 = vpop.xlane.xlu1 %1283 }
 0x4a1   : > { %v5626_v48 = vmax.f32 %v1304_v32, 0.0  ;;  %v1303_v5 = vsub.f32 %v5275_v53, %v1284_v8  ;;  %v3962_v14 = vpop.eup %3961  ;;  %v5631_v39 = vmul.f32 %v1481_v49, %v5508_v29  ;;  %v1511_v53 = vadd.f32 %v1510_v25, %v5624_v40 }
 0x4a2   : > { %v1290_v19 = vpop.xlane.xlu0 %1289  ;;  %v3964_v22 = vpop.eup %3963 }
 0x4a3   : > { %v5633_v17 = vmax.f32 %v1303_v5, 0.0  ;;  %v1306_v50 = vsub.f32 %v5288_v13, %v1290_v19  ;;  %v1483_v6 = vmul.f32 %v3962_v14, %v5626_v48  ;;  %v1512_v29 = vadd.f32 %v1511_v53, %v5631_v39 }
 0x4a4   : > { %v1288_v46 = vpop.xlane.xlu1 %1287  ;;  %v1632_v53 = vmul.f32 -256.0, %v4562_v12 }
 0x4a5   : > { %v1482_v7 = vmul.f32 %v3964_v22, %v5633_v17  ;;  %v1305_v0 = vsub.f32 %v5285_v60, %v1288_v46  ;;  %v3966_v4 = vpop.eup %3965  ;;  %v5646_v23 = vmax.f32 %v1306_v50, 0.0  ;;  %v5649_v44 = vmul.f32 %v1483_v6, %v5518_v52 }
 0x4a6   : > { %v1628_v6 = vmul.f32 -256.0, %v4548_v51 }
 0x4a7   : > { %v5641_v35 = vmul.f32 %v1482_v7, %v5513_v58  ;;  %v5643_v54 = vmax.f32 %v1305_v0, 0.0 }
 0x4a8   : > { %v1646_v0 = vmul.f32 1.442695, %v1628_v6 }
 0x4a9   : > { %v3968_v13 = vpop.eup %3967  ;;  %v1484_v1 = vmul.f32 %v3966_v4, %v5643_v54  ;;  %v1513_v60 = vadd.f32 %v1512_v29, %v5641_v35 }
 0x4aa   : > { %v1485_v57 = vmul.f32 %v3968_v13, %v5646_v23 }
 0x4ab   : > { %v5655_v58 = vmul.f32 %v1484_v1, %v5523_v31  ;;  %v1514_v30 = vadd.f32 %v1513_v60, %v5649_v44  ;;  %v1626_v31 = vmul.f32 -256.0, %v4530_v11  ;;  %v1654_v1 = vmul.f32 1.442695, %v1632_v53  ;;  %v8144_v60 = vld [vmem:[#allocation4_spill] sm:$0xff] }
 0x4ac   : > { %v5659_v49 = vmul.f32 %v1485_v57, %v5528_v55  ;;  %v1630_v55 = vmul.f32 -256.0, %v4542_v36  ;;  %v1627_v57 = vmul.f32 -256.0, %v8144_v60 }
 0x4ad   : > { %v1515_v32 = vadd.f32 %v1514_v30, %v5655_v58  ;;  %v1642_v46 = vmul.f32 1.442695, %v1626_v31  ;;  %v8145_v30 = vld [vmem:[#allocation9_spill] sm:$0xff] }
 0x4ae   : > { %v1650_v13 = vmul.f32 1.442695, %v1630_v55  ;;  %v8153_v55 = vld [vmem:[#allocation19_spill] sm:$0xff] }
 0x4af   : > { %v1516_v8 = vadd.f32 %v1515_v32, %v5659_v49  ;;  %v1633_v32 = vmul.f32 -256.0, %v8145_v30 }
 0x4b1   : > { %v1517_v52 = vrot.slane %v1516_v8, 4 }
 0x4b3   : > { %v1518_v5 = vadd.f32 %v1517_v52, %v1516_v8 }
 0x4b5   : > { %v1519_v25 = vrot.slane %v1518_v5, 2 }
 0x4b7   : > { %v1520_v14 = vadd.f32 %v1519_v25, %v1518_v5 }
 0x4b9   : > { %v1521_v19 = vrot.slane %v1520_v14, 1 }
 0x4bb   : > { %v1522_v22 = vadd.f32 %v1521_v19, %v1520_v14 }
 0x4bd   : > { %v1523_v50 = vadd.f32 1e-09, %v1522_v22 }
 0x4bf   : > { %3969 = vrcp.f32 %v1523_v50 }
 0x4c0   : > { %3971 = vpow2.f32 %v1642_v46 }
 0x4c1   : > { %3973 = vpow2.f32 %v1646_v0  ;;  %v8155_v0 = vld [vmem:[#allocation10_spill] sm:$0xff] }
 0x4c2   : > { %3975 = vpow2.f32 %v1650_v13  ;;  %v1634_v53 = vmul.f32 -256.0, %v8155_v0 }
 0x4c3   : > { %3977 = vpow2.f32 %v1654_v1  ;;  %v8161_v1 = vld [vmem:[#allocation21_spill] sm:$0xff] }
 0x4c9   : > { %v3970_v7 = vpop.eup %3969 }
 0x4ca   : > { %v1525_v29 = vmul.f32 %v3970_v7, %v5364_v42  ;;  %v3972_v7 = vpop.eup %3971 }
 0x4cc   : > { %v1526_v4 = vmin.f32 %v1525_v29, 1.0 }
 0x4ce   : > { %v1528_v8 = vmul.f32 %v1526_v4, %v5559_v2  ;;  %v1607_v52 = vmul.f32 %v1526_v4, %v1522_v22  ;;  %v1527_v5 = vmul.f32 %v1526_v4, %v5556_v24  ;;  %v1529_v25 = vmul.f32 %v1526_v4, %v5564_v43 }
 0x4cf   : > { %v1530_v14 = vmul.f32 %v1526_v4, %v5574_v3  ;;  %v1531_v19 = vmul.f32 %v1526_v4, %v5578_v15  ;;  %v1532_v50 = vmul.f32 %v1526_v4, %v5587_v28  ;;  %v5677_v31 = vmul.f32 %v1526_v4, %v5595_v26  ;;  %v8148_v3 = vld [vmem:[#allocation34_spill] sm:$0xff] }
 0x4d0   : > { %v1608_v46 = vsub.f32 %v5364_v42, %v1607_v52  ;;  %1545 = vadd.xlane.f32.xlu0 %v1528_v8  ;;  %v5681_v6 = vadd.f32 %v1528_v8, %v5351_v37  ;;  %1543 = vadd.xlane.f32.xlu1 %v1527_v5  ;;  %v5684_v24 = vadd.f32 %v1527_v5, %v5353_v61  ;;  %v8150_v28 = vld [vmem:[#allocation18_spill] sm:$0xff]  ;;  %v8152_v37 = vld [vmem:[#allocation3_spill] sm:$0xff] }
 0x4d1   : > { %v5687_v2 = vadd.f32 %v1529_v25, %v5355_v21  ;;  %v5690_v43 = vadd.f32 %v1530_v14, %v5357_v10  ;;  %v5693_v15 = vadd.f32 %v1531_v19, %v8148_v3  ;;  %v5696_v42 = vadd.f32 %v1532_v50, %v8150_v28  ;;  %v3974_v28 = vpop.eup %3973 }
 0x4d2   : > { %v5698_v26 = vmax.f32 %v1608_v46, 0.0  ;;  %v1629_v22 = vmul.f32 -256.0, %v8152_v37  ;;  %v5703_v61 = vadd.f32 %v5677_v31, %v8153_v55  ;;  %v5706_v21 = vmul.f32 %v1526_v4, %v5602_v63  ;;  %v8159_v55 = vld [vmem:[#allocation35_spill] sm:$0xff] }
 0x4d3   : > { %8146 = vst [vmem:[#allocation39_spill] sm:$0xff] %v5687_v2  ;;  %8147 = vst [vmem:[#allocation25_spill] sm:$0xff] %v5690_v43  ;;  %v1644_v10 = vmul.f32 1.442695, %v1627_v57  ;;  %v5710_v29 = vmul.f32 %v1526_v4, %v5611_v62  ;;  %v5713_v13 = vmul.f32 %v1526_v4, %v5615_v45  ;;  %v5719_v52 = vmul.f32 %v1526_v4, %v5624_v40  ;;  %v8156_v45 = vld [vmem:[#allocation7_spill] sm:$0xff] }
 0x4d4   : > { %8149 = vst [vmem:[#allocation40_spill] sm:$0xff] %v5693_v15  ;;  %8151 = vst [vmem:[#allocation26_spill] sm:$0xff] %v5696_v42  ;;  %1547 = vadd.xlane.f32.xlu0 %v1529_v25  ;;  %v5716_v8 = vmul.f32 %v3972_v7, %v5698_v26  ;;  %v5722_v63 = vmul.f32 %v1526_v4, %v5631_v39  ;;  %v1656_v57 = vmul.f32 1.442695, %v1633_v32  ;;  %v1648_v62 = vmul.f32 1.442695, %v1629_v22 }
 0x4d5   : > { %8154 = vst [vmem:[#allocation41_spill] sm:$0xff] %v5703_v61  ;;  %v5725_v5 = vmul.f32 %v1526_v4, %v5649_v44  ;;  %v1631_v46 = vmul.f32 -256.0, %v8156_v45  ;;  %v8157_v25 = vld [vmem:[#allocation20_spill] sm:$0xff]  ;;  %3979 = vpow2.f32 %v1644_v10  ;;  %v1658_v40 = vmul.f32 1.442695, %v1634_v53  ;;  %v8166_v10 = vld [vmem:[#allocation22_spill] sm:$0xff] }
 0x4d6   : > { %1690 = vadd.xlane.f32.xlu1 %v5716_v8  ;;  %v5731_v3 = vadd.f32 %v5706_v21, %v8157_v25  ;;  %v5735_v39 = vadd.f32 %v5710_v29, %v8159_v55  ;;  %v5739_v44 = vadd.f32 %v5713_v13, %v8161_v1  ;;  %v5742_v32 = vmul.f32 %v3974_v28, %v5698_v26  ;;  %v8163_v22 = vld [vmem:[#allocation12_spill] sm:$0xff]  ;;  %v8168_v55 = vld [vmem:[#allocation37_spill] sm:$0xff]  ;;  %v3976_v1 = vpop.eup %3975 }
 0x4d7   : > { %v1635_v7 = vmul.f32 -256.0, %v8163_v22  ;;  %v8164_v45 = vld [vmem:[#allocation36_spill] sm:$0xff]  ;;  %v5751_v53 = vadd.f32 %v5722_v63, %v8166_v10  ;;  %3981 = vpow2.f32 %v1656_v57  ;;  %v5761_v28 = vmul.f32 %v1526_v4, %v5659_v49 }
 0x4d8   : > { %8158 = vst [vmem:[#allocation27_spill] sm:$0xff] %v5731_v3  ;;  %8160 = vst [vmem:[#allocation42_spill] sm:$0xff] %v5735_v39  ;;  %1549 = vadd.xlane.f32.xlu0 %v1530_v14  ;;  %v5747_v25 = vadd.f32 %v5719_v52, %v8164_v45  ;;  %v5755_v39 = vadd.f32 %v5725_v5, %v8168_v55  ;;  %v5758_v14 = vmul.f32 %v1526_v4, %v5641_v35  ;;  %v8172_v55 = vld [vmem:[#allocation38_spill] sm:$0xff]  ;;  %v8174_v49 = vld [vmem:[#allocation24_spill] sm:$0xff] }
 0x4d9   : > { %8162 = vst [vmem:[#allocation28_spill] sm:$0xff] %v5739_v44  ;;  %8167 = vst [vmem:[#allocation29_spill] sm:$0xff] %v5751_v53  ;;  %v5765_v45 = vmul.f32 %v1526_v4, %v5655_v58  ;;  %3983 = vpow2.f32 %v1648_v62  ;;  %v1652_v10 = vmul.f32 1.442695, %v1631_v46  ;;  %v8170_v53 = vld [vmem:[#allocation23_spill] sm:$0xff]  ;;  %v5776_v35 = vmul.f32 %v3976_v1, %v5698_v26  ;;  %v3978_v46 = vpop.eup %3977 }
 0x4da   : > { %8165 = vst [vmem:[#allocation43_spill] sm:$0xff] %v5747_v25  ;;  %8169 = vst [vmem:[#allocation44_spill] sm:$0xff] %v5755_v39  ;;  %1694 = vadd.xlane.f32.xlu1 %v5742_v32  ;;  %v5769_v57 = vadd.f32 %v5758_v14, %v8170_v53  ;;  %v5773_v39 = vadd.f32 %v5761_v28, %v8172_v55  ;;  %3985 = vpow2.f32 %v1658_v40  ;;  %v1660_v58 = vmul.f32 1.442695, %v1635_v7  ;;  %v8176_v4 = vld [vmem:[#allocation11_spill] sm:$0xff]  ;;  %v8177_v55 = vld [vmem:[#allocation13_spill] sm:$0xff] }
 0x4db   : > { %v5780_v25 = vadd.f32 %v5765_v45, %v8174_v49  ;;  %v1636_v62 = vmul.f32 -256.0, %v8176_v4  ;;  %3987 = vpow2.f32 %v1652_v10  ;;  %v5785_v53 = vmul.f32 %v3978_v46, %v5698_v26  ;;  %v8178_v46 = vld [vmem:[#allocation14_spill] sm:$0xff] }
 0x4dc   : > { %8171 = vst [vmem:[#allocation30_spill] sm:$0xff] %v5769_v57  ;;  %8173 = vst [vmem:[#allocation45_spill] sm:$0xff] %v5773_v39  ;;  %1551 = vadd.xlane.f32.xlu0 %v1531_v19  ;;  %3989 = vpow2.f32 %v1660_v58  ;;  %v1637_v39 = vmul.f32 -256.0, %v8177_v55  ;;  %v1638_v4 = vmul.f32 -256.0, %v8178_v46 }
 0x4dd   : > { %8175 = vst [vmem:[#allocation31_spill] sm:$0xff] %v5780_v25  ;;  %v1662_v1 = vmul.f32 1.442695, %v1636_v62  ;;  %v8179_v25 = vld [vmem:[#allocation15_spill] sm:$0xff] }
 0x4de   : > { %1698 = vadd.xlane.f32.xlu1 %v5776_v35  ;;  %v1664_v10 = vmul.f32 1.442695, %v1637_v39  ;;  %v1639_v57 = vmul.f32 -256.0, %v8179_v25  ;;  %v8181_v25 = vld [vmem:[#allocation16_spill] sm:$0xff] }
 0x4df   : > { %v3980_v19 = vpop.eup %3979  ;;  %3991 = vpow2.f32 %v1662_v1  ;;  %v1641_v22 = vmul.f32 -256.0, %v8181_v25 }
 0x4e0   : > { %1553 = vadd.xlane.f32.xlu0 %v1532_v50  ;;  %v5790_v40 = vmul.f32 %v3980_v19, %v5698_v26  ;;  %3993 = vpow2.f32 %v1664_v10  ;;  %v1668_v46 = vmul.f32 1.442695, %v1639_v57 }
 0x4e1   : > { %v3982_v7 = vpop.eup %3981 }
 0x4e2   : > { %1702 = vadd.xlane.f32.xlu1 %v5785_v53  ;;  %v5794_v49 = vmul.f32 %v3982_v7, %v5698_v26  ;;  %v1666_v7 = vmul.f32 1.442695, %v1638_v4 }
 0x4e3   : > { %v3984_v50 = vpop.eup %3983 }
 0x4e4   : > { %1692 = vadd.xlane.f32.xlu0 %v5790_v40  ;;  %v5799_v58 = vmul.f32 %v3984_v50, %v5698_v26  ;;  %v3986_v62 = vpop.eup %3985  ;;  %3995 = vpow2.f32 %v1666_v7  ;;  %v1672_v7 = vmul.f32 1.442695, %v1641_v22 }
 0x4e5   : > { %v5803_v19 = vmul.f32 %v3986_v62, %v5698_v26  ;;  %v3988_v55 = vpop.eup %3987  ;;  %v8180_v62 = vld [vmem:[#allocation17_spill] sm:$0xff]  ;;  %3997 = vpow2.f32 %v1668_v46 }
 0x4e6   : > { %1704 = vadd.xlane.f32.xlu1 %v5794_v49  ;;  %v5808_v39 = vmul.f32 %v3988_v55, %v5698_v26  ;;  %v3990_v1 = vpop.eup %3989  ;;  %v1640_v44 = vmul.f32 -256.0, %v8180_v62 }
 0x4e7   : > { %v5812_v50 = vmul.f32 %v3990_v1, %v5698_v26 }
 0x4e8   : > { %1696 = vadd.xlane.f32.xlu0 %v5799_v58  ;;  %v1670_v55 = vmul.f32 1.442695, %v1640_v44 }
 0x4e9   : > { %v3992_v4 = vpop.eup %3991 }
 0x4ea   : > { %1706 = vadd.xlane.f32.xlu1 %v5803_v19  ;;  %v5818_v10 = vmul.f32 %v3992_v4, %v5698_v26  ;;  %v3994_v1 = vpop.eup %3993  ;;  %3999 = vpow2.f32 %v1670_v55 }
 0x4eb   : > { %v5824_v57 = vmul.f32 %v3994_v1, %v5698_v26  ;;  %4001 = vpow2.f32 %v1672_v7 }
 0x4ec   : > { %1700 = vadd.xlane.f32.xlu0 %v5808_v39 }
 0x4ee   : > { %1708 = vadd.xlane.f32.xlu1 %v5812_v50 }
 0x4f0   : > { %1555 = vadd.xlane.f32.xlu0 %v5677_v31  ;;  %v3996_v31 = vpop.eup %3995 }
 0x4f1   : > { %v5829_v46 = vmul.f32 %v3996_v31, %v5698_v26  ;;  %v3998_v44 = vpop.eup %3997 }
 0x4f2   : > { %1710 = vadd.xlane.f32.xlu1 %v5818_v10 }
 0x4f4   : > { %1557 = vadd.xlane.f32.xlu0 %v5706_v21  ;;  %v5834_v21 = vmul.f32 %v3998_v44, %v5698_v26  ;;  %v4000_v22 = vpop.eup %3999 }
 0x4f5   : > { %v5839_v4 = vmul.f32 %v4000_v22, %v5698_v26 }
 0x4f6   : > { %1712 = vadd.xlane.f32.xlu1 %v5824_v57 }
 0x4f8   : > { %1559 = vadd.xlane.f32.xlu0 %v5710_v29  ;;  %v4002_v29 = vpop.eup %4001 }
 0x4f9   : > { %v5844_v55 = vmul.f32 %v4002_v29, %v5698_v26 }
 0x4fa   : > { %1714 = vadd.xlane.f32.xlu1 %v5829_v46 }
 0x4fc   : > { %1561 = vadd.xlane.f32.xlu0 %v5713_v13 }
 0x4fe   : > { %1716 = vadd.xlane.f32.xlu1 %v5834_v21 }
 0x500   : > { %1563 = vadd.xlane.f32.xlu0 %v5719_v52 }
 0x502   : > { %1718 = vadd.xlane.f32.xlu1 %v5839_v4 }
 0x504   : > { %1565 = vadd.xlane.f32.xlu0 %v5722_v63 }
 0x506   : > { %1720 = vadd.xlane.f32.xlu1 %v5844_v55 }
 0x508   : > { %1569 = vadd.xlane.f32.xlu0 %v5725_v5 }
 0x50a   : > { %1567 = vadd.xlane.f32.xlu1 %v5758_v14 }
 0x50c   : > { %1573 = vadd.xlane.f32.xlu0 %v5761_v28 }
 0x50e   : > { %1571 = vadd.xlane.f32.xlu1 %v5765_v45 }
 0x55d   : > { %v1546_v13 = vpop.xlane.xlu0 %1545  ;;  %v1544_v52 = vpop.xlane.xlu1 %1543 }
 0x55e   : > { %v1575_v37 = vsub.f32 %v5538_v38, %v1544_v52 }
 0x560   : > { %v5854_v2 = vmax.f32 %v1575_v37, 0.0 }
 0x561   : > { %v1548_v1 = vpop.xlane.xlu0 %1547 }
 0x562   : > { %v1577_v43 = vsub.f32 %v5540_v41, %v1548_v1 }
 0x563   : > { %v1691_v7 = vpop.xlane.xlu1 %1690 }
 0x564   : > { %v1722_v29 = vadd.f32 1e-09, %v1691_v7  ;;  %v1576_v7 = vsub.f32 %v5543_v34, %v1546_v13 }
 0x565   : > { %v1550_v31 = vpop.xlane.xlu0 %1549 }
 0x566   : > { %4003 = vrcp.f32 %v1722_v29  ;;  %v1578_v41 = vsub.f32 %v5552_v56, %v1550_v31 }
 0x567   : > { %v1695_v44 = vpop.xlane.xlu1 %1694 }
 0x568   : > { %v1724_v25 = vadd.f32 1e-09, %v1695_v44 }
 0x569   : > { %v1552_v63 = vpop.xlane.xlu0 %1551 }
 0x56a   : > { %4005 = vrcp.f32 %v1724_v25  ;;  %v1579_v38 = vsub.f32 %v5550_v47, %v1552_v63 }
 0x56b   : > { %v1699_v22 = vpop.xlane.xlu1 %1698 }
 0x56c   : > { %v1726_v5 = vadd.f32 1e-09, %v1699_v22  ;;  %v5866_v47 = vmax.f32 %v1579_v38, 0.0 }
 0x56d   : > { %v1554_v62 = vpop.xlane.xlu0 %1553 }
 0x56e   : > { %v1580_v56 = vsub.f32 %v5571_v9, %v1554_v62 }
 0x56f   : > { %v1703_v3 = vpop.xlane.xlu1 %1702 }
 0x570   : > { %v1728_v42 = vadd.f32 1e-09, %v1703_v3  ;;  %v4004_v29 = vpop.eup %4003  ;;  %v5859_v3 = vmax.f32 %v1576_v7, 0.0  ;;  %v5887_v62 = vmax.f32 %v1580_v56, 0.0 }
 0x571   : > { %v1693_v14 = vpop.xlane.xlu0 %1692  ;;  %v1754_v34 = vmul.f32 %v4004_v29, %v5854_v2 }
 0x572   : > { %v1723_v0 = vadd.f32 1e-09, %v1693_v14  ;;  %v5856_v14 = vmax.f32 %v1577_v43, 0.0 }
 0x573   : > { %v1705_v28 = vpop.xlane.xlu1 %1704  ;;  %v5872_v7 = vmul.f32 %v1754_v34, %v5716_v8 }
 0x574   : > { %4007 = vrcp.f32 %v1723_v0  ;;  %v4006_v22 = vpop.eup %4005  ;;  %v1729_v0 = vadd.f32 1e-09, %v1705_v28 }
 0x575   : > { %4009 = vrcp.f32 %v1726_v5  ;;  %v1697_v45 = vpop.xlane.xlu0 %1696  ;;  %v1756_v52 = vmul.f32 %v4006_v22, %v5856_v14 }
 0x576   : > { %v1725_v61 = vadd.f32 1e-09, %v1697_v45  ;;  %v5868_v45 = vmax.f32 %v1578_v41, 0.0 }
 0x577   : > { %v1707_v15 = vpop.xlane.xlu1 %1706 }
 0x578   : > { %4011 = vrcp.f32 %v1725_v61 }
 0x579   : > { %v1701_v44 = vpop.xlane.xlu0 %1700  ;;  %4013 = vrcp.f32 %v1728_v42  ;;  %v1730_v42 = vadd.f32 1e-09, %v1707_v15 }
 0x57a   : > { %v1727_v25 = vadd.f32 1e-09, %v1701_v44 }
 0x57b   : > { %v1709_v5 = vpop.xlane.xlu1 %1708 }
 0x57c   : > { %4015 = vrcp.f32 %v1727_v25  ;;  %v1731_v63 = vadd.f32 1e-09, %v1709_v5  ;;  %v5880_v25 = vmul.f32 %v1756_v52, %v5742_v32 }
 0x57d   : > { %v1556_v61 = vpop.xlane.xlu0 %1555  ;;  %4017 = vrcp.f32 %v1729_v0 }
 0x57e   : > { %v4008_v13 = vpop.eup %4007  ;;  %v1581_v1 = vsub.f32 %v5567_v27, %v1556_v61  ;;  %4019 = vrcp.f32 %v1730_v42 }
 0x57f   : > { %v4010_v37 = vpop.eup %4009  ;;  %v1711_v43 = vpop.xlane.xlu1 %1710  ;;  %v1755_v28 = vmul.f32 %v4008_v13, %v5859_v3  ;;  %4021 = vrcp.f32 %v1731_v63 }
 0x580   : > { %v1758_v27 = vmul.f32 %v4010_v37, %v5866_v47  ;;  %v5883_v0 = vmax.f32 %v1581_v1, 0.0  ;;  %v1732_v5 = vadd.f32 1e-09, %v1711_v43 }
 0x581   : > { %v1558_v31 = vpop.xlane.xlu0 %1557  ;;  %v5875_v44 = vmul.f32 %v1755_v28, %v5790_v40 }
 0x582   : > { %v4012_v15 = vpop.eup %4011  ;;  %v1582_v29 = vsub.f32 %v5580_v59, %v1558_v31  ;;  %v5894_v61 = vmul.f32 %v1758_v27, %v5776_v35  ;;  %4023 = vrcp.f32 %v1732_v5 }
 0x583   : > { %v1757_v22 = vmul.f32 %v4012_v15, %v5868_v45  ;;  %v1713_v9 = vpop.xlane.xlu1 %1712  ;;  %v1786_v8 = vadd.f32 %v5875_v44, %v5872_v7  ;;  %v4014_v40 = vpop.eup %4013 }
 0x584   : > { %v5896_v34 = vmax.f32 %v1582_v29, 0.0  ;;  %v1760_v37 = vmul.f32 %v4014_v40, %v5883_v0  ;;  %v1733_v42 = vadd.f32 1e-09, %v1713_v9 }
 0x585   : > { %v1560_v38 = vpop.xlane.xlu0 %1559  ;;  %v5890_v59 = vmul.f32 %v1757_v22, %v5799_v58  ;;  %v1787_v32 = vadd.f32 %v1786_v8, %v5880_v25 }
 0x586   : > { %v4016_v41 = vpop.eup %4015  ;;  %v1583_v13 = vsub.f32 %v5591_v20, %v1560_v38  ;;  %v5911_v15 = vmul.f32 %v1760_v37, %v5785_v53  ;;  %4025 = vrcp.f32 %v1733_v42 }
 0x587   : > { %v1759_v52 = vmul.f32 %v4016_v41, %v5887_v62  ;;  %v1715_v1 = vpop.xlane.xlu1 %1714  ;;  %v1788_v43 = vadd.f32 %v1787_v32, %v5890_v59  ;;  %v4018_v58 = vpop.eup %4017 }
 0x588   : > { %v1761_v56 = vmul.f32 %v4018_v58, %v5896_v34  ;;  %v5907_v31 = vmax.f32 %v1583_v13, 0.0  ;;  %v4020_v9 = vpop.eup %4019  ;;  %v1734_v8 = vadd.f32 1e-09, %v1715_v1 }
 0x589   : > { %v5903_v28 = vmul.f32 %v1759_v52, %v5808_v39  ;;  %v1562_v63 = vpop.xlane.xlu0 %1561  ;;  %v1789_v35 = vadd.f32 %v1788_v43, %v5894_v61  ;;  %v4022_v38 = vpop.eup %4021 }
 0x58a   : > { %v1584_v20 = vsub.f32 %v5598_v16, %v1562_v63  ;;  %v5918_v32 = vmul.f32 %v1761_v56, %v5794_v49  ;;  %v1762_v16 = vmul.f32 %v4020_v9, %v5907_v31 }
 0x58b   : > { %v1717_v27 = vpop.xlane.xlu1 %1716  ;;  %v1790_v29 = vadd.f32 %v1789_v35, %v5903_v28 }
 0x58c   : > { %v5914_v22 = vmax.f32 %v1584_v20, 0.0  ;;  %v1735_v39 = vadd.f32 1e-09, %v1717_v27  ;;  %v5927_v43 = vmul.f32 %v1762_v16, %v5803_v19  ;;  %v4024_v58 = vpop.eup %4023 }
 0x58d   : > { %v1564_v40 = vpop.xlane.xlu0 %1563  ;;  %v1791_v5 = vadd.f32 %v1790_v29, %v5911_v15 }
 0x58e   : > { %v1585_v53 = vsub.f32 %v5607_v18, %v1564_v40  ;;  %v1763_v41 = vmul.f32 %v4022_v38, %v5914_v22  ;;  %4027 = vrcp.f32 %v1735_v39 }
 0x58f   : > { %v1719_v13 = vpop.xlane.xlu1 %1718  ;;  %v1792_v37 = vadd.f32 %v1791_v5, %v5918_v32  ;;  %4029 = vrcp.f32 %v1734_v8 }
 0x590   : > { %v5923_v52 = vmax.f32 %v1585_v53, 0.0  ;;  %v1736_v42 = vadd.f32 1e-09, %v1719_v13  ;;  %v5931_v63 = vmul.f32 %v1763_v41, %v5812_v50  ;;  %v4026_v29 = vpop.eup %4025 }
 0x591   : > { %v1566_v1 = vpop.xlane.xlu0 %1565  ;;  %v1793_v27 = vadd.f32 %v1792_v37, %v5927_v43 }
 0x592   : > { %v1586_v49 = vsub.f32 %v5618_v33, %v1566_v1  ;;  %v1764_v35 = vmul.f32 %v4024_v58, %v5923_v52  ;;  %4031 = vrcp.f32 %v1736_v42 }
 0x593   : > { %v1721_v18 = vpop.xlane.xlu1 %1720  ;;  %v1794_v5 = vadd.f32 %v1793_v27, %v5931_v63 }
 0x594   : > { %v5934_v56 = vmax.f32 %v1586_v49, 0.0  ;;  %v1737_v20 = vadd.f32 1e-09, %v1721_v18  ;;  %v5940_v50 = vmul.f32 %v1764_v35, %v5818_v10 }
 0x595   : > { %v1570_v39 = vpop.xlane.xlu0 %1569 }
 0x596   : > { %v1765_v19 = vmul.f32 %v4026_v29, %v5934_v56  ;;  %4033 = vrcp.f32 %v1737_v20  ;;  %v1588_v33 = vsub.f32 %v5626_v48, %v1570_v39 }
 0x597   : > { %v1568_v9 = vpop.xlane.xlu1 %1567 }
 0x598   : > { %v5942_v8 = vmax.f32 %v1588_v33, 0.0  ;;  %v1587_v40 = vsub.f32 %v5633_v17, %v1568_v9  ;;  %v4028_v38 = vpop.eup %4027  ;;  %v5947_v53 = vmul.f32 %v1765_v19, %v5824_v57  ;;  %v1795_v17 = vadd.f32 %v1794_v5, %v5940_v50 }
 0x599   : > { %v1574_v16 = vpop.xlane.xlu0 %1573  ;;  %v4030_v13 = vpop.eup %4029 }
 0x59a   : > { %v5949_v41 = vmax.f32 %v1587_v40, 0.0  ;;  %v1590_v48 = vsub.f32 %v5646_v23, %v1574_v16  ;;  %v1767_v10 = vmul.f32 %v4028_v38, %v5942_v8  ;;  %v1796_v57 = vadd.f32 %v1795_v17, %v5947_v53 }
 0x59b   : > { %v1572_v37 = vpop.xlane.xlu1 %1571  ;;  %v1916_v17 = vmul.f32 -64.0, %v4562_v12 }
 0x59c   : > { %v1766_v42 = vmul.f32 %v4030_v13, %v5949_v41  ;;  %v1589_v1 = vsub.f32 %v5643_v54, %v1572_v37  ;;  %v4032_v18 = vpop.eup %4031  ;;  %v5962_v35 = vmax.f32 %v1590_v48, 0.0  ;;  %v5965_v20 = vmul.f32 %v1767_v10, %v5834_v21 }
 0x59d   : > { %v1912_v10 = vmul.f32 -64.0, %v4548_v51 }
 0x59e   : > { %v5957_v49 = vmul.f32 %v1766_v42, %v5829_v46  ;;  %v5959_v58 = vmax.f32 %v1589_v1, 0.0 }
 0x59f   : > { %v1930_v1 = vmul.f32 1.442695, %v1912_v10 }
 0x5a0   : > { %v4034_v23 = vpop.eup %4033  ;;  %v1768_v27 = vmul.f32 %v4032_v18, %v5959_v58  ;;  %v1797_v54 = vadd.f32 %v1796_v57, %v5957_v49 }
 0x5a1   : > { %v1769_v29 = vmul.f32 %v4034_v23, %v5962_v35 }
 0x5a2   : > { %v5971_v46 = vmul.f32 %v1768_v27, %v5839_v4  ;;  %v1798_v39 = vadd.f32 %v1797_v54, %v5965_v20  ;;  %v1910_v4 = vmul.f32 -64.0, %v4530_v11  ;;  %v1938_v27 = vmul.f32 1.442695, %v1916_v17 }
 0x5a3   : > { %v5975_v19 = vmul.f32 %v1769_v29, %v5844_v55  ;;  %v1914_v55 = vmul.f32 -64.0, %v4542_v36  ;;  %v1911_v54 = vmul.f32 -64.0, %v8144_v60  ;;  %v1917_v29 = vmul.f32 -64.0, %v8145_v30 }
 0x5a4   : > { %v1799_v33 = vadd.f32 %v1798_v39, %v5971_v46  ;;  %v1926_v37 = vmul.f32 1.442695, %v1910_v4 }
 0x5a5   : > { %v1934_v23 = vmul.f32 1.442695, %v1914_v55  ;;  %v8191_v55 = vld [vmem:[#allocation41_spill] sm:$0xff]  ;;  %v1928_v17 = vmul.f32 1.442695, %v1911_v54 }
 0x5a6   : > { %v1800_v9 = vadd.f32 %v1799_v33, %v5975_v19  ;;  %v1940_v54 = vmul.f32 1.442695, %v1917_v29  ;;  %v8200_v29 = vld [vmem:[#allocation28_spill] sm:$0xff] }
 0x5a8   : > { %v1801_v21 = vrot.slane %v1800_v9, 4 }
 0x5aa   : > { %v1802_v40 = vadd.f32 %v1801_v21, %v1800_v9 }
 0x5ac   : > { %v1803_v5 = vrot.slane %v1802_v40, 2 }
 0x5ae   : > { %v1804_v38 = vadd.f32 %v1803_v5, %v1802_v40 }
 0x5b0   : > { %v1805_v16 = vrot.slane %v1804_v38, 1 }
 0x5b2   : > { %v1806_v13 = vadd.f32 %v1805_v16, %v1804_v38 }
 0x5b4   : > { %v1807_v48 = vadd.f32 1e-09, %v1806_v13 }
 0x5b6   : > { %4035 = vrcp.f32 %v1807_v48 }
 0x5b7   : > { %4037 = vpow2.f32 %v1926_v37 }
 0x5b8   : > { %4039 = vpow2.f32 %v1930_v1 }
 0x5b9   : > { %4041 = vpow2.f32 %v1934_v23 }
 0x5ba   : > { %4043 = vpow2.f32 %v1938_v27 }
 0x5bb   : > { %4045 = vpow2.f32 %v1928_v17  ;;  %v8204_v17 = vld [vmem:[#allocation29_spill] sm:$0xff] }
 0x5bc   : > { %4047 = vpow2.f32 %v1940_v54 }
 0x5c0   : > { %v4036_v42 = vpop.eup %4035 }
 0x5c1   : > { %v1809_v57 = vmul.f32 %v4036_v42, %v5698_v26  ;;  %v4038_v1 = vpop.eup %4037 }
 0x5c3   : > { %v1810_v18 = vmin.f32 %v1809_v57, 1.0 }
 0x5c5   : > { %v1812_v39 = vmul.f32 %v1810_v18, %v5875_v44  ;;  %v1891_v33 = vmul.f32 %v1810_v18, %v1806_v13  ;;  %v1811_v9 = vmul.f32 %v1810_v18, %v5872_v7  ;;  %v1813_v21 = vmul.f32 %v1810_v18, %v5880_v25  ;;  %v8182_v44 = vld [vmem:[#allocation39_spill] sm:$0xff]  ;;  %v8188_v13 = vld [vmem:[#allocation26_spill] sm:$0xff] }
 0x5c6   : > { %v1814_v40 = vmul.f32 %v1810_v18, %v5890_v59  ;;  %v1815_v5 = vmul.f32 %v1810_v18, %v5894_v61  ;;  %v1816_v38 = vmul.f32 %v1810_v18, %v5903_v28  ;;  %v5993_v16 = vmul.f32 %v1810_v18, %v5911_v15  ;;  %v8184_v59 = vld [vmem:[#allocation25_spill] sm:$0xff]  ;;  %v8186_v28 = vld [vmem:[#allocation40_spill] sm:$0xff] }
 0x5c7   : > { %v1892_v48 = vsub.f32 %v5698_v26, %v1891_v33  ;;  %1829 = vadd.xlane.f32.xlu0 %v1812_v39  ;;  %v5997_v4 = vadd.f32 %v1812_v39, %v5681_v6  ;;  %1827 = vadd.xlane.f32.xlu1 %v1811_v9  ;;  %v6000_v7 = vadd.f32 %v1811_v9, %v5684_v24  ;;  %v8190_v6 = vld [vmem:[#allocation3_spill] sm:$0xff]  ;;  %v8193_v33 = vld [vmem:[#allocation10_spill] sm:$0xff] }
 0x5c8   : > { %v6003_v25 = vadd.f32 %v1813_v21, %v8182_v44  ;;  %v6006_v61 = vadd.f32 %v1814_v40, %v8184_v59  ;;  %v6009_v15 = vadd.f32 %v1815_v5, %v8186_v28  ;;  %v6012_v26 = vadd.f32 %v1816_v38, %v8188_v13  ;;  %v8195_v59 = vld [vmem:[#allocation27_spill] sm:$0xff]  ;;  %v4040_v13 = vpop.eup %4039 }
 0x5c9   : > { %v6014_v37 = vmax.f32 %v1892_v48, 0.0  ;;  %v1913_v10 = vmul.f32 -64.0, %v8190_v6  ;;  %v6019_v24 = vadd.f32 %v5993_v16, %v8191_v55  ;;  %v6022_v42 = vmul.f32 %v1810_v18, %v5918_v32 }
 0x5ca   : > { %8183 = vst [vmem:[#allocation46_spill] sm:$0xff] %v6003_v25  ;;  %8185 = vst [vmem:[#allocation32_spill] sm:$0xff] %v6006_v61  ;;  %v6025_v57 = vmul.f32 %v1810_v18, %v5927_v43  ;;  %v6028_v23 = vmul.f32 %v1810_v18, %v5931_v63  ;;  %v1918_v9 = vmul.f32 -64.0, %v8193_v33  ;;  %v6035_v48 = vmul.f32 %v1810_v18, %v5940_v50  ;;  %v8197_v50 = vld [vmem:[#allocation12_spill] sm:$0xff] }
 0x5cb   : > { %8187 = vst [vmem:[#allocation47_spill] sm:$0xff] %v6009_v15  ;;  %8189 = vst [vmem:[#allocation33_spill] sm:$0xff] %v6012_v26  ;;  %1831 = vadd.xlane.f32.xlu0 %v1813_v21  ;;  %v6031_v39 = vmul.f32 %v4038_v1, %v6014_v37  ;;  %v6038_v32 = vmul.f32 %v1810_v18, %v5947_v53  ;;  %v6041_v43 = vmul.f32 %v1810_v18, %v5965_v20  ;;  %v8194_v21 = vld [vmem:[#allocation7_spill] sm:$0xff]  ;;  %v8198_v53 = vld [vmem:[#allocation42_spill] sm:$0xff] }
 0x5cc   : > { %8192 = vst [vmem:[#allocation48_spill] sm:$0xff] %v6019_v24  ;;  %v1932_v63 = vmul.f32 1.442695, %v1913_v10  ;;  %v1915_v44 = vmul.f32 -64.0, %v8194_v21  ;;  %v6047_v28 = vadd.f32 %v6022_v42, %v8195_v59  ;;  %v1919_v55 = vmul.f32 -64.0, %v8197_v50  ;;  %v8202_v21 = vld [vmem:[#allocation43_spill] sm:$0xff] }
 0x5cd   : > { %1974 = vadd.xlane.f32.xlu1 %v6031_v39  ;;  %v6052_v27 = vadd.f32 %v6025_v57, %v8198_v53  ;;  %v6056_v20 = vadd.f32 %v6028_v23, %v8200_v29  ;;  %v6059_v10 = vmul.f32 %v4040_v13, %v6014_v37  ;;  %v1942_v1 = vmul.f32 1.442695, %v1918_v9  ;;  %v8206_v53 = vld [vmem:[#allocation44_spill] sm:$0xff]  ;;  %v4042_v9 = vpop.eup %4041 }
 0x5ce   : > { %8196 = vst [vmem:[#allocation34_spill] sm:$0xff] %v6047_v28  ;;  %v6063_v59 = vadd.f32 %v6035_v48, %v8202_v21  ;;  %v6067_v50 = vadd.f32 %v6038_v32, %v8204_v17  ;;  %v6074_v29 = vmul.f32 %v1810_v18, %v5957_v49  ;;  %v6081_v21 = vmul.f32 %v1810_v18, %v5971_v46  ;;  %v8208_v17 = vld [vmem:[#allocation30_spill] sm:$0xff] }
 0x5cf   : > { %8199 = vst [vmem:[#allocation18_spill] sm:$0xff] %v6052_v27  ;;  %8201 = vst [vmem:[#allocation19_spill] sm:$0xff] %v6056_v20  ;;  %1833 = vadd.xlane.f32.xlu0 %v1814_v40  ;;  %v6071_v27 = vadd.f32 %v6041_v43, %v8206_v53  ;;  %v6077_v40 = vmul.f32 %v1810_v18, %v5975_v19  ;;  %4049 = vpow2.f32 %v1932_v63  ;;  %v1936_v13 = vmul.f32 1.442695, %v1915_v44  ;;  %v8210_v53 = vld [vmem:[#allocation45_spill] sm:$0xff]  ;;  %v8212_v19 = vld [vmem:[#allocation31_spill] sm:$0xff]  ;;  %v4044_v44 = vpop.eup %4043 }
 0x5d0   : > { %8203 = vst [vmem:[#allocation20_spill] sm:$0xff] %v6063_v59  ;;  %8205 = vst [vmem:[#allocation35_spill] sm:$0xff] %v6067_v50  ;;  %v6085_v54 = vadd.f32 %v6074_v29, %v8208_v17  ;;  %v6092_v49 = vmul.f32 %v4042_v9, %v6014_v37  ;;  %v6096_v50 = vadd.f32 %v6081_v21, %v8212_v19  ;;  %4051 = vpow2.f32 %v1942_v1  ;;  %v8214_v18 = vld [vmem:[#allocation11_spill] sm:$0xff] }
 0x5d1   : > { %8207 = vst [vmem:[#allocation21_spill] sm:$0xff] %v6071_v27  ;;  %1978 = vadd.xlane.f32.xlu1 %v6059_v10  ;;  %v6089_v27 = vadd.f32 %v6077_v40, %v8210_v53  ;;  %v1944_v46 = vmul.f32 1.442695, %v1919_v55  ;;  %v1920_v63 = vmul.f32 -64.0, %v8214_v18  ;;  %4053 = vpow2.f32 %v1936_v13  ;;  %v8215_v53 = vld [vmem:[#allocation13_spill] sm:$0xff] }
 0x5d2   : > { %8209 = vst [vmem:[#allocation36_spill] sm:$0xff] %v6085_v54  ;;  %8213 = vst [vmem:[#allocation37_spill] sm:$0xff] %v6096_v50  ;;  %v6101_v17 = vmul.f32 %v4044_v44, %v6014_v37  ;;  %v8216_v44 = vld [vmem:[#allocation14_spill] sm:$0xff]  ;;  %v8217_v50 = vld [vmem:[#allocation15_spill] sm:$0xff] }
 0x5d3   : > { %8211 = vst [vmem:[#allocation22_spill] sm:$0xff] %v6089_v27  ;;  %1835 = vadd.xlane.f32.xlu0 %v1815_v5  ;;  %v4046_v5 = vpop.eup %4045  ;;  %4055 = vpow2.f32 %v1944_v46  ;;  %v1946_v9 = vmul.f32 1.442695, %v1920_v63  ;;  %v1921_v27 = vmul.f32 -64.0, %v8215_v53  ;;  %v1922_v18 = vmul.f32 -64.0, %v8216_v44 }
 0x5d4   : > { %v6106_v1 = vmul.f32 %v4046_v5, %v6014_v37  ;;  %v4048_v55 = vpop.eup %4047  ;;  %v1923_v54 = vmul.f32 -64.0, %v8217_v50  ;;  %v8219_v50 = vld [vmem:[#allocation16_spill] sm:$0xff] }
 0x5d5   : > { %1982 = vadd.xlane.f32.xlu1 %v6092_v49  ;;  %v6110_v19 = vmul.f32 %v4048_v55, %v6014_v37  ;;  %4057 = vpow2.f32 %v1946_v9  ;;  %v1948_v13 = vmul.f32 1.442695, %v1921_v27  ;;  %v1950_v55 = vmul.f32 1.442695, %v1922_v18 }
 0x5d6   : > { %v1952_v44 = vmul.f32 1.442695, %v1923_v54  ;;  %v1925_v20 = vmul.f32 -64.0, %v8219_v50 }
 0x5d7   : > { %1837 = vadd.xlane.f32.xlu0 %v1816_v38  ;;  %4059 = vpow2.f32 %v1948_v13 }
 0x5d8   : > { %4061 = vpow2.f32 %v1950_v55  ;;  %v1956_v55 = vmul.f32 1.442695, %v1925_v20 }
 0x5d9   : > { %1986 = vadd.xlane.f32.xlu1 %v6101_v17  ;;  %v4050_v38 = vpop.eup %4049  ;;  %4063 = vpow2.f32 %v1952_v44 }
 0x5da   : > { %v6115_v46 = vmul.f32 %v4050_v38, %v6014_v37  ;;  %v4052_v63 = vpop.eup %4051 }
 0x5db   : > { %1976 = vadd.xlane.f32.xlu0 %v6106_v1  ;;  %v6119_v5 = vmul.f32 %v4052_v63, %v6014_v37  ;;  %v4054_v53 = vpop.eup %4053  ;;  %v8218_v63 = vld [vmem:[#allocation17_spill] sm:$0xff] }
 0x5dc   : > { %v6124_v27 = vmul.f32 %v4054_v53, %v6014_v37  ;;  %v1924_v59 = vmul.f32 -64.0, %v8218_v63 }
 0x5dd   : > { %1988 = vadd.xlane.f32.xlu1 %v6110_v19  ;;  %v4056_v9 = vpop.eup %4055 }
 0x5de   : > { %v6128_v38 = vmul.f32 %v4056_v9, %v6014_v37  ;;  %v1954_v53 = vmul.f32 1.442695, %v1924_v59 }
 0x5df   : > { %1980 = vadd.xlane.f32.xlu0 %v6115_v46  ;;  %v4058_v18 = vpop.eup %4057 }
 0x5e0   : > { %v6134_v13 = vmul.f32 %v4058_v18, %v6014_v37  ;;  %4065 = vpow2.f32 %v1954_v53 }
 0x5e1   : > { %1990 = vadd.xlane.f32.xlu1 %v6119_v5  ;;  %v4060_v9 = vpop.eup %4059  ;;  %4067 = vpow2.f32 %v1956_v55 }
 0x5e2   : > { %v6140_v54 = vmul.f32 %v4060_v9, %v6014_v37 }
 0x5e3   : > { %1984 = vadd.xlane.f32.xlu0 %v6124_v27 }
 0x5e5   : > { %1992 = vadd.xlane.f32.xlu1 %v6128_v38 }
 0x5e7   : > { %1839 = vadd.xlane.f32.xlu0 %v5993_v16  ;;  %v4062_v16 = vpop.eup %4061 }
 0x5e8   : > { %v6145_v44 = vmul.f32 %v4062_v16, %v6014_v37  ;;  %v4064_v59 = vpop.eup %4063 }
 0x5e9   : > { %1994 = vadd.xlane.f32.xlu1 %v6134_v13 }
 0x5ea   : > { %v4066_v20 = vpop.eup %4065 }
 0x5eb   : > { %1841 = vadd.xlane.f32.xlu0 %v6022_v42  ;;  %v6150_v42 = vmul.f32 %v4064_v59, %v6014_v37  ;;  %v6155_v18 = vmul.f32 %v4066_v20, %v6014_v37 }
 0x5ed   : > { %1996 = vadd.xlane.f32.xlu1 %v6140_v54 }
 0x5ef   : > { %1843 = vadd.xlane.f32.xlu0 %v6025_v57  ;;  %v4068_v57 = vpop.eup %4067 }
 0x5f0   : > { %v6160_v53 = vmul.f32 %v4068_v57, %v6014_v37 }
 0x5f1   : > { %1998 = vadd.xlane.f32.xlu1 %v6145_v44 }
 0x5f3   : > { %1845 = vadd.xlane.f32.xlu0 %v6028_v23 }
 0x5f5   : > { %2000 = vadd.xlane.f32.xlu1 %v6150_v42 }
 0x5f7   : > { %1847 = vadd.xlane.f32.xlu0 %v6035_v48 }
 0x5f9   : > { %2002 = vadd.xlane.f32.xlu1 %v6155_v18 }
 0x5fb   : > { %1849 = vadd.xlane.f32.xlu0 %v6038_v32 }
 0x5fd   : > { %2004 = vadd.xlane.f32.xlu1 %v6160_v53 }
 0x5ff   : > { %1853 = vadd.xlane.f32.xlu0 %v6041_v43 }
 0x601   : > { %1851 = vadd.xlane.f32.xlu1 %v6074_v29 }
 0x603   : > { %1857 = vadd.xlane.f32.xlu0 %v6077_v40 }
 0x605   : > { %1855 = vadd.xlane.f32.xlu1 %v6081_v21 }
 0x654   : > { %v1830_v23 = vpop.xlane.xlu0 %1829  ;;  %v1828_v48 = vpop.xlane.xlu1 %1827 }
 0x655   : > { %v1859_v6 = vsub.f32 %v5854_v2, %v1828_v48 }
 0x657   : > { %v6170_v25 = vmax.f32 %v1859_v6, 0.0 }
 0x658   : > { %v1832_v9 = vpop.xlane.xlu0 %1831 }
 0x659   : > { %v1861_v61 = vsub.f32 %v5856_v14, %v1832_v9 }
 0x65a   : > { %v1975_v55 = vpop.xlane.xlu1 %1974 }
 0x65b   : > { %v2006_v57 = vadd.f32 1e-09, %v1975_v55  ;;  %v1860_v55 = vsub.f32 %v5859_v3, %v1830_v23 }
 0x65c   : > { %v1834_v16 = vpop.xlane.xlu0 %1833 }
 0x65d   : > { %4069 = vrcp.f32 %v2006_v57  ;;  %v1862_v14 = vsub.f32 %v5868_v45, %v1834_v16 }
 0x65e   : > { %v1979_v59 = vpop.xlane.xlu1 %1978 }
 0x65f   : > { %v2008_v50 = vadd.f32 1e-09, %v1979_v59 }
 0x660   : > { %v1836_v32 = vpop.xlane.xlu0 %1835 }
 0x661   : > { %4071 = vrcp.f32 %v2008_v50  ;;  %v1863_v2 = vsub.f32 %v5866_v47, %v1836_v32 }
 0x662   : > { %v1983_v20 = vpop.xlane.xlu1 %1982 }
 0x663   : > { %v2010_v43 = vadd.f32 1e-09, %v1983_v20  ;;  %v6182_v47 = vmax.f32 %v1863_v2, 0.0 }
 0x664   : > { %v1838_v63 = vpop.xlane.xlu0 %1837 }
 0x665   : > { %v1864_v45 = vsub.f32 %v5887_v62, %v1838_v63 }
 0x666   : > { %v1987_v28 = vpop.xlane.xlu1 %1986 }
 0x667   : > { %v2012_v26 = vadd.f32 1e-09, %v1987_v28  ;;  %v4070_v57 = vpop.eup %4069  ;;  %v6175_v28 = vmax.f32 %v1860_v55, 0.0  ;;  %v6203_v63 = vmax.f32 %v1864_v45, 0.0 }
 0x668   : > { %v1977_v29 = vpop.xlane.xlu0 %1976  ;;  %v2038_v3 = vmul.f32 %v4070_v57, %v6170_v25 }
 0x669   : > { %v2007_v33 = vadd.f32 1e-09, %v1977_v29  ;;  %v6172_v29 = vmax.f32 %v1861_v61, 0.0 }
 0x66a   : > { %v1989_v40 = vpop.xlane.xlu1 %1988  ;;  %v6188_v55 = vmul.f32 %v2038_v3, %v6031_v39 }
 0x66b   : > { %4073 = vrcp.f32 %v2007_v33  ;;  %v4072_v20 = vpop.eup %4071  ;;  %v2013_v33 = vadd.f32 1e-09, %v1989_v40 }
 0x66c   : > { %4075 = vrcp.f32 %v2010_v43  ;;  %v1981_v21 = vpop.xlane.xlu0 %1980  ;;  %v2040_v48 = vmul.f32 %v4072_v20, %v6172_v29 }
 0x66d   : > { %v2009_v24 = vadd.f32 1e-09, %v1981_v21  ;;  %v6184_v21 = vmax.f32 %v1862_v14, 0.0 }
 0x66e   : > { %v1991_v15 = vpop.xlane.xlu1 %1990 }
 0x66f   : > { %4077 = vrcp.f32 %v2009_v24 }
 0x670   : > { %v1985_v59 = vpop.xlane.xlu0 %1984  ;;  %4079 = vrcp.f32 %v2012_v26  ;;  %v2014_v26 = vadd.f32 1e-09, %v1991_v15 }
 0x671   : > { %v2011_v50 = vadd.f32 1e-09, %v1985_v59 }
 0x672   : > { %v1993_v43 = vpop.xlane.xlu1 %1992 }
 0x673   : > { %4081 = vrcp.f32 %v2011_v50  ;;  %v2015_v32 = vadd.f32 1e-09, %v1993_v43  ;;  %v6196_v50 = vmul.f32 %v2040_v48, %v6059_v10 }
 0x674   : > { %v1840_v24 = vpop.xlane.xlu0 %1839  ;;  %4083 = vrcp.f32 %v2013_v33 }
 0x675   : > { %v4074_v23 = vpop.eup %4073  ;;  %v1865_v9 = vsub.f32 %v5883_v0, %v1840_v24  ;;  %4085 = vrcp.f32 %v2014_v26 }
 0x676   : > { %v4076_v6 = vpop.eup %4075  ;;  %v1995_v61 = vpop.xlane.xlu1 %1994  ;;  %v2039_v40 = vmul.f32 %v4074_v23, %v6175_v28  ;;  %4087 = vrcp.f32 %v2015_v32 }
 0x677   : > { %v2042_v0 = vmul.f32 %v4076_v6, %v6182_v47  ;;  %v6199_v33 = vmax.f32 %v1865_v9, 0.0  ;;  %v2016_v43 = vadd.f32 1e-09, %v1995_v61 }
 0x678   : > { %v1842_v16 = vpop.xlane.xlu0 %1841  ;;  %v6191_v59 = vmul.f32 %v2039_v40, %v6106_v1 }
 0x679   : > { %v4078_v15 = vpop.eup %4077  ;;  %v1866_v57 = vsub.f32 %v5896_v34, %v1842_v16  ;;  %v6210_v24 = vmul.f32 %v2042_v0, %v6092_v49  ;;  %4089 = vrcp.f32 %v2016_v43 }
 0x67a   : > { %v2041_v20 = vmul.f32 %v4078_v15, %v6184_v21  ;;  %v1997_v62 = vpop.xlane.xlu1 %1996  ;;  %v2070_v39 = vadd.f32 %v6191_v59, %v6188_v55  ;;  %v4080_v1 = vpop.eup %4079 }
 0x67b   : > { %v6212_v3 = vmax.f32 %v1866_v57, 0.0  ;;  %v2044_v6 = vmul.f32 %v4080_v1, %v6199_v33  ;;  %v2017_v26 = vadd.f32 1e-09, %v1997_v62 }
 0x67c   : > { %v1844_v2 = vpop.xlane.xlu0 %1843  ;;  %v6206_v34 = vmul.f32 %v2041_v20, %v6115_v46  ;;  %v2071_v10 = vadd.f32 %v2070_v39, %v6196_v50 }
 0x67d   : > { %v4082_v14 = vpop.eup %4081  ;;  %v1867_v23 = vsub.f32 %v5907_v31, %v1844_v2  ;;  %v6227_v15 = vmul.f32 %v2044_v6, %v6101_v17  ;;  %4091 = vrcp.f32 %v2017_v26 }
 0x67e   : > { %v2043_v48 = vmul.f32 %v4082_v14, %v6203_v63  ;;  %v1999_v9 = vpop.xlane.xlu1 %1998  ;;  %v2072_v61 = vadd.f32 %v2071_v10, %v6206_v34  ;;  %v4084_v46 = vpop.eup %4083 }
 0x67f   : > { %v2045_v45 = vmul.f32 %v4084_v46, %v6212_v3  ;;  %v6223_v16 = vmax.f32 %v1867_v23, 0.0  ;;  %v4086_v62 = vpop.eup %4085  ;;  %v2018_v39 = vadd.f32 1e-09, %v1999_v9 }
 0x680   : > { %v6219_v40 = vmul.f32 %v2043_v48, %v6124_v27  ;;  %v1846_v32 = vpop.xlane.xlu0 %1845  ;;  %v2073_v49 = vadd.f32 %v2072_v61, %v6210_v24  ;;  %v4088_v2 = vpop.eup %4087 }
 0x681   : > { %v1868_v31 = vsub.f32 %v5914_v22, %v1846_v32  ;;  %v6234_v10 = vmul.f32 %v2045_v45, %v6110_v19  ;;  %v2046_v22 = vmul.f32 %v4086_v62, %v6223_v16 }
 0x682   : > { %v2001_v0 = vpop.xlane.xlu1 %2000  ;;  %v2074_v57 = vadd.f32 %v2073_v49, %v6219_v40 }
 0x683   : > { %v6230_v20 = vmax.f32 %v1868_v31, 0.0  ;;  %v2019_v27 = vadd.f32 1e-09, %v2001_v0  ;;  %v6243_v61 = vmul.f32 %v2046_v22, %v6119_v5  ;;  %v4090_v46 = vpop.eup %4089 }
 0x684   : > { %v1848_v1 = vpop.xlane.xlu0 %1847  ;;  %v2075_v43 = vadd.f32 %v2074_v57, %v6227_v15 }
 0x685   : > { %v1869_v17 = vsub.f32 %v5923_v52, %v1848_v1  ;;  %v2047_v14 = vmul.f32 %v4088_v2, %v6230_v20  ;;  %4093 = vrcp.f32 %v2019_v27 }
 0x686   : > { %v2003_v23 = vpop.xlane.xlu1 %2002  ;;  %v2076_v6 = vadd.f32 %v2075_v43, %v6234_v10  ;;  %4095 = vrcp.f32 %v2018_v39 }
 0x687   : > { %v6239_v48 = vmax.f32 %v1869_v17, 0.0  ;;  %v2020_v26 = vadd.f32 1e-09, %v2003_v23  ;;  %v6247_v32 = vmul.f32 %v2047_v14, %v6128_v38  ;;  %v4092_v57 = vpop.eup %4091 }
 0x688   : > { %v1850_v9 = vpop.xlane.xlu0 %1849  ;;  %v2077_v0 = vadd.f32 %v2076_v6, %v6243_v61 }
 0x689   : > { %v1870_v19 = vsub.f32 %v5934_v56, %v1850_v9  ;;  %v2048_v49 = vmul.f32 %v4090_v46, %v6239_v48  ;;  %4097 = vrcp.f32 %v2020_v26 }
 0x68a   : > { %v2005_v52 = vpop.xlane.xlu1 %2004  ;;  %v2078_v43 = vadd.f32 %v2077_v0, %v6247_v32 }
 0x68b   : > { %v6250_v45 = vmax.f32 %v1870_v19, 0.0  ;;  %v2021_v31 = vadd.f32 1e-09, %v2005_v52  ;;  %v6256_v38 = vmul.f32 %v2048_v49, %v6134_v13 }
 0x68c   : > { %v1854_v27 = vpop.xlane.xlu0 %1853 }
 0x68d   : > { %v2049_v5 = vmul.f32 %v4092_v57, %v6250_v45  ;;  %4099 = vrcp.f32 %v2021_v31  ;;  %v1872_v56 = vsub.f32 %v5942_v8, %v1854_v27 }
 0x68e   : > { %v1852_v62 = vpop.xlane.xlu1 %1851 }
 0x68f   : > { %v6258_v39 = vmax.f32 %v1872_v56, 0.0  ;;  %v1871_v1 = vsub.f32 %v5949_v41, %v1852_v62  ;;  %v4094_v2 = vpop.eup %4093  ;;  %v6263_v17 = vmul.f32 %v2049_v5, %v6140_v54  ;;  %v2079_v41 = vadd.f32 %v2078_v43, %v6256_v38 }
 0x690   : > { %v1858_v22 = vpop.xlane.xlu0 %1857  ;;  %v4096_v23 = vpop.eup %4095 }
 0x691   : > { %v6265_v14 = vmax.f32 %v1871_v1, 0.0  ;;  %v1874_v8 = vsub.f32 %v5962_v35, %v1858_v22  ;;  %v2051_v13 = vmul.f32 %v4094_v2, %v6258_v39  ;;  %v2080_v54 = vadd.f32 %v2079_v41, %v6263_v17 }
 0x692   : > { %v1856_v6 = vpop.xlane.xlu1 %1855  ;;  %v2200_v41 = vmul.f32 -16.0, %v4562_v12 }
 0x693   : > { %v2050_v26 = vmul.f32 %v4096_v23, %v6265_v14  ;;  %v1873_v9 = vsub.f32 %v5959_v58, %v1856_v6  ;;  %v4098_v52 = vpop.eup %4097  ;;  %v6278_v49 = vmax.f32 %v1874_v8, 0.0  ;;  %v6281_v31 = vmul.f32 %v2051_v13, %v6150_v42 }
 0x694   : > { %v2196_v13 = vmul.f32 -16.0, %v4548_v51 }
 0x695   : > { %v6273_v19 = vmul.f32 %v2050_v26, %v6145_v44  ;;  %v6275_v46 = vmax.f32 %v1873_v9, 0.0 }
 0x696   : > { %v2214_v9 = vmul.f32 1.442695, %v2196_v13 }
 0x697   : > { %v4100_v35 = vpop.eup %4099  ;;  %v2052_v0 = vmul.f32 %v4098_v52, %v6275_v46  ;;  %v2081_v58 = vadd.f32 %v2080_v54, %v6273_v19 }
 0x698   : > { %v2053_v57 = vmul.f32 %v4100_v35, %v6278_v49 }
 0x699   : > { %v6287_v44 = vmul.f32 %v2052_v0, %v6155_v18  ;;  %v2082_v27 = vadd.f32 %v2081_v58, %v6281_v31  ;;  %v2194_v18 = vmul.f32 -16.0, %v4530_v11  ;;  %v2222_v0 = vmul.f32 1.442695, %v2200_v41 }
 0x69a   : > { %v6291_v5 = vmul.f32 %v2053_v57, %v6160_v53  ;;  %v2198_v53 = vmul.f32 -16.0, %v4542_v36  ;;  %v2195_v58 = vmul.f32 -16.0, %v8144_v60  ;;  %v2201_v57 = vmul.f32 -16.0, %v8145_v30 }
 0x69b   : > { %v2083_v56 = vadd.f32 %v2082_v27, %v6287_v44  ;;  %v2210_v6 = vmul.f32 1.442695, %v2194_v18 }
 0x69c   : > { %v2218_v35 = vmul.f32 1.442695, %v2198_v53  ;;  %v8229_v53 = vld [vmem:[#allocation48_spill] sm:$0xff]  ;;  %v2212_v41 = vmul.f32 1.442695, %v2195_v58 }
 0x69d   : > { %v2084_v62 = vadd.f32 %v2083_v56, %v6291_v5  ;;  %v2224_v58 = vmul.f32 1.442695, %v2201_v57  ;;  %v8238_v57 = vld [vmem:[#allocation19_spill] sm:$0xff] }
 0x69f   : > { %v2085_v42 = vrot.slane %v2084_v62, 4 }
 0x6a1   : > { %v2086_v1 = vadd.f32 %v2085_v42, %v2084_v62 }
 0x6a3   : > { %v2087_v43 = vrot.slane %v2086_v1, 2 }
 0x6a5   : > { %v2088_v2 = vadd.f32 %v2087_v43, %v2086_v1 }
 0x6a7   : > { %v2089_v22 = vrot.slane %v2088_v2, 1 }
 0x6a9   : > { %v2090_v23 = vadd.f32 %v2089_v22, %v2088_v2 }
 0x6ab   : > { %v2091_v8 = vadd.f32 1e-09, %v2090_v23 }
 0x6ad   : > { %4101 = vrcp.f32 %v2091_v8 }
 0x6ae   : > { %4103 = vpow2.f32 %v2210_v6 }
 0x6af   : > { %4105 = vpow2.f32 %v2214_v9 }
 0x6b0   : > { %4107 = vpow2.f32 %v2218_v35 }
 0x6b1   : > { %4109 = vpow2.f32 %v2222_v0 }
 0x6b2   : > { %4111 = vpow2.f32 %v2212_v41  ;;  %v8242_v41 = vld [vmem:[#allocation35_spill] sm:$0xff] }
 0x6b3   : > { %4113 = vpow2.f32 %v2224_v58 }
 0x6b7   : > { %v4102_v26 = vpop.eup %4101 }
 0x6b8   : > { %v2093_v54 = vmul.f32 %v4102_v26, %v6014_v37  ;;  %v4104_v9 = vpop.eup %4103 }
 0x6ba   : > { %v2094_v52 = vmin.f32 %v2093_v54, 1.0 }
 0x6bc   : > { %v2096_v27 = vmul.f32 %v2094_v52, %v6191_v59  ;;  %v2175_v56 = vmul.f32 %v2094_v52, %v2090_v23  ;;  %v2095_v62 = vmul.f32 %v2094_v52, %v6188_v55  ;;  %v2097_v42 = vmul.f32 %v2094_v52, %v6196_v50  ;;  %v8220_v59 = vld [vmem:[#allocation46_spill] sm:$0xff]  ;;  %v8226_v23 = vld [vmem:[#allocation33_spill] sm:$0xff] }
 0x6bd   : > { %v2098_v1 = vmul.f32 %v2094_v52, %v6206_v34  ;;  %v2099_v43 = vmul.f32 %v2094_v52, %v6210_v24  ;;  %v2100_v2 = vmul.f32 %v2094_v52, %v6219_v40  ;;  %v6309_v22 = vmul.f32 %v2094_v52, %v6227_v15  ;;  %v8222_v34 = vld [vmem:[#allocation32_spill] sm:$0xff]  ;;  %v8224_v40 = vld [vmem:[#allocation47_spill] sm:$0xff] }
 0x6be   : > { %v2176_v8 = vsub.f32 %v6014_v37, %v2175_v56  ;;  %2113 = vadd.xlane.f32.xlu0 %v2096_v27  ;;  %v6313_v18 = vadd.f32 %v2096_v27, %v5997_v4  ;;  %2111 = vadd.xlane.f32.xlu1 %v2095_v62  ;;  %v6316_v55 = vadd.f32 %v2095_v62, %v6000_v7  ;;  %v8228_v4 = vld [vmem:[#allocation3_spill] sm:$0xff]  ;;  %v8231_v56 = vld [vmem:[#allocation10_spill] sm:$0xff] }
 0x6bf   : > { %v6319_v50 = vadd.f32 %v2097_v42, %v8220_v59  ;;  %v6322_v24 = vadd.f32 %v2098_v1, %v8222_v34  ;;  %v6325_v15 = vadd.f32 %v2099_v43, %v8224_v40  ;;  %v6328_v37 = vadd.f32 %v2100_v2, %v8226_v23  ;;  %v8233_v34 = vld [vmem:[#allocation34_spill] sm:$0xff]  ;;  %v4106_v23 = vpop.eup %4105 }
 0x6c0   : > { %v6330_v6 = vmax.f32 %v2176_v8, 0.0  ;;  %v2197_v13 = vmul.f32 -16.0, %v8228_v4  ;;  %v6335_v7 = vadd.f32 %v6309_v22, %v8229_v53  ;;  %v6338_v26 = vmul.f32 %v2094_v52, %v6234_v10 }
 0x6c1   : > { %8221 = vst [vmem:[#allocation23_spill] sm:$0xff] %v6319_v50  ;;  %8223 = vst [vmem:[#allocation38_spill] sm:$0xff] %v6322_v24  ;;  %v6341_v54 = vmul.f32 %v2094_v52, %v6243_v61  ;;  %v6344_v35 = vmul.f32 %v2094_v52, %v6247_v32  ;;  %v2202_v62 = vmul.f32 -16.0, %v8231_v56  ;;  %v6351_v8 = vmul.f32 %v2094_v52, %v6256_v38  ;;  %v8235_v38 = vld [vmem:[#allocation12_spill] sm:$0xff] }
 0x6c2   : > { %8225 = vst [vmem:[#allocation24_spill] sm:$0xff] %v6325_v15  ;;  %8227 = vst [vmem:[#allocation39_spill] sm:$0xff] %v6328_v37  ;;  %2115 = vadd.xlane.f32.xlu0 %v2097_v42  ;;  %v6347_v27 = vmul.f32 %v4104_v9, %v6330_v6  ;;  %v6354_v10 = vmul.f32 %v2094_v52, %v6263_v17  ;;  %v6357_v61 = vmul.f32 %v2094_v52, %v6281_v31  ;;  %v8232_v42 = vld [vmem:[#allocation7_spill] sm:$0xff]  ;;  %v8236_v17 = vld [vmem:[#allocation18_spill] sm:$0xff] }
 0x6c3   : > { %8230 = vst [vmem:[#allocation25_spill] sm:$0xff] %v6335_v7  ;;  %v2216_v32 = vmul.f32 1.442695, %v2197_v13  ;;  %v2199_v59 = vmul.f32 -16.0, %v8232_v42  ;;  %v6363_v40 = vadd.f32 %v6338_v26, %v8233_v34  ;;  %v2203_v53 = vmul.f32 -16.0, %v8235_v38  ;;  %v8240_v42 = vld [vmem:[#allocation20_spill] sm:$0xff] }
 0x6c4   : > { %2258 = vadd.xlane.f32.xlu1 %v6347_v27  ;;  %v6368_v0 = vadd.f32 %v6341_v54, %v8236_v17  ;;  %v6372_v31 = vadd.f32 %v6344_v35, %v8238_v57  ;;  %v6375_v13 = vmul.f32 %v4106_v23, %v6330_v6  ;;  %v2226_v9 = vmul.f32 1.442695, %v2202_v62  ;;  %v8244_v17 = vld [vmem:[#allocation21_spill] sm:$0xff]  ;;  %v4108_v62 = vpop.eup %4107 }
 0x6c5   : > { %8234 = vst [vmem:[#allocation40_spill] sm:$0xff] %v6363_v40  ;;  %v6379_v34 = vadd.f32 %v6351_v8, %v8240_v42  ;;  %v6383_v38 = vadd.f32 %v6354_v10, %v8242_v41  ;;  %v6390_v57 = vmul.f32 %v2094_v52, %v6273_v19  ;;  %v6397_v42 = vmul.f32 %v2094_v52, %v6287_v44  ;;  %v8246_v41 = vld [vmem:[#allocation36_spill] sm:$0xff] }
 0x6c6   : > { %8237 = vst [vmem:[#allocation26_spill] sm:$0xff] %v6368_v0  ;;  %8239 = vst [vmem:[#allocation41_spill] sm:$0xff] %v6372_v31  ;;  %2117 = vadd.xlane.f32.xlu0 %v2098_v1  ;;  %v6387_v0 = vadd.f32 %v6357_v61, %v8244_v17  ;;  %v6393_v1 = vmul.f32 %v2094_v52, %v6291_v5  ;;  %4115 = vpow2.f32 %v2216_v32  ;;  %v2220_v23 = vmul.f32 1.442695, %v2199_v59  ;;  %v8248_v17 = vld [vmem:[#allocation22_spill] sm:$0xff]  ;;  %v8250_v5 = vld [vmem:[#allocation37_spill] sm:$0xff]  ;;  %v4110_v59 = vpop.eup %4109 }
 0x6c7   : > { %8241 = vst [vmem:[#allocation27_spill] sm:$0xff] %v6379_v34  ;;  %8243 = vst [vmem:[#allocation42_spill] sm:$0xff] %v6383_v38  ;;  %v6401_v58 = vadd.f32 %v6390_v57, %v8246_v41  ;;  %v6408_v19 = vmul.f32 %v4108_v62, %v6330_v6  ;;  %v6412_v38 = vadd.f32 %v6397_v42, %v8250_v5  ;;  %4117 = vpow2.f32 %v2226_v9  ;;  %v8252_v52 = vld [vmem:[#allocation11_spill] sm:$0xff] }
 0x6c8   : > { %8245 = vst [vmem:[#allocation28_spill] sm:$0xff] %v6387_v0  ;;  %2262 = vadd.xlane.f32.xlu1 %v6375_v13  ;;  %v6405_v0 = vadd.f32 %v6393_v1, %v8248_v17  ;;  %v2228_v44 = vmul.f32 1.442695, %v2203_v53  ;;  %v2204_v32 = vmul.f32 -16.0, %v8252_v52  ;;  %4119 = vpow2.f32 %v2220_v23  ;;  %v8253_v17 = vld [vmem:[#allocation13_spill] sm:$0xff] }
 0x6c9   : > { %8247 = vst [vmem:[#allocation43_spill] sm:$0xff] %v6401_v58  ;;  %8251 = vst [vmem:[#allocation44_spill] sm:$0xff] %v6412_v38  ;;  %v6417_v41 = vmul.f32 %v4110_v59, %v6330_v6  ;;  %v8254_v59 = vld [vmem:[#allocation14_spill] sm:$0xff]  ;;  %v8255_v38 = vld [vmem:[#allocation15_spill] sm:$0xff] }
 0x6ca   : > { %8249 = vst [vmem:[#allocation29_spill] sm:$0xff] %v6405_v0  ;;  %2119 = vadd.xlane.f32.xlu0 %v2099_v43  ;;  %v4112_v43 = vpop.eup %4111  ;;  %4121 = vpow2.f32 %v2228_v44  ;;  %v2230_v62 = vmul.f32 1.442695, %v2204_v32  ;;  %v2205_v0 = vmul.f32 -16.0, %v8253_v17  ;;  %v2206_v52 = vmul.f32 -16.0, %v8254_v59 }
 0x6cb   : > { %v6422_v9 = vmul.f32 %v4112_v43, %v6330_v6  ;;  %v4114_v53 = vpop.eup %4113  ;;  %v2207_v58 = vmul.f32 -16.0, %v8255_v38  ;;  %v8257_v38 = vld [vmem:[#allocation16_spill] sm:$0xff] }
 0x6cc   : > { %2266 = vadd.xlane.f32.xlu1 %v6408_v19  ;;  %v6426_v5 = vmul.f32 %v4114_v53, %v6330_v6  ;;  %4123 = vpow2.f32 %v2230_v62  ;;  %v2232_v23 = vmul.f32 1.442695, %v2205_v0  ;;  %v2234_v53 = vmul.f32 1.442695, %v2206_v52 }
 0x6cd   : > { %v2236_v59 = vmul.f32 1.442695, %v2207_v58  ;;  %v2209_v31 = vmul.f32 -16.0, %v8257_v38 }
 0x6ce   : > { %2121 = vadd.xlane.f32.xlu0 %v2100_v2  ;;  %4125 = vpow2.f32 %v2232_v23 }
 0x6cf   : > { %4127 = vpow2.f32 %v2234_v53  ;;  %v2240_v53 = vmul.f32 1.442695, %v2209_v31 }
 0x6d0   : > { %2270 = vadd.xlane.f32.xlu1 %v6417_v41  ;;  %v4116_v2 = vpop.eup %4115  ;;  %4129 = vpow2.f32 %v2236_v59 }
 0x6d1   : > { %v6431_v44 = vmul.f32 %v4116_v2, %v6330_v6  ;;  %v4118_v32 = vpop.eup %4117 }
 0x6d2   : > { %2260 = vadd.xlane.f32.xlu0 %v6422_v9  ;;  %v6435_v43 = vmul.f32 %v4118_v32, %v6330_v6  ;;  %v4120_v17 = vpop.eup %4119  ;;  %v8256_v32 = vld [vmem:[#allocation17_spill] sm:$0xff] }
 0x6d3   : > { %v6440_v0 = vmul.f32 %v4120_v17, %v6330_v6  ;;  %v2208_v34 = vmul.f32 -16.0, %v8256_v32 }
 0x6d4   : > { %2272 = vadd.xlane.f32.xlu1 %v6426_v5  ;;  %v4122_v62 = vpop.eup %4121 }
 0x6d5   : > { %v6444_v2 = vmul.f32 %v4122_v62, %v6330_v6  ;;  %v2238_v17 = vmul.f32 1.442695, %v2208_v34 }
 0x6d6   : > { %2264 = vadd.xlane.f32.xlu0 %v6431_v44  ;;  %v4124_v52 = vpop.eup %4123 }
 0x6d7   : > { %v6450_v23 = vmul.f32 %v4124_v52, %v6330_v6  ;;  %4131 = vpow2.f32 %v2238_v17 }
 0x6d8   : > { %2274 = vadd.xlane.f32.xlu1 %v6435_v43  ;;  %v4126_v62 = vpop.eup %4125  ;;  %4133 = vpow2.f32 %v2240_v53 }
 0x6d9   : > { %v6456_v58 = vmul.f32 %v4126_v62, %v6330_v6 }
 0x6da   : > { %2268 = vadd.xlane.f32.xlu0 %v6440_v0 }
 0x6dc   : > { %2276 = vadd.xlane.f32.xlu1 %v6444_v2 }
 0x6de   : > { %2123 = vadd.xlane.f32.xlu0 %v6309_v22  ;;  %v4128_v22 = vpop.eup %4127 }
 0x6df   : > { %v6461_v59 = vmul.f32 %v4128_v22, %v6330_v6  ;;  %v4130_v34 = vpop.eup %4129 }
 0x6e0   : > { %2278 = vadd.xlane.f32.xlu1 %v6450_v23 }
 0x6e1   : > { %v4132_v31 = vpop.eup %4131 }
 0x6e2   : > { %2125 = vadd.xlane.f32.xlu0 %v6338_v26  ;;  %v6466_v26 = vmul.f32 %v4130_v34, %v6330_v6  ;;  %v6471_v52 = vmul.f32 %v4132_v31, %v6330_v6 }
 0x6e4   : > { %2280 = vadd.xlane.f32.xlu1 %v6456_v58 }
 0x6e6   : > { %2127 = vadd.xlane.f32.xlu0 %v6341_v54  ;;  %v4134_v54 = vpop.eup %4133 }
 0x6e7   : > { %v6476_v17 = vmul.f32 %v4134_v54, %v6330_v6 }
 0x6e8   : > { %2282 = vadd.xlane.f32.xlu1 %v6461_v59 }
 0x6ea   : > { %2129 = vadd.xlane.f32.xlu0 %v6344_v35 }
 0x6ec   : > { %2284 = vadd.xlane.f32.xlu1 %v6466_v26 }
 0x6ee   : > { %2131 = vadd.xlane.f32.xlu0 %v6351_v8 }
 0x6f0   : > { %2286 = vadd.xlane.f32.xlu1 %v6471_v52 }
 0x6f2   : > { %2133 = vadd.xlane.f32.xlu0 %v6354_v10 }
 0x6f4   : > { %2288 = vadd.xlane.f32.xlu1 %v6476_v17 }
 0x6f6   : > { %2137 = vadd.xlane.f32.xlu0 %v6357_v61 }
 0x6f8   : > { %2135 = vadd.xlane.f32.xlu1 %v6390_v57 }
 0x6fa   : > { %2141 = vadd.xlane.f32.xlu0 %v6393_v1 }
 0x6fc   : > { %2139 = vadd.xlane.f32.xlu1 %v6397_v42 }
 0x74b   : > { %v2114_v35 = vpop.xlane.xlu0 %2113  ;;  %v2112_v8 = vpop.xlane.xlu1 %2111 }
 0x74c   : > { %v2143_v4 = vsub.f32 %v6170_v25, %v2112_v8 }
 0x74e   : > { %v6486_v50 = vmax.f32 %v2143_v4, 0.0 }
 0x74f   : > { %v2116_v62 = vpop.xlane.xlu0 %2115 }
 0x750   : > { %v2145_v24 = vsub.f32 %v6172_v29, %v2116_v62 }
 0x751   : > { %v2259_v53 = vpop.xlane.xlu1 %2258 }
 0x752   : > { %v2290_v54 = vadd.f32 1e-09, %v2259_v53  ;;  %v2144_v53 = vsub.f32 %v6175_v28, %v2114_v35 }
 0x753   : > { %v2118_v22 = vpop.xlane.xlu0 %2117 }
 0x754   : > { %4135 = vrcp.f32 %v2290_v54  ;;  %v2146_v29 = vsub.f32 %v6184_v21, %v2118_v22 }
 0x755   : > { %v2263_v34 = vpop.xlane.xlu1 %2262 }
 0x756   : > { %v2292_v38 = vadd.f32 1e-09, %v2263_v34 }
 0x757   : > { %v2120_v10 = vpop.xlane.xlu0 %2119 }
 0x758   : > { %4137 = vrcp.f32 %v2292_v38  ;;  %v2147_v25 = vsub.f32 %v6182_v47, %v2120_v10 }
 0x759   : > { %v2267_v31 = vpop.xlane.xlu1 %2266 }
 0x75a   : > { %v2294_v61 = vadd.f32 1e-09, %v2267_v31  ;;  %v6498_v47 = vmax.f32 %v2147_v25, 0.0 }
 0x75b   : > { %v2122_v32 = vpop.xlane.xlu0 %2121 }
 0x75c   : > { %v2148_v21 = vsub.f32 %v6203_v63, %v2122_v32 }
 0x75d   : > { %v2271_v40 = vpop.xlane.xlu1 %2270 }
 0x75e   : > { %v2296_v37 = vadd.f32 1e-09, %v2271_v40  ;;  %v4136_v54 = vpop.eup %4135  ;;  %v6491_v40 = vmax.f32 %v2144_v53, 0.0  ;;  %v6519_v32 = vmax.f32 %v2148_v21, 0.0 }
 0x75f   : > { %v2261_v57 = vpop.xlane.xlu0 %2260  ;;  %v2322_v28 = vmul.f32 %v4136_v54, %v6486_v50 }
 0x760   : > { %v2291_v56 = vadd.f32 1e-09, %v2261_v57  ;;  %v6488_v57 = vmax.f32 %v2145_v24, 0.0 }
 0x761   : > { %v2273_v1 = vpop.xlane.xlu1 %2272  ;;  %v6504_v53 = vmul.f32 %v2322_v28, %v6347_v27 }
 0x762   : > { %4139 = vrcp.f32 %v2291_v56  ;;  %v4138_v31 = vpop.eup %4137  ;;  %v2297_v56 = vadd.f32 1e-09, %v2273_v1 }
 0x763   : > { %4141 = vrcp.f32 %v2294_v61  ;;  %v2265_v42 = vpop.xlane.xlu0 %2264  ;;  %v2324_v8 = vmul.f32 %v4138_v31, %v6488_v57 }
 0x764   : > { %v2293_v7 = vadd.f32 1e-09, %v2265_v42  ;;  %v6500_v42 = vmax.f32 %v2146_v29, 0.0 }
 0x765   : > { %v2275_v15 = vpop.xlane.xlu1 %2274 }
 0x766   : > { %4143 = vrcp.f32 %v2293_v7 }
 0x767   : > { %v2269_v34 = vpop.xlane.xlu0 %2268  ;;  %4145 = vrcp.f32 %v2296_v37  ;;  %v2298_v37 = vadd.f32 1e-09, %v2275_v15 }
 0x768   : > { %v2295_v38 = vadd.f32 1e-09, %v2269_v34 }
 0x769   : > { %v2277_v61 = vpop.xlane.xlu1 %2276 }
 0x76a   : > { %4147 = vrcp.f32 %v2295_v38  ;;  %v2299_v10 = vadd.f32 1e-09, %v2277_v61  ;;  %v6512_v38 = vmul.f32 %v2324_v8, %v6375_v13 }
 0x76b   : > { %v2124_v7 = vpop.xlane.xlu0 %2123  ;;  %4149 = vrcp.f32 %v2297_v56 }
 0x76c   : > { %v4140_v35 = vpop.eup %4139  ;;  %v2149_v62 = vsub.f32 %v6199_v33, %v2124_v7  ;;  %4151 = vrcp.f32 %v2298_v37 }
 0x76d   : > { %v4142_v4 = vpop.eup %4141  ;;  %v2279_v24 = vpop.xlane.xlu1 %2278  ;;  %v2323_v1 = vmul.f32 %v4140_v35, %v6491_v40  ;;  %4153 = vrcp.f32 %v2299_v10 }
 0x76e   : > { %v2326_v33 = vmul.f32 %v4142_v4, %v6498_v47  ;;  %v6515_v56 = vmax.f32 %v2149_v62, 0.0  ;;  %v2300_v61 = vadd.f32 1e-09, %v2279_v24 }
 0x76f   : > { %v2126_v22 = vpop.xlane.xlu0 %2125  ;;  %v6507_v34 = vmul.f32 %v2323_v1, %v6422_v9 }
 0x770   : > { %v4144_v15 = vpop.eup %4143  ;;  %v2150_v54 = vsub.f32 %v6212_v3, %v2126_v22  ;;  %v6526_v7 = vmul.f32 %v2326_v33, %v6408_v19  ;;  %4155 = vrcp.f32 %v2300_v61 }
 0x771   : > { %v2325_v31 = vmul.f32 %v4144_v15, %v6500_v42  ;;  %v2281_v63 = vpop.xlane.xlu1 %2280  ;;  %v2354_v27 = vadd.f32 %v6507_v34, %v6504_v53  ;;  %v4146_v9 = vpop.eup %4145 }
 0x772   : > { %v6528_v28 = vmax.f32 %v2150_v54, 0.0  ;;  %v2328_v4 = vmul.f32 %v4146_v9, %v6515_v56  ;;  %v2301_v37 = vadd.f32 1e-09, %v2281_v63 }
 0x773   : > { %v2128_v25 = vpop.xlane.xlu0 %2127  ;;  %v6522_v3 = vmul.f32 %v2325_v31, %v6431_v44  ;;  %v2355_v13 = vadd.f32 %v2354_v27, %v6512_v38 }
 0x774   : > { %v4148_v29 = vpop.eup %4147  ;;  %v2151_v35 = vsub.f32 %v6223_v16, %v2128_v25  ;;  %v6543_v15 = vmul.f32 %v2328_v4, %v6417_v41  ;;  %4157 = vrcp.f32 %v2301_v37 }
 0x775   : > { %v2327_v8 = vmul.f32 %v4148_v29, %v6519_v32  ;;  %v2283_v62 = vpop.xlane.xlu1 %2282  ;;  %v2356_v24 = vadd.f32 %v2355_v13, %v6522_v3  ;;  %v4150_v44 = vpop.eup %4149 }
 0x776   : > { %v2329_v21 = vmul.f32 %v4150_v44, %v6528_v28  ;;  %v6539_v22 = vmax.f32 %v2151_v35, 0.0  ;;  %v4152_v63 = vpop.eup %4151  ;;  %v2302_v27 = vadd.f32 1e-09, %v2283_v62 }
 0x777   : > { %v6535_v1 = vmul.f32 %v2327_v8, %v6440_v0  ;;  %v2130_v10 = vpop.xlane.xlu0 %2129  ;;  %v2357_v19 = vadd.f32 %v2356_v24, %v6526_v7  ;;  %v4154_v25 = vpop.eup %4153 }
 0x778   : > { %v2152_v16 = vsub.f32 %v6230_v20, %v2130_v10  ;;  %v6550_v13 = vmul.f32 %v2329_v21, %v6426_v5  ;;  %v2330_v20 = vmul.f32 %v4152_v63, %v6539_v22 }
 0x779   : > { %v2285_v33 = vpop.xlane.xlu1 %2284  ;;  %v2358_v54 = vadd.f32 %v2357_v19, %v6535_v1 }
 0x77a   : > { %v6546_v31 = vmax.f32 %v2152_v16, 0.0  ;;  %v2303_v0 = vadd.f32 1e-09, %v2285_v33  ;;  %v6559_v24 = vmul.f32 %v2330_v20, %v6435_v43  ;;  %v4156_v44 = vpop.eup %4155 }
 0x77b   : > { %v2132_v9 = vpop.xlane.xlu0 %2131  ;;  %v2359_v61 = vadd.f32 %v2358_v54, %v6543_v15 }
 0x77c   : > { %v2153_v41 = vsub.f32 %v6239_v48, %v2132_v9  ;;  %v2331_v29 = vmul.f32 %v4154_v25, %v6546_v31  ;;  %4159 = vrcp.f32 %v2303_v0 }
 0x77d   : > { %v2287_v35 = vpop.xlane.xlu1 %2286  ;;  %v2360_v4 = vadd.f32 %v2359_v61, %v6550_v13  ;;  %4161 = vrcp.f32 %v2302_v27 }
 0x77e   : > { %v6555_v8 = vmax.f32 %v2153_v41, 0.0  ;;  %v2304_v37 = vadd.f32 1e-09, %v2287_v35  ;;  %v6563_v10 = vmul.f32 %v2331_v29, %v6444_v2  ;;  %v4158_v54 = vpop.eup %4157 }
 0x77f   : > { %v2134_v62 = vpop.xlane.xlu0 %2133  ;;  %v2361_v33 = vadd.f32 %v2360_v4, %v6559_v24 }
 0x780   : > { %v2154_v5 = vsub.f32 %v6250_v45, %v2134_v62  ;;  %v2332_v19 = vmul.f32 %v4156_v44, %v6555_v8  ;;  %4163 = vrcp.f32 %v2304_v37 }
 0x781   : > { %v2289_v48 = vpop.xlane.xlu1 %2288  ;;  %v2362_v61 = vadd.f32 %v2361_v33, %v6563_v10 }
 0x782   : > { %v6566_v21 = vmax.f32 %v2154_v5, 0.0  ;;  %v2305_v16 = vadd.f32 1e-09, %v2289_v48  ;;  %v6572_v2 = vmul.f32 %v2332_v19, %v6450_v23 }
 0x783   : > { %v2138_v0 = vpop.xlane.xlu0 %2137 }
 0x784   : > { %v2333_v43 = vmul.f32 %v4158_v54, %v6566_v21  ;;  %4165 = vrcp.f32 %v2305_v16  ;;  %v2156_v45 = vsub.f32 %v6258_v39, %v2138_v0 }
 0x785   : > { %v2136_v63 = vpop.xlane.xlu1 %2135 }
 0x786   : > { %v6574_v27 = vmax.f32 %v2156_v45, 0.0  ;;  %v2155_v9 = vsub.f32 %v6265_v14, %v2136_v63  ;;  %v4160_v25 = vpop.eup %4159  ;;  %v6579_v41 = vmul.f32 %v2333_v43, %v6456_v58  ;;  %v2363_v14 = vadd.f32 %v2362_v61, %v6572_v2 }
 0x787   : > { %v2142_v20 = vpop.xlane.xlu0 %2141  ;;  %v4162_v35 = vpop.eup %4161 }
 0x788   : > { %v6581_v29 = vmax.f32 %v2155_v9, 0.0  ;;  %v2158_v39 = vsub.f32 %v6278_v49, %v2142_v20  ;;  %v2335_v23 = vmul.f32 %v4160_v25, %v6574_v27  ;;  %v2364_v58 = vadd.f32 %v2363_v14, %v6579_v41 }
 0x789   : > { %v2140_v4 = vpop.xlane.xlu1 %2139  ;;  %v2484_v14 = vmul.f32 -4.0, %v4562_v12 }
 0x78a   : > { %v2334_v37 = vmul.f32 %v4162_v35, %v6581_v29  ;;  %v2157_v62 = vsub.f32 %v6275_v46, %v2140_v4  ;;  %v4164_v48 = vpop.eup %4163  ;;  %v6594_v19 = vmax.f32 %v2158_v39, 0.0  ;;  %v6597_v16 = vmul.f32 %v2335_v23, %v6466_v26 }
 0x78b   : > { %v2480_v23 = vmul.f32 -4.0, %v4548_v51 }
 0x78c   : > { %v6589_v5 = vmul.f32 %v2334_v37, %v6461_v59  ;;  %v6591_v44 = vmax.f32 %v2157_v62, 0.0 }
 0x78d   : > { %v2498_v62 = vmul.f32 1.442695, %v2480_v23 }
 0x78e   : > { %v4166_v49 = vpop.eup %4165  ;;  %v2336_v33 = vmul.f32 %v4164_v48, %v6591_v44  ;;  %v2365_v46 = vadd.f32 %v2364_v58, %v6589_v5 }
 0x78f   : > { %v2337_v54 = vmul.f32 %v4166_v49, %v6594_v19 }
 0x790   : > { %v6603_v59 = vmul.f32 %v2336_v33, %v6471_v52  ;;  %v2366_v0 = vadd.f32 %v2365_v46, %v6597_v16  ;;  %v2478_v52 = vmul.f32 -4.0, %v4530_v11  ;;  %v2506_v33 = vmul.f32 1.442695, %v2484_v14 }
 0x791   : > { %v6607_v43 = vmul.f32 %v2337_v54, %v6476_v17  ;;  %v2482_v17 = vmul.f32 -4.0, %v4542_v36  ;;  %v2479_v46 = vmul.f32 -4.0, %v8144_v60  ;;  %v2485_v54 = vmul.f32 -4.0, %v8145_v30 }
 0x792   : > { %v2367_v45 = vadd.f32 %v2366_v0, %v6603_v59  ;;  %v2494_v4 = vmul.f32 1.442695, %v2478_v52 }
 0x793   : > { %v2502_v49 = vmul.f32 1.442695, %v2482_v17  ;;  %v8267_v17 = vld [vmem:[#allocation25_spill] sm:$0xff]  ;;  %v2496_v14 = vmul.f32 1.442695, %v2479_v46 }
 0x794   : > { %v2368_v63 = vadd.f32 %v2367_v45, %v6607_v43  ;;  %v2508_v46 = vmul.f32 1.442695, %v2485_v54 }
 0x796   : > { %v2369_v26 = vrot.slane %v2368_v63, 4 }
 0x798   : > { %v2370_v9 = vadd.f32 %v2369_v26, %v2368_v63 }
 0x79a   : > { %v2371_v61 = vrot.slane %v2370_v9, 2 }
 0x79c   : > { %v2372_v25 = vadd.f32 %v2371_v61, %v2370_v9 }
 0x79e   : > { %v2373_v20 = vrot.slane %v2372_v25, 1 }
 0x7a0   : > { %v2374_v35 = vadd.f32 %v2373_v20, %v2372_v25 }
 0x7a2   : > { %v2375_v39 = vadd.f32 1e-09, %v2374_v35 }
 0x7a4   : > { %4167 = vrcp.f32 %v2375_v39 }
 0x7a5   : > { %4169 = vpow2.f32 %v2494_v4 }
 0x7a6   : > { %4171 = vpow2.f32 %v2498_v62 }
 0x7a7   : > { %4173 = vpow2.f32 %v2502_v49 }
 0x7a8   : > { %4175 = vpow2.f32 %v2506_v33  ;;  %v8275_v33 = vld [vmem:[#allocation41_spill] sm:$0xff] }
 0x7a9   : > { %4177 = vpow2.f32 %v2496_v14  ;;  %v8280_v14 = vld [vmem:[#allocation42_spill] sm:$0xff] }
 0x7aa   : > { %4179 = vpow2.f32 %v2508_v46 }
 0x7ae   : > { %v4168_v37 = vpop.eup %4167 }
 0x7af   : > { %v2377_v58 = vmul.f32 %v4168_v37, %v6330_v6  ;;  %v4170_v62 = vpop.eup %4169 }
 0x7b1   : > { %v2378_v48 = vmin.f32 %v2377_v58, 1.0  ;;  %v8269_v58 = vld [vmem:[#allocation10_spill] sm:$0xff] }
 0x7b2   : > { %v2486_v49 = vmul.f32 -4.0, %v8269_v58 }
 0x7b3   : > { %v2380_v0 = vmul.f32 %v2378_v48, %v6507_v34  ;;  %v2459_v45 = vmul.f32 %v2378_v48, %v2374_v35  ;;  %v2379_v63 = vmul.f32 %v2378_v48, %v6504_v53  ;;  %v2381_v26 = vmul.f32 %v2378_v48, %v6512_v38  ;;  %v8258_v34 = vld [vmem:[#allocation23_spill] sm:$0xff] }
 0x7b4   : > { %v2382_v9 = vmul.f32 %v2378_v48, %v6522_v3  ;;  %v2383_v61 = vmul.f32 %v2378_v48, %v6526_v7  ;;  %v2384_v25 = vmul.f32 %v2378_v48, %v6535_v1  ;;  %v6625_v20 = vmul.f32 %v2378_v48, %v6543_v15  ;;  %v8260_v3 = vld [vmem:[#allocation38_spill] sm:$0xff]  ;;  %v8262_v1 = vld [vmem:[#allocation24_spill] sm:$0xff]  ;;  %v8264_v35 = vld [vmem:[#allocation39_spill] sm:$0xff] }
 0x7b5   : > { %v2460_v39 = vsub.f32 %v6330_v6, %v2459_v45  ;;  %2397 = vadd.xlane.f32.xlu0 %v2380_v0  ;;  %v6629_v52 = vadd.f32 %v2380_v0, %v6313_v18  ;;  %2395 = vadd.xlane.f32.xlu1 %v2379_v63  ;;  %v6632_v53 = vadd.f32 %v2379_v63, %v6316_v55  ;;  %v8266_v18 = vld [vmem:[#allocation3_spill] sm:$0xff] }
 0x7b6   : > { %v6635_v38 = vadd.f32 %v2381_v26, %v8258_v34  ;;  %v6638_v7 = vadd.f32 %v2382_v9, %v8260_v3  ;;  %v6641_v15 = vadd.f32 %v2383_v61, %v8262_v1  ;;  %v6644_v6 = vadd.f32 %v2384_v25, %v8264_v35  ;;  %v4172_v35 = vpop.eup %4171 }
 0x7b7   : > { %v6646_v4 = vmax.f32 %v2460_v39, 0.0  ;;  %v2481_v23 = vmul.f32 -4.0, %v8266_v18  ;;  %v6651_v55 = vadd.f32 %v6625_v20, %v8267_v17  ;;  %v6654_v37 = vmul.f32 %v2378_v48, %v6550_v13  ;;  %v8273_v17 = vld [vmem:[#allocation26_spill] sm:$0xff] }
 0x7b8   : > { %8259 = vst [vmem:[#allocation30_spill] sm:$0xff] %v6635_v38  ;;  %8261 = vst [vmem:[#allocation45_spill] sm:$0xff] %v6638_v7  ;;  %v6658_v0 = vmul.f32 %v2378_v48, %v6559_v24  ;;  %v6661_v45 = vmul.f32 %v2378_v48, %v6563_v10  ;;  %v6667_v39 = vmul.f32 %v2378_v48, %v6572_v2  ;;  %v8270_v10 = vld [vmem:[#allocation7_spill] sm:$0xff]  ;;  %v2510_v2 = vmul.f32 1.442695, %v2486_v49 }
 0x7b9   : > { %8263 = vst [vmem:[#allocation31_spill] sm:$0xff] %v6641_v15  ;;  %8265 = vst [vmem:[#allocation46_spill] sm:$0xff] %v6644_v6  ;;  %2399 = vadd.xlane.f32.xlu0 %v2381_v26  ;;  %v6664_v63 = vmul.f32 %v4170_v62, %v6646_v4  ;;  %v6670_v13 = vmul.f32 %v2378_v48, %v6579_v41  ;;  %v6673_v34 = vmul.f32 %v2378_v48, %v6597_v16  ;;  %v8271_v26 = vld [vmem:[#allocation40_spill] sm:$0xff] }
 0x7ba   : > { %8268 = vst [vmem:[#allocation32_spill] sm:$0xff] %v6651_v55  ;;  %v2500_v24 = vmul.f32 1.442695, %v2481_v23  ;;  %v2483_v3 = vmul.f32 -4.0, %v8270_v10  ;;  %v6679_v1 = vadd.f32 %v6654_v37, %v8271_v26  ;;  %v6683_v41 = vadd.f32 %v6658_v0, %v8273_v17  ;;  %v8277_v23 = vld [vmem:[#allocation12_spill] sm:$0xff]  ;;  %v8278_v10 = vld [vmem:[#allocation27_spill] sm:$0xff] }
 0x7bb   : > { %2542 = vadd.xlane.f32.xlu1 %v6664_v63  ;;  %v6687_v16 = vadd.f32 %v6661_v45, %v8275_v33  ;;  %v6690_v54 = vmul.f32 %v4172_v35, %v6646_v4  ;;  %v2487_v62 = vmul.f32 -4.0, %v8277_v23  ;;  %v6695_v26 = vadd.f32 %v6667_v39, %v8278_v10  ;;  %v8282_v17 = vld [vmem:[#allocation28_spill] sm:$0xff]  ;;  %v4174_v33 = vpop.eup %4173 }
 0x7bc   : > { %8272 = vst [vmem:[#allocation47_spill] sm:$0xff] %v6679_v1  ;;  %8274 = vst [vmem:[#allocation33_spill] sm:$0xff] %v6683_v41  ;;  %v6699_v49 = vadd.f32 %v6670_v13, %v8280_v14  ;;  %v6703_v41 = vadd.f32 %v6673_v34, %v8282_v17  ;;  %v6709_v35 = vmul.f32 %v2378_v48, %v6607_v43  ;;  %4181 = vpow2.f32 %v2500_v24  ;;  %v8286_v17 = vld [vmem:[#allocation29_spill] sm:$0xff]  ;;  %v8288_v43 = vld [vmem:[#allocation44_spill] sm:$0xff] }
 0x7bd   : > { %8276 = vst [vmem:[#allocation48_spill] sm:$0xff] %v6687_v16  ;;  %2401 = vadd.xlane.f32.xlu0 %v2382_v9  ;;  %8279 = vst [vmem:[#allocation34_spill] sm:$0xff] %v6695_v26  ;;  %v6706_v9 = vmul.f32 %v2378_v48, %v6589_v5  ;;  %v6713_v10 = vmul.f32 %v2378_v48, %v6603_v59  ;;  %v2504_v14 = vmul.f32 1.442695, %v2483_v3  ;;  %4183 = vpow2.f32 %v2510_v2  ;;  %v8290_v48 = vld [vmem:[#allocation11_spill] sm:$0xff]  ;;  %v4176_v3 = vpop.eup %4175 }
 0x7be   : > { %8281 = vst [vmem:[#allocation18_spill] sm:$0xff] %v6699_v49  ;;  %8283 = vst [vmem:[#allocation19_spill] sm:$0xff] %v6703_v41  ;;  %v8284_v49 = vld [vmem:[#allocation43_spill] sm:$0xff]  ;;  %v6721_v41 = vadd.f32 %v6709_v35, %v8286_v17  ;;  %v6724_v5 = vmul.f32 %v4174_v33, %v6646_v4  ;;  %v2512_v59 = vmul.f32 1.442695, %v2487_v62  ;;  %v2488_v24 = vmul.f32 -4.0, %v8290_v48 }
 0x7bf   : > { %2546 = vadd.xlane.f32.xlu1 %v6690_v54  ;;  %v6717_v46 = vadd.f32 %v6706_v9, %v8284_v49  ;;  %v6728_v26 = vadd.f32 %v6713_v10, %v8288_v43  ;;  %4185 = vpow2.f32 %v2504_v14  ;;  %v6733_v49 = vmul.f32 %v4176_v3, %v6646_v4  ;;  %v8291_v17 = vld [vmem:[#allocation13_spill] sm:$0xff]  ;;  %v8292_v3 = vld [vmem:[#allocation14_spill] sm:$0xff] }
 0x7c0   : > { %8287 = vst [vmem:[#allocation35_spill] sm:$0xff] %v6721_v41  ;;  %4187 = vpow2.f32 %v2512_v59  ;;  %v2514_v33 = vmul.f32 1.442695, %v2488_v24  ;;  %v2489_v41 = vmul.f32 -4.0, %v8291_v17  ;;  %v2490_v48 = vmul.f32 -4.0, %v8292_v3 }
 0x7c1   : > { %8285 = vst [vmem:[#allocation20_spill] sm:$0xff] %v6717_v46  ;;  %2403 = vadd.xlane.f32.xlu0 %v2383_v61  ;;  %8289 = vst [vmem:[#allocation21_spill] sm:$0xff] %v6728_v26  ;;  %v4178_v61 = vpop.eup %4177  ;;  %v8293_v26 = vld [vmem:[#allocation15_spill] sm:$0xff] }
 0x7c2   : > { %v6738_v2 = vmul.f32 %v4178_v61, %v6646_v4  ;;  %v4180_v62 = vpop.eup %4179  ;;  %4189 = vpow2.f32 %v2514_v33  ;;  %v2516_v14 = vmul.f32 1.442695, %v2489_v41  ;;  %v2491_v46 = vmul.f32 -4.0, %v8293_v26  ;;  %v8295_v26 = vld [vmem:[#allocation16_spill] sm:$0xff] }
 0x7c3   : > { %2550 = vadd.xlane.f32.xlu1 %v6724_v5  ;;  %v6742_v43 = vmul.f32 %v4180_v62, %v6646_v4  ;;  %v2518_v62 = vmul.f32 1.442695, %v2490_v48  ;;  %v2493_v23 = vmul.f32 -4.0, %v8295_v26 }
 0x7c4   : > { %4191 = vpow2.f32 %v2516_v14  ;;  %v2520_v3 = vmul.f32 1.442695, %v2491_v46 }
 0x7c5   : > { %2405 = vadd.xlane.f32.xlu0 %v2384_v25  ;;  %4193 = vpow2.f32 %v2518_v62  ;;  %v2524_v62 = vmul.f32 1.442695, %v2493_v23 }
 0x7c6   : > { %v4182_v25 = vpop.eup %4181  ;;  %4195 = vpow2.f32 %v2520_v3 }
 0x7c7   : > { %2554 = vadd.xlane.f32.xlu1 %v6733_v49  ;;  %v6747_v59 = vmul.f32 %v4182_v25, %v6646_v4  ;;  %v4184_v24 = vpop.eup %4183 }
 0x7c8   : > { %v6751_v61 = vmul.f32 %v4184_v24, %v6646_v4  ;;  %v8294_v24 = vld [vmem:[#allocation17_spill] sm:$0xff] }
 0x7c9   : > { %2544 = vadd.xlane.f32.xlu0 %v6738_v2  ;;  %v4186_v17 = vpop.eup %4185  ;;  %v2492_v16 = vmul.f32 -4.0, %v8294_v24 }
 0x7ca   : > { %v6756_v41 = vmul.f32 %v4186_v17, %v6646_v4  ;;  %v4188_v33 = vpop.eup %4187 }
 0x7cb   : > { %2556 = vadd.xlane.f32.xlu1 %v6742_v43  ;;  %v6760_v25 = vmul.f32 %v4188_v33, %v6646_v4  ;;  %v2522_v17 = vmul.f32 1.442695, %v2492_v16 }
 0x7cc   : > { %v4190_v48 = vpop.eup %4189 }
 0x7cd   : > { %2548 = vadd.xlane.f32.xlu0 %v6747_v59  ;;  %v6766_v14 = vmul.f32 %v4190_v48, %v6646_v4  ;;  %4197 = vpow2.f32 %v2522_v17 }
 0x7ce   : > { %v4192_v33 = vpop.eup %4191  ;;  %4199 = vpow2.f32 %v2524_v62 }
 0x7cf   : > { %2558 = vadd.xlane.f32.xlu1 %v6751_v61  ;;  %v6772_v46 = vmul.f32 %v4192_v33, %v6646_v4 }
 0x7d1   : > { %2552 = vadd.xlane.f32.xlu0 %v6756_v41 }
 0x7d3   : > { %2560 = vadd.xlane.f32.xlu1 %v6760_v25 }
 0x7d5   : > { %2407 = vadd.xlane.f32.xlu0 %v6625_v20  ;;  %v4194_v20 = vpop.eup %4193 }
 0x7d6   : > { %v6777_v3 = vmul.f32 %v4194_v20, %v6646_v4  ;;  %v4196_v16 = vpop.eup %4195 }
 0x7d7   : > { %2562 = vadd.xlane.f32.xlu1 %v6766_v14  ;;  %v4198_v23 = vpop.eup %4197 }
 0x7d8   : > { %v6787_v48 = vmul.f32 %v4198_v23, %v6646_v4 }
 0x7d9   : > { %2409 = vadd.xlane.f32.xlu0 %v6654_v37  ;;  %v6782_v37 = vmul.f32 %v4196_v16, %v6646_v4 }
 0x7db   : > { %2564 = vadd.xlane.f32.xlu1 %v6772_v46 }
 0x7dd   : > { %2411 = vadd.xlane.f32.xlu0 %v6658_v0  ;;  %v4200_v0 = vpop.eup %4199 }
 0x7de   : > { %v6792_v17 = vmul.f32 %v4200_v0, %v6646_v4 }
 0x7df   : > { %2566 = vadd.xlane.f32.xlu1 %v6777_v3 }
 0x7e1   : > { %2413 = vadd.xlane.f32.xlu0 %v6661_v45 }
 0x7e3   : > { %2568 = vadd.xlane.f32.xlu1 %v6782_v37 }
 0x7e5   : > { %2415 = vadd.xlane.f32.xlu0 %v6667_v39 }
 0x7e7   : > { %2570 = vadd.xlane.f32.xlu1 %v6787_v48 }
 0x7e9   : > { %2417 = vadd.xlane.f32.xlu0 %v6670_v13 }
 0x7eb   : > { %2572 = vadd.xlane.f32.xlu1 %v6792_v17 }
 0x7ed   : > { %2421 = vadd.xlane.f32.xlu0 %v6673_v34 }
 0x7ef   : > { %2419 = vadd.xlane.f32.xlu1 %v6706_v9 }
 0x7f1   : > { %2425 = vadd.xlane.f32.xlu0 %v6709_v35 }
 0x7f3   : > { %2423 = vadd.xlane.f32.xlu1 %v6713_v10 }
 0x842   : > { %v2398_v45 = vpop.xlane.xlu0 %2397  ;;  %v2396_v39 = vpop.xlane.xlu1 %2395 }
 0x843   : > { %v2427_v18 = vsub.f32 %v6486_v50, %v2396_v39 }
 0x845   : > { %v6802_v38 = vmax.f32 %v2427_v18, 0.0 }
 0x846   : > { %v2400_v33 = vpop.xlane.xlu0 %2399 }
 0x847   : > { %v2429_v7 = vsub.f32 %v6488_v57, %v2400_v33 }
 0x848   : > { %v2543_v62 = vpop.xlane.xlu1 %2542 }
 0x849   : > { %v2574_v0 = vadd.f32 1e-09, %v2543_v62  ;;  %v2428_v62 = vsub.f32 %v6491_v40, %v2398_v45 }
 0x84a   : > { %v2402_v20 = vpop.xlane.xlu0 %2401 }
 0x84b   : > { %4201 = vrcp.f32 %v2574_v0  ;;  %v2430_v57 = vsub.f32 %v6500_v42, %v2402_v20 }
 0x84c   : > { %v2547_v16 = vpop.xlane.xlu1 %2546 }
 0x84d   : > { %v2576_v26 = vadd.f32 1e-09, %v2547_v16 }
 0x84e   : > { %v2404_v13 = vpop.xlane.xlu0 %2403 }
 0x84f   : > { %4203 = vrcp.f32 %v2576_v26  ;;  %v2431_v50 = vsub.f32 %v6498_v47, %v2404_v13 }
 0x850   : > { %v2551_v23 = vpop.xlane.xlu1 %2550 }
 0x851   : > { %v2578_v34 = vadd.f32 1e-09, %v2551_v23  ;;  %v6814_v47 = vmax.f32 %v2431_v50, 0.0 }
 0x852   : > { %v2406_v24 = vpop.xlane.xlu0 %2405 }
 0x853   : > { %v2432_v42 = vsub.f32 %v6519_v32, %v2406_v24 }
 0x854   : > { %v2555_v1 = vpop.xlane.xlu1 %2554 }
 0x855   : > { %v2580_v6 = vadd.f32 1e-09, %v2555_v1  ;;  %v4202_v0 = vpop.eup %4201  ;;  %v6807_v1 = vmax.f32 %v2428_v62, 0.0  ;;  %v6835_v24 = vmax.f32 %v2432_v42, 0.0 }
 0x856   : > { %v2545_v9 = vpop.xlane.xlu0 %2544  ;;  %v2606_v40 = vmul.f32 %v4202_v0, %v6802_v38 }
 0x857   : > { %v2575_v58 = vadd.f32 1e-09, %v2545_v9  ;;  %v6804_v9 = vmax.f32 %v2429_v7, 0.0 }
 0x858   : > { %v2557_v35 = vpop.xlane.xlu1 %2556  ;;  %v6820_v62 = vmul.f32 %v2606_v40, %v6664_v63 }
 0x859   : > { %4205 = vrcp.f32 %v2575_v58  ;;  %v4204_v23 = vpop.eup %4203  ;;  %v2581_v58 = vadd.f32 1e-09, %v2557_v35 }
 0x85a   : > { %4207 = vrcp.f32 %v2578_v34  ;;  %v2549_v10 = vpop.xlane.xlu0 %2548  ;;  %v2608_v39 = vmul.f32 %v4204_v23, %v6804_v9 }
 0x85b   : > { %v2577_v55 = vadd.f32 1e-09, %v2549_v10  ;;  %v6816_v10 = vmax.f32 %v2430_v57, 0.0 }
 0x85c   : > { %v2559_v15 = vpop.xlane.xlu1 %2558 }
 0x85d   : > { %4209 = vrcp.f32 %v2577_v55 }
 0x85e   : > { %v2553_v16 = vpop.xlane.xlu0 %2552  ;;  %4211 = vrcp.f32 %v2580_v6  ;;  %v2582_v6 = vadd.f32 1e-09, %v2559_v15 }
 0x85f   : > { %v2579_v26 = vadd.f32 1e-09, %v2553_v16 }
 0x860   : > { %v2561_v34 = vpop.xlane.xlu1 %2560 }
 0x861   : > { %4213 = vrcp.f32 %v2579_v26  ;;  %v2583_v13 = vadd.f32 1e-09, %v2561_v34  ;;  %v6828_v26 = vmul.f32 %v2608_v39, %v6690_v54 }
 0x862   : > { %v2408_v55 = vpop.xlane.xlu0 %2407  ;;  %4215 = vrcp.f32 %v2581_v58 }
 0x863   : > { %v4206_v45 = vpop.eup %4205  ;;  %v2433_v33 = vsub.f32 %v6515_v56, %v2408_v55  ;;  %4217 = vrcp.f32 %v2582_v6 }
 0x864   : > { %v4208_v18 = vpop.eup %4207  ;;  %v2563_v7 = vpop.xlane.xlu1 %2562  ;;  %v2607_v35 = vmul.f32 %v4206_v45, %v6807_v1  ;;  %4219 = vrcp.f32 %v2583_v13 }
 0x865   : > { %v2610_v56 = vmul.f32 %v4208_v18, %v6814_v47  ;;  %v6831_v58 = vmax.f32 %v2433_v33, 0.0  ;;  %v2584_v34 = vadd.f32 1e-09, %v2563_v7 }
 0x866   : > { %v2410_v20 = vpop.xlane.xlu0 %2409  ;;  %v6823_v16 = vmul.f32 %v2607_v35, %v6738_v2 }
 0x867   : > { %v4210_v15 = vpop.eup %4209  ;;  %v2434_v0 = vsub.f32 %v6528_v28, %v2410_v20  ;;  %v6842_v55 = vmul.f32 %v2610_v56, %v6724_v5  ;;  %4221 = vrcp.f32 %v2584_v34 }
 0x868   : > { %v2609_v23 = vmul.f32 %v4210_v15, %v6816_v10  ;;  %v2565_v32 = vpop.xlane.xlu1 %2564  ;;  %v2638_v63 = vadd.f32 %v6823_v16, %v6820_v62  ;;  %v4212_v2 = vpop.eup %4211 }
 0x869   : > { %v6844_v40 = vmax.f32 %v2434_v0, 0.0  ;;  %v2612_v18 = vmul.f32 %v4212_v2, %v6831_v58  ;;  %v2585_v6 = vadd.f32 1e-09, %v2565_v32 }
 0x86a   : > { %v2412_v50 = vpop.xlane.xlu0 %2411  ;;  %v6838_v28 = vmul.f32 %v2609_v23, %v6747_v59  ;;  %v2639_v54 = vadd.f32 %v2638_v63, %v6828_v26 }
 0x86b   : > { %v4214_v57 = vpop.eup %4213  ;;  %v2435_v45 = vsub.f32 %v6539_v22, %v2412_v50  ;;  %v6859_v15 = vmul.f32 %v2612_v18, %v6733_v49  ;;  %4223 = vrcp.f32 %v2585_v6 }
 0x86c   : > { %v2611_v39 = vmul.f32 %v4214_v57, %v6835_v24  ;;  %v2567_v33 = vpop.xlane.xlu1 %2566  ;;  %v2640_v7 = vadd.f32 %v2639_v54, %v6838_v28  ;;  %v4216_v59 = vpop.eup %4215 }
 0x86d   : > { %v2613_v42 = vmul.f32 %v4216_v59, %v6844_v40  ;;  %v6855_v20 = vmax.f32 %v2435_v45, 0.0  ;;  %v4218_v32 = vpop.eup %4217  ;;  %v2586_v63 = vadd.f32 1e-09, %v2567_v33 }
 0x86e   : > { %v6851_v35 = vmul.f32 %v2611_v39, %v6756_v41  ;;  %v2414_v13 = vpop.xlane.xlu0 %2413  ;;  %v2641_v5 = vadd.f32 %v2640_v7, %v6842_v55  ;;  %v4220_v50 = vpop.eup %4219 }
 0x86f   : > { %v2436_v22 = vsub.f32 %v6546_v31, %v2414_v13  ;;  %v6866_v54 = vmul.f32 %v2613_v42, %v6742_v43  ;;  %v2614_v31 = vmul.f32 %v4218_v32, %v6855_v20 }
 0x870   : > { %v2569_v56 = vpop.xlane.xlu1 %2568  ;;  %v2642_v0 = vadd.f32 %v2641_v5, %v6851_v35 }
 0x871   : > { %v6862_v23 = vmax.f32 %v2436_v22, 0.0  ;;  %v2587_v41 = vadd.f32 1e-09, %v2569_v56  ;;  %v6875_v7 = vmul.f32 %v2614_v31, %v6751_v61  ;;  %v4222_v59 = vpop.eup %4221 }
 0x872   : > { %v2416_v2 = vpop.xlane.xlu0 %2415  ;;  %v2643_v34 = vadd.f32 %v2642_v0, %v6859_v15 }
 0x873   : > { %v2437_v49 = vsub.f32 %v6555_v8, %v2416_v2  ;;  %v2615_v57 = vmul.f32 %v4220_v50, %v6862_v23  ;;  %4225 = vrcp.f32 %v2587_v41 }
 0x874   : > { %v2571_v45 = vpop.xlane.xlu1 %2570  ;;  %v2644_v18 = vadd.f32 %v2643_v34, %v6866_v54  ;;  %4227 = vrcp.f32 %v2586_v63 }
 0x875   : > { %v6871_v39 = vmax.f32 %v2437_v49, 0.0  ;;  %v2588_v6 = vadd.f32 1e-09, %v2571_v45  ;;  %v6879_v13 = vmul.f32 %v2615_v57, %v6760_v25  ;;  %v4224_v0 = vpop.eup %4223 }
 0x876   : > { %v2418_v33 = vpop.xlane.xlu0 %2417  ;;  %v2645_v56 = vadd.f32 %v2644_v18, %v6875_v7 }
 0x877   : > { %v2438_v43 = vsub.f32 %v6566_v21, %v2418_v33  ;;  %v2616_v5 = vmul.f32 %v4222_v59, %v6871_v39  ;;  %4229 = vrcp.f32 %v2588_v6 }
 0x878   : > { %v2573_v8 = vpop.xlane.xlu1 %2572  ;;  %v2646_v34 = vadd.f32 %v2645_v56, %v6879_v13 }
 0x879   : > { %v6882_v42 = vmax.f32 %v2438_v43, 0.0  ;;  %v2589_v22 = vadd.f32 1e-09, %v2573_v8  ;;  %v6888_v25 = vmul.f32 %v2616_v5, %v6766_v14 }
 0x87a   : > { %v2422_v41 = vpop.xlane.xlu0 %2421 }
 0x87b   : > { %v2617_v61 = vmul.f32 %v4224_v0, %v6882_v42  ;;  %4231 = vrcp.f32 %v2589_v22  ;;  %v2440_v21 = vsub.f32 %v6574_v27, %v2422_v41 }
 0x87c   : > { %v2420_v32 = vpop.xlane.xlu1 %2419 }
 0x87d   : > { %v6890_v63 = vmax.f32 %v2440_v21, 0.0  ;;  %v2439_v2 = vsub.f32 %v6581_v29, %v2420_v32  ;;  %v4226_v50 = vpop.eup %4225  ;;  %v6895_v49 = vmul.f32 %v2617_v61, %v6772_v46  ;;  %v2647_v29 = vadd.f32 %v2646_v34, %v6888_v25 }
 0x87e   : > { %v2426_v31 = vpop.xlane.xlu0 %2425  ;;  %v4228_v45 = vpop.eup %4227 }
 0x87f   : > { %v6897_v57 = vmax.f32 %v2439_v2, 0.0  ;;  %v2442_v27 = vsub.f32 %v6594_v19, %v2426_v31  ;;  %v2619_v14 = vmul.f32 %v4226_v50, %v6890_v63  ;;  %v2648_v46 = vadd.f32 %v2647_v29, %v6895_v49 }
 0x880   : > { %v2424_v18 = vpop.xlane.xlu1 %2423  ;;  %v2768_v29 = vmul.f32 -1.0, %v4562_v12 }
 0x881   : > { %v2618_v6 = vmul.f32 %v4228_v45, %v6897_v57  ;;  %v2441_v33 = vsub.f32 %v6591_v44, %v2424_v18  ;;  %v4230_v8 = vpop.eup %4229  ;;  %v6910_v5 = vmax.f32 %v2442_v27, 0.0  ;;  %v6913_v22 = vmul.f32 %v2619_v14, %v6782_v37 }
 0x882   : > { %v2764_v14 = vmul.f32 -1.0, %v4548_v51 }
 0x883   : > { %v6905_v43 = vmul.f32 %v2618_v6, %v6777_v3  ;;  %v6907_v59 = vmax.f32 %v2441_v33, 0.0 }
 0x884   : > { %v2782_v33 = vmul.f32 1.442695, %v2764_v14 }
 0x885   : > { %v4232_v19 = vpop.eup %4231  ;;  %v2620_v56 = vmul.f32 %v4230_v8, %v6907_v59  ;;  %v2649_v44 = vadd.f32 %v2648_v46, %v6905_v43 }
 0x886   : > { %v2621_v0 = vmul.f32 %v4232_v19, %v6910_v5 }
 0x887   : > { %v6919_v3 = vmul.f32 %v2620_v56, %v6787_v48  ;;  %v2650_v41 = vadd.f32 %v2649_v44, %v6913_v22  ;;  %v2762_v48 = vmul.f32 -1.0, %v4530_v11  ;;  %v2790_v56 = vmul.f32 1.442695, %v2768_v29 }
 0x888   : > { %v6923_v61 = vmul.f32 %v2621_v0, %v6792_v17  ;;  %v2766_v17 = vmul.f32 -1.0, %v4542_v36  ;;  %v2763_v44 = vmul.f32 -1.0, %v8144_v60  ;;  %v2769_v0 = vmul.f32 -1.0, %v8145_v30 }
 0x889   : > { %v2651_v21 = vadd.f32 %v2650_v41, %v6919_v3  ;;  %v2778_v18 = vmul.f32 1.442695, %v2762_v48 }
 0x88a   : > { %v2786_v19 = vmul.f32 1.442695, %v2766_v17  ;;  %v8306_v17 = vld [vmem:[#allocation32_spill] sm:$0xff]  ;;  %v2780_v29 = vmul.f32 1.442695, %v2763_v44 }
 0x88b   : > { %v2652_v32 = vadd.f32 %v2651_v21, %v6923_v61  ;;  %v2792_v44 = vmul.f32 1.442695, %v2769_v0  ;;  %v8315_v0 = vld [vmem:[#allocation48_spill] sm:$0xff] }
 0x88d   : > { %v2653_v37 = vrot.slane %v2652_v32, 4 }
 0x88f   : > { %v2654_v2 = vadd.f32 %v2653_v37, %v2652_v32 }
 0x891   : > { %v2655_v34 = vrot.slane %v2654_v2, 2 }
 0x893   : > { %v2656_v50 = vadd.f32 %v2655_v34, %v2654_v2 }
 0x895   : > { %v2657_v31 = vrot.slane %v2656_v50, 1 }
 0x897   : > { %v2658_v45 = vadd.f32 %v2657_v31, %v2656_v50 }
 0x899   : > { %v2659_v27 = vadd.f32 1e-09, %v2658_v45 }
 0x89b   : > { %4233 = vrcp.f32 %v2659_v27 }
 0x89c   : > { %4235 = vpow2.f32 %v2778_v18 }
 0x89d   : > { %4237 = vpow2.f32 %v2782_v33 }
 0x89e   : > { %4239 = vpow2.f32 %v2786_v19 }
 0x89f   : > { %4241 = vpow2.f32 %v2790_v56 }
 0x8a0   : > { %4243 = vpow2.f32 %v2780_v29  ;;  %v8319_v29 = vld [vmem:[#allocation18_spill] sm:$0xff] }
 0x8a1   : > { %4245 = vpow2.f32 %v2792_v44 }
 0x8a5   : > { %v4234_v6 = vpop.eup %4233 }
 0x8a6   : > { %v2661_v46 = vmul.f32 %v4234_v6, %v6646_v4  ;;  %v4236_v33 = vpop.eup %4235 }
 0x8a8   : > { %v2662_v8 = vmin.f32 %v2661_v46, 1.0 }
 0x8aa   : > { %v2664_v41 = vmul.f32 %v2662_v8, %v6823_v16  ;;  %v2743_v21 = vmul.f32 %v2662_v8, %v2658_v45  ;;  %v2663_v32 = vmul.f32 %v2662_v8, %v6820_v62  ;;  %v2665_v37 = vmul.f32 %v2662_v8, %v6828_v26  ;;  %v8297_v16 = vld [vmem:[#allocation30_spill] sm:$0xff] }
 0x8ab   : > { %v2666_v2 = vmul.f32 %v2662_v8, %v6838_v28  ;;  %v2667_v34 = vmul.f32 %v2662_v8, %v6842_v55  ;;  %v2668_v50 = vmul.f32 %v2662_v8, %v6851_v35  ;;  %v6941_v31 = vmul.f32 %v2662_v8, %v6859_v15  ;;  %v8299_v28 = vld [vmem:[#allocation45_spill] sm:$0xff]  ;;  %v8301_v35 = vld [vmem:[#allocation31_spill] sm:$0xff]  ;;  %v8303_v45 = vld [vmem:[#allocation46_spill] sm:$0xff] }
 0x8ac   : > { %v2744_v27 = vsub.f32 %v6646_v4, %v2743_v21  ;;  %2681 = vadd.xlane.f32.xlu0 %v2664_v41  ;;  %v6945_v48 = vadd.f32 %v2664_v41, %v6629_v52  ;;  %2679 = vadd.xlane.f32.xlu1 %v2663_v32  ;;  %v6948_v62 = vadd.f32 %v2663_v32, %v6632_v53  ;;  %v8305_v52 = vld [vmem:[#allocation3_spill] sm:$0xff]  ;;  %v8308_v21 = vld [vmem:[#allocation10_spill] sm:$0xff] }
 0x8ad   : > { %v6951_v26 = vadd.f32 %v2665_v37, %v8297_v16  ;;  %v6954_v55 = vadd.f32 %v2666_v2, %v8299_v28  ;;  %v6957_v15 = vadd.f32 %v2667_v34, %v8301_v35  ;;  %v6960_v4 = vadd.f32 %v2668_v50, %v8303_v45  ;;  %v8310_v28 = vld [vmem:[#allocation47_spill] sm:$0xff]  ;;  %v4238_v45 = vpop.eup %4237 }
 0x8ae   : > { %8296 = vst [vmem:[#allocation36_spill] sm:$0xff] %v6948_v62  ;;  %v6962_v18 = vmax.f32 %v2744_v27, 0.0  ;;  %v2765_v14 = vmul.f32 -1.0, %v8305_v52  ;;  %v6967_v53 = vadd.f32 %v6941_v31, %v8306_v17  ;;  %v6970_v6 = vmul.f32 %v2662_v8, %v6866_v54 }
 0x8af   : > { %8298 = vst [vmem:[#allocation22_spill] sm:$0xff] %v6951_v26  ;;  %8300 = vst [vmem:[#allocation37_spill] sm:$0xff] %v6954_v55  ;;  %v6973_v46 = vmul.f32 %v2662_v8, %v6875_v7  ;;  %v6976_v19 = vmul.f32 %v2662_v8, %v6879_v13  ;;  %v2770_v32 = vmul.f32 -1.0, %v8308_v21  ;;  %v6983_v27 = vmul.f32 %v2662_v8, %v6888_v25  ;;  %v8312_v25 = vld [vmem:[#allocation12_spill] sm:$0xff] }
 0x8b0   : > { %8302 = vst [vmem:[#allocation23_spill] sm:$0xff] %v6957_v15  ;;  %8304 = vst [vmem:[#allocation38_spill] sm:$0xff] %v6960_v4  ;;  %2683 = vadd.xlane.f32.xlu0 %v2665_v37  ;;  %v6979_v41 = vmul.f32 %v4236_v33, %v6962_v18  ;;  %v6986_v54 = vmul.f32 %v2662_v8, %v6895_v49  ;;  %v6989_v7 = vmul.f32 %v2662_v8, %v6913_v22  ;;  %v8309_v37 = vld [vmem:[#allocation7_spill] sm:$0xff]  ;;  %v8313_v49 = vld [vmem:[#allocation33_spill] sm:$0xff] }
 0x8b1   : > { %8307 = vst [vmem:[#allocation24_spill] sm:$0xff] %v6967_v53  ;;  %v2784_v13 = vmul.f32 1.442695, %v2765_v14  ;;  %v2767_v16 = vmul.f32 -1.0, %v8309_v37  ;;  %v6995_v35 = vadd.f32 %v6970_v6, %v8310_v28  ;;  %v2771_v17 = vmul.f32 -1.0, %v8312_v25  ;;  %v8317_v37 = vld [vmem:[#allocation34_spill] sm:$0xff] }
 0x8b2   : > { %2826 = vadd.xlane.f32.xlu1 %v6979_v41  ;;  %v7000_v56 = vadd.f32 %v6973_v46, %v8313_v49  ;;  %v7004_v22 = vadd.f32 %v6976_v19, %v8315_v0  ;;  %v7007_v14 = vmul.f32 %v4238_v45, %v6962_v18  ;;  %v2794_v33 = vmul.f32 1.442695, %v2770_v32  ;;  %v8321_v49 = vld [vmem:[#allocation19_spill] sm:$0xff]  ;;  %v4240_v32 = vpop.eup %4239 }
 0x8b3   : > { %8311 = vst [vmem:[#allocation39_spill] sm:$0xff] %v6995_v35  ;;  %v7011_v28 = vadd.f32 %v6983_v27, %v8317_v37  ;;  %v7015_v25 = vadd.f32 %v6986_v54, %v8319_v29  ;;  %v7022_v0 = vmul.f32 %v2662_v8, %v6905_v43  ;;  %v7029_v37 = vmul.f32 %v2662_v8, %v6919_v3  ;;  %v8323_v29 = vld [vmem:[#allocation20_spill] sm:$0xff] }
 0x8b4   : > { %8314 = vst [vmem:[#allocation25_spill] sm:$0xff] %v7000_v56  ;;  %8316 = vst [vmem:[#allocation40_spill] sm:$0xff] %v7004_v22  ;;  %2685 = vadd.xlane.f32.xlu0 %v2666_v2  ;;  %v7019_v56 = vadd.f32 %v6989_v7, %v8321_v49  ;;  %v7025_v2 = vmul.f32 %v2662_v8, %v6923_v61  ;;  %4247 = vpow2.f32 %v2784_v13  ;;  %v2788_v45 = vmul.f32 1.442695, %v2767_v16  ;;  %v8325_v49 = vld [vmem:[#allocation35_spill] sm:$0xff]  ;;  %v8327_v61 = vld [vmem:[#allocation21_spill] sm:$0xff]  ;;  %v4242_v16 = vpop.eup %4241 }
 0x8b5   : > { %8318 = vst [vmem:[#allocation26_spill] sm:$0xff] %v7011_v28  ;;  %8320 = vst [vmem:[#allocation41_spill] sm:$0xff] %v7015_v25  ;;  %v7033_v44 = vadd.f32 %v7022_v0, %v8323_v29  ;;  %v7040_v43 = vmul.f32 %v4240_v32, %v6962_v18  ;;  %v7044_v25 = vadd.f32 %v7029_v37, %v8327_v61  ;;  %4249 = vpow2.f32 %v2794_v33  ;;  %v8329_v8 = vld [vmem:[#allocation11_spill] sm:$0xff] }
 0x8b6   : > { %8322 = vst [vmem:[#allocation27_spill] sm:$0xff] %v7019_v56  ;;  %2830 = vadd.xlane.f32.xlu1 %v7007_v14  ;;  %v7037_v56 = vadd.f32 %v7025_v2, %v8325_v49  ;;  %v2796_v3 = vmul.f32 1.442695, %v2771_v17  ;;  %v2772_v13 = vmul.f32 -1.0, %v8329_v8  ;;  %4251 = vpow2.f32 %v2788_v45  ;;  %v8330_v49 = vld [vmem:[#allocation13_spill] sm:$0xff] }
 0x8b7   : > { %8324 = vst [vmem:[#allocation42_spill] sm:$0xff] %v7033_v44  ;;  %8328 = vst [vmem:[#allocation43_spill] sm:$0xff] %v7044_v25  ;;  %v7049_v29 = vmul.f32 %v4242_v16, %v6962_v18  ;;  %v8331_v16 = vld [vmem:[#allocation14_spill] sm:$0xff]  ;;  %v8332_v25 = vld [vmem:[#allocation15_spill] sm:$0xff] }
 0x8b8   : > { %8326 = vst [vmem:[#allocation28_spill] sm:$0xff] %v7037_v56  ;;  %2687 = vadd.xlane.f32.xlu0 %v2667_v34  ;;  %v4244_v34 = vpop.eup %4243  ;;  %4253 = vpow2.f32 %v2796_v3  ;;  %v2798_v32 = vmul.f32 1.442695, %v2772_v13  ;;  %v2773_v56 = vmul.f32 -1.0, %v8330_v49  ;;  %v2774_v8 = vmul.f32 -1.0, %v8331_v16 }
 0x8b9   : > { %v7054_v33 = vmul.f32 %v4244_v34, %v6962_v18  ;;  %v4246_v17 = vpop.eup %4245  ;;  %v2775_v44 = vmul.f32 -1.0, %v8332_v25  ;;  %v8334_v25 = vld [vmem:[#allocation16_spill] sm:$0xff] }
 0x8ba   : > { %2834 = vadd.xlane.f32.xlu1 %v7040_v43  ;;  %v7058_v61 = vmul.f32 %v4246_v17, %v6962_v18  ;;  %4255 = vpow2.f32 %v2798_v32  ;;  %v2800_v45 = vmul.f32 1.442695, %v2773_v56  ;;  %v2802_v17 = vmul.f32 1.442695, %v2774_v8 }
 0x8bb   : > { %v2804_v16 = vmul.f32 1.442695, %v2775_v44  ;;  %v2777_v22 = vmul.f32 -1.0, %v8334_v25 }
 0x8bc   : > { %2689 = vadd.xlane.f32.xlu0 %v2668_v50  ;;  %4257 = vpow2.f32 %v2800_v45 }
 0x8bd   : > { %4259 = vpow2.f32 %v2802_v17  ;;  %v2808_v17 = vmul.f32 1.442695, %v2777_v22 }
 0x8be   : > { %2838 = vadd.xlane.f32.xlu1 %v7049_v29  ;;  %v4248_v50 = vpop.eup %4247  ;;  %4261 = vpow2.f32 %v2804_v16 }
 0x8bf   : > { %v7063_v3 = vmul.f32 %v4248_v50, %v6962_v18  ;;  %v4250_v13 = vpop.eup %4249 }
 0x8c0   : > { %2828 = vadd.xlane.f32.xlu0 %v7054_v33  ;;  %v7067_v34 = vmul.f32 %v4250_v13, %v6962_v18  ;;  %v4252_v49 = vpop.eup %4251  ;;  %v8333_v13 = vld [vmem:[#allocation17_spill] sm:$0xff] }
 0x8c1   : > { %v7072_v56 = vmul.f32 %v4252_v49, %v6962_v18  ;;  %v2776_v28 = vmul.f32 -1.0, %v8333_v13 }
 0x8c2   : > { %2840 = vadd.xlane.f32.xlu1 %v7058_v61  ;;  %v4254_v32 = vpop.eup %4253 }
 0x8c3   : > { %v7076_v50 = vmul.f32 %v4254_v32, %v6962_v18  ;;  %v2806_v49 = vmul.f32 1.442695, %v2776_v28 }
 0x8c4   : > { %2832 = vadd.xlane.f32.xlu0 %v7063_v3  ;;  %v4256_v8 = vpop.eup %4255 }
 0x8c5   : > { %v7082_v45 = vmul.f32 %v4256_v8, %v6962_v18  ;;  %4263 = vpow2.f32 %v2806_v49 }
 0x8c6   : > { %2842 = vadd.xlane.f32.xlu1 %v7067_v34  ;;  %v4258_v32 = vpop.eup %4257  ;;  %4265 = vpow2.f32 %v2808_v17 }
 0x8c7   : > { %v7088_v44 = vmul.f32 %v4258_v32, %v6962_v18 }
 0x8c8   : > { %2836 = vadd.xlane.f32.xlu0 %v7072_v56 }
 0x8ca   : > { %2844 = vadd.xlane.f32.xlu1 %v7076_v50 }
 0x8cc   : > { %2691 = vadd.xlane.f32.xlu0 %v6941_v31  ;;  %v4260_v31 = vpop.eup %4259 }
 0x8cd   : > { %v7093_v16 = vmul.f32 %v4260_v31, %v6962_v18  ;;  %v4262_v28 = vpop.eup %4261 }
 0x8ce   : > { %2846 = vadd.xlane.f32.xlu1 %v7082_v45 }
 0x8cf   : > { %v4264_v22 = vpop.eup %4263 }
 0x8d0   : > { %2693 = vadd.xlane.f32.xlu0 %v6970_v6  ;;  %v7098_v6 = vmul.f32 %v4262_v28, %v6962_v18  ;;  %v7103_v8 = vmul.f32 %v4264_v22, %v6962_v18 }
 0x8d2   : > { %2848 = vadd.xlane.f32.xlu1 %v7088_v44 }
 0x8d4   : > { %2695 = vadd.xlane.f32.xlu0 %v6973_v46  ;;  %v4266_v46 = vpop.eup %4265 }
 0x8d5   : > { %v7108_v49 = vmul.f32 %v4266_v46, %v6962_v18 }
 0x8d6   : > { %2850 = vadd.xlane.f32.xlu1 %v7093_v16 }
 0x8d8   : > { %2697 = vadd.xlane.f32.xlu0 %v6976_v19 }
 0x8da   : > { %2852 = vadd.xlane.f32.xlu1 %v7098_v6 }
 0x8dc   : > { %2699 = vadd.xlane.f32.xlu0 %v6983_v27 }
 0x8de   : > { %2854 = vadd.xlane.f32.xlu1 %v7103_v8 }
 0x8e0   : > { %2701 = vadd.xlane.f32.xlu0 %v6986_v54 }
 0x8e2   : > { %2856 = vadd.xlane.f32.xlu1 %v7108_v49 }
 0x8e4   : > { %2705 = vadd.xlane.f32.xlu0 %v6989_v7 }
 0x8e6   : > { %2703 = vadd.xlane.f32.xlu1 %v7022_v0 }
 0x8e8   : > { %2709 = vadd.xlane.f32.xlu0 %v7025_v2 }
 0x8ea   : > { %2707 = vadd.xlane.f32.xlu1 %v7029_v37 }
 0x939   : > { %v2682_v19 = vpop.xlane.xlu0 %2681  ;;  %v2680_v27 = vpop.xlane.xlu1 %2679 }
 0x93a   : > { %v2711_v4 = vsub.f32 %v6802_v38, %v2680_v27 }
 0x93c   : > { %v7118_v62 = vmax.f32 %v2711_v4, 0.0 }
 0x93d   : > { %v2684_v32 = vpop.xlane.xlu0 %2683 }
 0x93e   : > { %v2713_v26 = vsub.f32 %v6804_v9, %v2684_v32 }
 0x93f   : > { %v2827_v17 = vpop.xlane.xlu1 %2826 }
 0x940   : > { %v2858_v46 = vadd.f32 1e-09, %v2827_v17  ;;  %v2712_v17 = vsub.f32 %v6807_v1, %v2682_v19 }
 0x941   : > { %v2686_v31 = vpop.xlane.xlu0 %2685 }
 0x942   : > { %4267 = vrcp.f32 %v2858_v46  ;;  %v2714_v9 = vsub.f32 %v6816_v10, %v2686_v31 }
 0x943   : > { %v2831_v28 = vpop.xlane.xlu1 %2830 }
 0x944   : > { %v2860_v25 = vadd.f32 1e-09, %v2831_v28 }
 0x945   : > { %v2688_v54 = vpop.xlane.xlu0 %2687 }
 0x946   : > { %4269 = vrcp.f32 %v2860_v25  ;;  %v2715_v38 = vsub.f32 %v6814_v47, %v2688_v54 }
 0x947   : > { %v2835_v22 = vpop.xlane.xlu1 %2834 }
 0x948   : > { %v2862_v7 = vadd.f32 1e-09, %v2835_v22  ;;  %v7130_v47 = vmax.f32 %v2715_v38, 0.0 }
 0x949   : > { %v2690_v13 = vpop.xlane.xlu0 %2689 }
 0x94a   : > { %v2716_v10 = vsub.f32 %v6835_v24, %v2690_v13 }
 0x94b   : > { %v2839_v35 = vpop.xlane.xlu1 %2838 }
 0x94c   : > { %v2864_v15 = vadd.f32 1e-09, %v2839_v35  ;;  %v4268_v46 = vpop.eup %4267  ;;  %v7123_v35 = vmax.f32 %v2712_v17, 0.0  ;;  %v7151_v13 = vmax.f32 %v2716_v10, 0.0 }
 0x94d   : > { %v2829_v0 = vpop.xlane.xlu0 %2828  ;;  %v2890_v1 = vmul.f32 %v4268_v46, %v7118_v62 }
 0x94e   : > { %v2859_v53 = vadd.f32 1e-09, %v2829_v0  ;;  %v7120_v0 = vmax.f32 %v2713_v26, 0.0 }
 0x94f   : > { %v2841_v2 = vpop.xlane.xlu1 %2840  ;;  %v7136_v17 = vmul.f32 %v2890_v1, %v6979_v41 }
 0x950   : > { %4271 = vrcp.f32 %v2859_v53  ;;  %v4270_v22 = vpop.eup %4269  ;;  %v2865_v53 = vadd.f32 1e-09, %v2841_v2 }
 0x951   : > { %4273 = vrcp.f32 %v2862_v7  ;;  %v2833_v37 = vpop.xlane.xlu0 %2832  ;;  %v2892_v27 = vmul.f32 %v4270_v22, %v7120_v0 }
 0x952   : > { %v2861_v21 = vadd.f32 1e-09, %v2833_v37  ;;  %v7132_v37 = vmax.f32 %v2714_v9, 0.0 }
 0x953   : > { %v2843_v55 = vpop.xlane.xlu1 %2842 }
 0x954   : > { %4275 = vrcp.f32 %v2861_v21 }
 0x955   : > { %v2837_v28 = vpop.xlane.xlu0 %2836  ;;  %4277 = vrcp.f32 %v2864_v15  ;;  %v2866_v15 = vadd.f32 1e-09, %v2843_v55 }
 0x956   : > { %v2863_v25 = vadd.f32 1e-09, %v2837_v28 }
 0x957   : > { %v2845_v7 = vpop.xlane.xlu1 %2844 }
 0x958   : > { %4279 = vrcp.f32 %v2863_v25  ;;  %v2867_v54 = vadd.f32 1e-09, %v2845_v7  ;;  %v7144_v25 = vmul.f32 %v2892_v27, %v7007_v14 }
 0x959   : > { %v2692_v21 = vpop.xlane.xlu0 %2691  ;;  %4281 = vrcp.f32 %v2865_v53 }
 0x95a   : > { %v4272_v19 = vpop.eup %4271  ;;  %v2717_v32 = vsub.f32 %v6831_v58, %v2692_v21  ;;  %4283 = vrcp.f32 %v2866_v15 }
 0x95b   : > { %v4274_v4 = vpop.eup %4273  ;;  %v2847_v26 = vpop.xlane.xlu1 %2846  ;;  %v2891_v2 = vmul.f32 %v4272_v19, %v7123_v35  ;;  %4285 = vrcp.f32 %v2867_v54 }
 0x95c   : > { %v2894_v58 = vmul.f32 %v4274_v4, %v7130_v47  ;;  %v7147_v53 = vmax.f32 %v2717_v32, 0.0  ;;  %v2868_v7 = vadd.f32 1e-09, %v2847_v26 }
 0x95d   : > { %v2694_v31 = vpop.xlane.xlu0 %2693  ;;  %v7139_v28 = vmul.f32 %v2891_v2, %v7054_v33 }
 0x95e   : > { %v4276_v55 = vpop.eup %4275  ;;  %v2718_v46 = vsub.f32 %v6844_v40, %v2694_v31  ;;  %v7158_v21 = vmul.f32 %v2894_v58, %v7040_v43  ;;  %4287 = vrcp.f32 %v2868_v7 }
 0x95f   : > { %v2893_v22 = vmul.f32 %v4276_v55, %v7132_v37  ;;  %v2849_v24 = vpop.xlane.xlu1 %2848  ;;  %v2922_v41 = vadd.f32 %v7139_v28, %v7136_v17  ;;  %v4278_v33 = vpop.eup %4277 }
 0x960   : > { %v7160_v1 = vmax.f32 %v2718_v46, 0.0  ;;  %v2896_v4 = vmul.f32 %v4278_v33, %v7147_v53  ;;  %v2869_v15 = vadd.f32 1e-09, %v2849_v24 }
 0x961   : > { %v2696_v38 = vpop.xlane.xlu0 %2695  ;;  %v7154_v40 = vmul.f32 %v2893_v22, %v7063_v3  ;;  %v2923_v14 = vadd.f32 %v2922_v41, %v7144_v25 }
 0x962   : > { %v4280_v9 = vpop.eup %4279  ;;  %v2719_v19 = vsub.f32 %v6855_v20, %v2696_v38  ;;  %v7175_v55 = vmul.f32 %v2896_v4, %v7049_v29  ;;  %4289 = vrcp.f32 %v2869_v15 }
 0x963   : > { %v2895_v27 = vmul.f32 %v4280_v9, %v7151_v13  ;;  %v2851_v32 = vpop.xlane.xlu1 %2850  ;;  %v2924_v26 = vadd.f32 %v2923_v14, %v7154_v40  ;;  %v4282_v3 = vpop.eup %4281 }
 0x964   : > { %v2897_v10 = vmul.f32 %v4282_v3, %v7160_v1  ;;  %v7171_v31 = vmax.f32 %v2719_v19, 0.0  ;;  %v4284_v24 = vpop.eup %4283  ;;  %v2870_v41 = vadd.f32 1e-09, %v2851_v32 }
 0x965   : > { %v7167_v2 = vmul.f32 %v2895_v27, %v7072_v56  ;;  %v2698_v54 = vpop.xlane.xlu0 %2697  ;;  %v2925_v43 = vadd.f32 %v2924_v26, %v7158_v21  ;;  %v4286_v38 = vpop.eup %4285 }
 0x966   : > { %v2720_v20 = vsub.f32 %v6862_v23, %v2698_v54  ;;  %v7182_v14 = vmul.f32 %v2897_v10, %v7058_v61  ;;  %v2898_v23 = vmul.f32 %v4284_v24, %v7171_v31 }
 0x967   : > { %v2853_v58 = vpop.xlane.xlu1 %2852  ;;  %v2926_v46 = vadd.f32 %v2925_v43, %v7167_v2 }
 0x968   : > { %v7178_v22 = vmax.f32 %v2720_v20, 0.0  ;;  %v2871_v56 = vadd.f32 1e-09, %v2853_v58  ;;  %v7191_v26 = vmul.f32 %v2898_v23, %v7067_v34  ;;  %v4288_v3 = vpop.eup %4287 }
 0x969   : > { %v2700_v33 = vpop.xlane.xlu0 %2699  ;;  %v2927_v7 = vadd.f32 %v2926_v46, %v7175_v55 }
 0x96a   : > { %v2721_v29 = vsub.f32 %v6871_v39, %v2700_v33  ;;  %v2899_v9 = vmul.f32 %v4286_v38, %v7178_v22  ;;  %4291 = vrcp.f32 %v2871_v56 }
 0x96b   : > { %v2855_v19 = vpop.xlane.xlu1 %2854  ;;  %v2928_v4 = vadd.f32 %v2927_v7, %v7182_v14  ;;  %4293 = vrcp.f32 %v2870_v41 }
 0x96c   : > { %v7187_v27 = vmax.f32 %v2721_v29, 0.0  ;;  %v2872_v15 = vadd.f32 1e-09, %v2855_v19  ;;  %v7195_v54 = vmul.f32 %v2899_v9, %v7076_v50  ;;  %v4290_v46 = vpop.eup %4289 }
 0x96d   : > { %v2702_v32 = vpop.xlane.xlu0 %2701  ;;  %v2929_v58 = vadd.f32 %v2928_v4, %v7191_v26 }
 0x96e   : > { %v2722_v61 = vsub.f32 %v6882_v42, %v2702_v32  ;;  %v2900_v43 = vmul.f32 %v4288_v3, %v7187_v27  ;;  %4295 = vrcp.f32 %v2872_v15 }
 0x96f   : > { %v2857_v39 = vpop.xlane.xlu1 %2856  ;;  %v2930_v7 = vadd.f32 %v2929_v58, %v7195_v54 }
 0x970   : > { %v7198_v10 = vmax.f32 %v2722_v61, 0.0  ;;  %v2873_v20 = vadd.f32 1e-09, %v2857_v39  ;;  %v7204_v50 = vmul.f32 %v2900_v43, %v7082_v45 }
 0x971   : > { %v2706_v56 = vpop.xlane.xlu0 %2705 }
 0x972   : > { %v2901_v34 = vmul.f32 %v4290_v46, %v7198_v10  ;;  %4297 = vrcp.f32 %v2873_v20  ;;  %v2724_v42 = vsub.f32 %v6890_v63, %v2706_v56 }
 0x973   : > { %v2704_v24 = vpop.xlane.xlu1 %2703 }
 0x974   : > { %v7206_v41 = vmax.f32 %v2724_v42, 0.0  ;;  %v2723_v33 = vsub.f32 %v6897_v57, %v2704_v24  ;;  %v4292_v38 = vpop.eup %4291  ;;  %v7211_v29 = vmul.f32 %v2901_v34, %v7088_v44  ;;  %v2931_v57 = vadd.f32 %v2930_v7, %v7204_v50 }
 0x975   : > { %v2710_v23 = vpop.xlane.xlu0 %2709  ;;  %v4294_v19 = vpop.eup %4293 }
 0x976   : > { %v7213_v9 = vmax.f32 %v2723_v33, 0.0  ;;  %v2726_v63 = vsub.f32 %v6910_v5, %v2710_v23  ;;  %v2903_v45 = vmul.f32 %v4292_v38, %v7206_v41  ;;  %v2932_v44 = vadd.f32 %v2931_v57, %v7211_v29 }
 0x977   : > { %v2708_v4 = vpop.xlane.xlu1 %2707  ;;  %v3052_v57 = vmul.f32 -0.25, %v4562_v12 }
 0x978   : > { %v2902_v15 = vmul.f32 %v4294_v19, %v7213_v9  ;;  %v2725_v32 = vsub.f32 %v6907_v59, %v2708_v4  ;;  %v4296_v39 = vpop.eup %4295  ;;  %v7226_v43 = vmax.f32 %v2726_v63, 0.0  ;;  %v7229_v20 = vmul.f32 %v2903_v45, %v7098_v6 }
 0x979   : > { %v3048_v45 = vmul.f32 -0.25, %v4548_v51 }
 0x97a   : > { %v7221_v61 = vmul.f32 %v2902_v15, %v7093_v16  ;;  %v7223_v3 = vmax.f32 %v2725_v32, 0.0 }
 0x97b   : > { %v3066_v32 = vmul.f32 1.442695, %v3048_v45  ;;  %v8339_v45 = vld [vmem:[#allocation38_spill] sm:$0xff] }
 0x97c   : > { %v4298_v5 = vpop.eup %4297  ;;  %v2904_v58 = vmul.f32 %v4296_v39, %v7223_v3  ;;  %v2933_v59 = vadd.f32 %v2932_v44, %v7221_v61 }
 0x97d   : > { %v2905_v46 = vmul.f32 %v4298_v5, %v7226_v43 }
 0x97e   : > { %v7235_v16 = vmul.f32 %v2904_v58, %v7103_v8  ;;  %v2934_v56 = vadd.f32 %v2933_v59, %v7229_v20  ;;  %v3046_v8 = vmul.f32 -0.25, %v4530_v11  ;;  %v3047_v58 = vmul.f32 -0.25, %v8144_v60 }
 0x97f   : > { %v7239_v34 = vmul.f32 %v2905_v46, %v7108_v49  ;;  %v3050_v49 = vmul.f32 -0.25, %v4542_v36  ;;  %v3074_v59 = vmul.f32 1.442695, %v3052_v57  ;;  %v3053_v46 = vmul.f32 -0.25, %v8145_v30 }
 0x980   : > { %v2935_v42 = vadd.f32 %v2934_v56, %v7235_v16  ;;  %v3062_v4 = vmul.f32 1.442695, %v3046_v8  ;;  %v3049_v56 = vmul.f32 -0.25, %v8305_v52  ;;  %v8364_v52 = vld [vmem:[#allocation15_spill] sm:$0xff] }
 0x981   : > { %v3070_v5 = vmul.f32 1.442695, %v3050_v49  ;;  %v3059_v51 = vmul.f32 -0.25, %v8364_v52  ;;  %v8366_v52 = vld [vmem:[#allocation16_spill] sm:$0xff] }
 0x982   : > { %v2936_v24 = vadd.f32 %v2935_v42, %v7239_v34  ;;  %v3061_v11 = vmul.f32 -0.25, %v8366_v52 }
 0x984   : > { %v2937_v6 = vrot.slane %v2936_v24, 4 }
 0x986   : > { %v2938_v33 = vadd.f32 %v2937_v6, %v2936_v24 }
 0x988   : > { %v2939_v7 = vrot.slane %v2938_v33, 2 }
 0x98a   : > { %v2940_v38 = vadd.f32 %v2939_v7, %v2938_v33 }
 0x98c   : > { %v2941_v23 = vrot.slane %v2940_v38, 1 }
 0x98e   : > { %v2942_v19 = vadd.f32 %v2941_v23, %v2940_v38 }
 0x990   : > { %v2943_v63 = vadd.f32 1e-09, %v2942_v19 }
 0x992   : > { %4299 = vrcp.f32 %v2943_v63 }
 0x993   : > { %4301 = vpow2.f32 %v3062_v4 }
 0x994   : > { %4303 = vpow2.f32 %v3066_v32  ;;  %v8341_v32 = vld [vmem:[#allocation24_spill] sm:$0xff] }
 0x995   : > { %4305 = vpow2.f32 %v3070_v5 }
 0x996   : > { %4307 = vpow2.f32 %v3074_v59  ;;  %v8346_v59 = vld [vmem:[#allocation40_spill] sm:$0xff] }
 0x99c   : > { %v4300_v15 = vpop.eup %4299 }
 0x99d   : > { %v2945_v44 = vmul.f32 %v4300_v15, %v6962_v18  ;;  %v4302_v5 = vpop.eup %4301 }
 0x99f   : > { %v2946_v39 = vmin.f32 %v2945_v44, 1.0 }
 0x9a1   : > { %v2948_v42 = vmul.f32 %v2946_v39, %v7139_v28  ;;  %v3027_v24 = vmul.f32 %v2946_v39, %v2942_v19  ;;  %v2947_v6 = vmul.f32 %v2946_v39, %v7136_v17  ;;  %v2949_v33 = vmul.f32 %v2946_v39, %v7144_v25  ;;  %v8335_v28 = vld [vmem:[#allocation36_spill] sm:$0xff]  ;;  %v8336_v25 = vld [vmem:[#allocation22_spill] sm:$0xff] }
 0x9a2   : > { %v2950_v7 = vmul.f32 %v2946_v39, %v7154_v40  ;;  %v2951_v38 = vmul.f32 %v2946_v39, %v7158_v21  ;;  %v2952_v23 = vmul.f32 %v2946_v39, %v7167_v2  ;;  %v7258_v63 = vmul.f32 %v2946_v39, %v7175_v55  ;;  %v8337_v21 = vld [vmem:[#allocation37_spill] sm:$0xff]  ;;  %v8338_v2 = vld [vmem:[#allocation23_spill] sm:$0xff] }
 0x9a3   : > { %v3028_v8 = vsub.f32 %v6962_v18, %v3027_v24  ;;  %2965 = vadd.xlane.f32.xlu0 %v2948_v42  ;;  %v7262_v4 = vadd.f32 %v2948_v42, %v6945_v48  ;;  %2963 = vadd.xlane.f32.xlu1 %v2947_v6  ;;  %v7265_v17 = vadd.f32 %v2947_v6, %v8335_v28  ;;  %v8340_v48 = vld [vmem:[#allocation10_spill] sm:$0xff]  ;;  %v3064_v42 = vmul.f32 1.442695, %v3047_v58 }
 0x9a4   : > { %v7268_v40 = vadd.f32 %v2949_v33, %v8336_v25  ;;  %v7271_v19 = vadd.f32 %v2950_v7, %v8337_v21  ;;  %v7274_v55 = vadd.f32 %v2951_v38, %v8338_v2  ;;  %v7277_v18 = vadd.f32 %v2952_v23, %v8339_v45  ;;  %v8342_v21 = vld [vmem:[#allocation39_spill] sm:$0xff]  ;;  %v4304_v2 = vpop.eup %4303 }
 0x9a5   : > { %v7279_v49 = vmax.f32 %v3028_v8, 0.0  ;;  %v3054_v15 = vmul.f32 -0.25, %v8340_v48  ;;  %v7284_v57 = vadd.f32 %v7258_v63, %v8341_v32  ;;  %v7287_v44 = vmul.f32 %v2946_v39, %v7182_v14  ;;  %v8345_v32 = vld [vmem:[#allocation25_spill] sm:$0xff] }
 0x9a6   : > { %v7290_v24 = vmul.f32 %v2946_v39, %v7191_v26  ;;  %v7293_v6 = vmul.f32 %v2946_v39, %v7195_v54  ;;  %v7299_v28 = vmul.f32 %v2946_v39, %v7204_v50  ;;  %v7302_v25 = vmul.f32 %v2946_v39, %v7211_v29  ;;  %v8344_v50 = vld [vmem:[#allocation7_spill] sm:$0xff] }
 0x9a7   : > { %2967 = vadd.xlane.f32.xlu0 %v2949_v33  ;;  %v7296_v8 = vmul.f32 %v4302_v5, %v7279_v49  ;;  %v3076_v14 = vmul.f32 1.442695, %v3053_v46  ;;  %v7305_v58 = vmul.f32 %v2946_v39, %v7229_v20  ;;  %v3068_v26 = vmul.f32 1.442695, %v3049_v56  ;;  %v8348_v56 = vld [vmem:[#allocation12_spill] sm:$0xff]  ;;  %v8349_v5 = vld [vmem:[#allocation26_spill] sm:$0xff] }
 0x9a8   : > { %v3078_v54 = vmul.f32 1.442695, %v3054_v15  ;;  %v7310_v33 = vadd.f32 %v7287_v44, %v8342_v21  ;;  %4309 = vpow2.f32 %v3064_v42  ;;  %v3051_v45 = vmul.f32 -0.25, %v8344_v50  ;;  %v8351_v42 = vld [vmem:[#allocation41_spill] sm:$0xff] }
 0x9a9   : > { %3110 = vadd.xlane.f32.xlu1 %v7296_v8  ;;  %v7315_v29 = vadd.f32 %v7290_v24, %v8345_v32  ;;  %v7319_v20 = vadd.f32 %v7293_v6, %v8346_v59  ;;  %v7322_v46 = vmul.f32 %v4304_v2, %v7279_v49  ;;  %v3055_v15 = vmul.f32 -0.25, %v8348_v56  ;;  %v8353_v32 = vld [vmem:[#allocation27_spill] sm:$0xff]  ;;  %v4306_v59 = vpop.eup %4305  ;;  %v8355_v56 = vld [vmem:[#allocation42_spill] sm:$0xff] }
 0x9aa   : > { %8343 = vst [vmem:[#allocation29_spill] sm:$0xff] %v7310_v33  ;;  %v7327_v21 = vadd.f32 %v7299_v28, %v8349_v5  ;;  %v7331_v48 = vadd.f32 %v7302_v25, %v8351_v42  ;;  %4311 = vpow2.f32 %v3076_v14  ;;  %v7335_v30 = vadd.f32 %v7305_v58, %v8353_v32  ;;  %v8357_v32 = vld [vmem:[#allocation28_spill] sm:$0xff] }
 0x9ab   : > { %8347 = vst [vmem:[#allocation44_spill] sm:$0xff] %v7319_v20  ;;  %2969 = vadd.xlane.f32.xlu0 %v2950_v7  ;;  %v7338_v7 = vmul.f32 %v2946_v39, %v7221_v61  ;;  %v7341_v2 = vmul.f32 %v2946_v39, %v7239_v34  ;;  %v7345_v5 = vmul.f32 %v2946_v39, %v7235_v16  ;;  %4313 = vpow2.f32 %v3068_v26  ;;  %v8359_v34 = vld [vmem:[#allocation43_spill] sm:$0xff] }
 0x9ac   : > { %8350 = vst [vmem:[#allocation30_spill] sm:$0xff] %v7327_v21  ;;  %8352 = vst [vmem:[#allocation45_spill] sm:$0xff] %v7331_v48  ;;  %v3072_v42 = vmul.f32 1.442695, %v3051_v45  ;;  %v7356_v61 = vmul.f32 %v4306_v59, %v7279_v49  ;;  %4315 = vpow2.f32 %v3078_v54  ;;  %v3080_v16 = vmul.f32 1.442695, %v3055_v15  ;;  %v4308_v45 = vpop.eup %4307 }
 0x9ad   : > { %8354 = vst [vmem:[#allocation31_spill] sm:$0xff] %v7335_v30  ;;  %3114 = vadd.xlane.f32.xlu1 %v7322_v46  ;;  %v7349_v14 = vadd.f32 %v7338_v7, %v8355_v56  ;;  %v7353_v12 = vadd.f32 %v7341_v2, %v8357_v32  ;;  %v7360_v50 = vadd.f32 %v7345_v5, %v8359_v34  ;;  %v8361_v39 = vld [vmem:[#allocation11_spill] sm:$0xff]  ;;  %v8362_v32 = vld [vmem:[#allocation13_spill] sm:$0xff] }
 0x9ae   : > { %v3056_v26 = vmul.f32 -0.25, %v8361_v39  ;;  %4317 = vpow2.f32 %v3072_v42  ;;  %v7365_v56 = vmul.f32 %v4308_v45, %v7279_v49  ;;  %v3057_v36 = vmul.f32 -0.25, %v8362_v32  ;;  %v8363_v45 = vld [vmem:[#allocation14_spill] sm:$0xff] }
 0x9af   : > { %8356 = vst [vmem:[#allocation46_spill] sm:$0xff] %v7349_v14  ;;  %8358 = vst [vmem:[#allocation32_spill] sm:$0xff] %v7353_v12  ;;  %2971 = vadd.xlane.f32.xlu0 %v2951_v38  ;;  %4319 = vpow2.f32 %v3080_v16  ;;  %v3058_v39 = vmul.f32 -0.25, %v8363_v45  ;;  %v3088_v45 = vmul.f32 1.442695, %v3059_v51 }
 0x9b0   : > { %8360 = vst [vmem:[#allocation47_spill] sm:$0xff] %v7360_v50  ;;  %v3082_v59 = vmul.f32 1.442695, %v3056_v26  ;;  %v3084_v42 = vmul.f32 1.442695, %v3057_v36 }
 0x9b1   : > { %3118 = vadd.xlane.f32.xlu1 %v7356_v61 }
 0x9b2   : > { %v4310_v38 = vpop.eup %4309  ;;  %4321 = vpow2.f32 %v3082_v59 }
 0x9b3   : > { %2973 = vadd.xlane.f32.xlu0 %v2952_v23  ;;  %v7370_v54 = vmul.f32 %v4310_v38, %v7279_v49  ;;  %4323 = vpow2.f32 %v3084_v42 }
 0x9b4   : > { %v4312_v15 = vpop.eup %4311 }
 0x9b5   : > { %3122 = vadd.xlane.f32.xlu1 %v7365_v56  ;;  %v7374_v34 = vmul.f32 %v4312_v15, %v7279_v49  ;;  %v4314_v23 = vpop.eup %4313  ;;  %v3086_v15 = vmul.f32 1.442695, %v3058_v39 }
 0x9b6   : > { %v7379_v16 = vmul.f32 %v4314_v23, %v7279_v49  ;;  %v4316_v26 = vpop.eup %4315 }
 0x9b7   : > { %3112 = vadd.xlane.f32.xlu0 %v7370_v54  ;;  %v7383_v38 = vmul.f32 %v4316_v26, %v7279_v49  ;;  %4325 = vpow2.f32 %v3086_v15  ;;  %v8365_v26 = vld [vmem:[#allocation17_spill] sm:$0xff]  ;;  %v3092_v15 = vmul.f32 1.442695, %v3061_v11 }
 0x9b8   : > { %v4318_v32 = vpop.eup %4317  ;;  %v3060_v60 = vmul.f32 -0.25, %v8365_v26  ;;  %4327 = vpow2.f32 %v3088_v45 }
 0x9b9   : > { %3124 = vadd.xlane.f32.xlu1 %v7374_v34  ;;  %v7388_v36 = vmul.f32 %v4318_v32, %v7279_v49  ;;  %v4320_v59 = vpop.eup %4319 }
 0x9ba   : > { %v7392_v23 = vmul.f32 %v4320_v59, %v7279_v49  ;;  %v3090_v32 = vmul.f32 1.442695, %v3060_v60 }
 0x9bb   : > { %3116 = vadd.xlane.f32.xlu0 %v7379_v16 }
 0x9bc   : > { %v4322_v39 = vpop.eup %4321  ;;  %4329 = vpow2.f32 %v3090_v32 }
 0x9bd   : > { %3126 = vadd.xlane.f32.xlu1 %v7383_v38  ;;  %v7398_v42 = vmul.f32 %v4322_v39, %v7279_v49  ;;  %v4324_v59 = vpop.eup %4323  ;;  %4331 = vpow2.f32 %v3092_v15 }
 0x9be   : > { %v7404_v51 = vmul.f32 %v4324_v59, %v7279_v49 }
 0x9bf   : > { %3120 = vadd.xlane.f32.xlu0 %v7388_v36 }
 0x9c1   : > { %3128 = vadd.xlane.f32.xlu1 %v7392_v23 }
 0x9c3   : > { %2975 = vadd.xlane.f32.xlu0 %v7258_v63  ;;  %v4326_v63 = vpop.eup %4325 }
 0x9c4   : > { %v7409_v45 = vmul.f32 %v4326_v63, %v7279_v49  ;;  %v4328_v60 = vpop.eup %4327 }
 0x9c5   : > { %3130 = vadd.xlane.f32.xlu1 %v7398_v42 }
 0x9c6   : > { %v4330_v11 = vpop.eup %4329 }
 0x9c7   : > { %2977 = vadd.xlane.f32.xlu0 %v7287_v44  ;;  %v7414_v44 = vmul.f32 %v4328_v60, %v7279_v49  ;;  %v7419_v39 = vmul.f32 %v4330_v11, %v7279_v49 }
 0x9c9   : > { %3132 = vadd.xlane.f32.xlu1 %v7404_v51 }
 0x9cb   : > { %2979 = vadd.xlane.f32.xlu0 %v7290_v24  ;;  %v4332_v24 = vpop.eup %4331 }
 0x9cc   : > { %v7424_v32 = vmul.f32 %v4332_v24, %v7279_v49 }
 0x9cd   : > { %3134 = vadd.xlane.f32.xlu1 %v7409_v45 }
 0x9cf   : > { %2981 = vadd.xlane.f32.xlu0 %v7293_v6 }
 0x9d1   : > { %3136 = vadd.xlane.f32.xlu1 %v7414_v44 }
 0x9d3   : > { %2983 = vadd.xlane.f32.xlu0 %v7299_v28 }
 0x9d5   : > { %3138 = vadd.xlane.f32.xlu1 %v7419_v39 }
 0x9d7   : > { %2985 = vadd.xlane.f32.xlu0 %v7302_v25 }
 0x9d9   : > { %3140 = vadd.xlane.f32.xlu1 %v7424_v32 }
 0x9db   : > { %2989 = vadd.xlane.f32.xlu0 %v7305_v58 }
 0x9dd   : > { %2987 = vadd.xlane.f32.xlu1 %v7338_v7 }
 0x9df   : > { %2993 = vadd.xlane.f32.xlu0 %v7341_v2 }
 0x9e1   : > { %2991 = vadd.xlane.f32.xlu1 %v7345_v5 }
 0xa30   : > { %v2966_v6 = vpop.xlane.xlu0 %2965  ;;  %v2964_v28 = vpop.xlane.xlu1 %2963 }
 0xa31   : > { %v2995_v48 = vsub.f32 %v7118_v62, %v2964_v28 }
 0xa33   : > { %v7434_v33 = vmax.f32 %v2995_v48, 0.0 }
 0xa34   : > { %v2968_v59 = vpop.xlane.xlu0 %2967 }
 0xa35   : > { %v2997_v21 = vsub.f32 %v7120_v0, %v2968_v59 }
 0xa36   : > { %v3111_v15 = vpop.xlane.xlu1 %3110 }
 0xa37   : > { %v3142_v24 = vadd.f32 1e-09, %v3111_v15  ;;  %v2996_v15 = vsub.f32 %v7123_v35, %v2966_v6 }
 0xa38   : > { %v2970_v63 = vpop.xlane.xlu0 %2969 }
 0xa39   : > { %4333 = vrcp.f32 %v3142_v24  ;;  %v2998_v0 = vsub.f32 %v7132_v37, %v2970_v63 }
 0xa3a   : > { %v3115_v60 = vpop.xlane.xlu1 %3114 }
 0xa3b   : > { %v3144_v52 = vadd.f32 1e-09, %v3115_v60 }
 0xa3c   : > { %v2972_v25 = vpop.xlane.xlu0 %2971 }
 0xa3d   : > { %4335 = vrcp.f32 %v3144_v52  ;;  %v2999_v62 = vsub.f32 %v7130_v47, %v2972_v25 }
 0xa3e   : > { %v3119_v11 = vpop.xlane.xlu1 %3118 }
 0xa3f   : > { %v3146_v58 = vadd.f32 1e-09, %v3119_v11  ;;  %v7446_v47 = vmax.f32 %v2999_v62, 0.0 }
 0xa40   : > { %v2974_v26 = vpop.xlane.xlu0 %2973 }
 0xa41   : > { %v3000_v37 = vsub.f32 %v7151_v13, %v2974_v26 }
 0xa42   : > { %v3123_v12 = vpop.xlane.xlu1 %3122 }
 0xa43   : > { %v3148_v14 = vadd.f32 1e-09, %v3123_v12  ;;  %v4334_v24 = vpop.eup %4333  ;;  %v7439_v12 = vmax.f32 %v2996_v15, 0.0  ;;  %v7467_v26 = vmax.f32 %v3000_v37, 0.0 }
 0xa44   : > { %v3113_v7 = vpop.xlane.xlu0 %3112  ;;  %v3174_v35 = vmul.f32 %v4334_v24, %v7434_v33 }
 0xa45   : > { %v3143_v30 = vadd.f32 1e-09, %v3113_v7  ;;  %v7436_v7 = vmax.f32 %v2997_v21, 0.0 }
 0xa46   : > { %v3125_v2 = vpop.xlane.xlu1 %3124  ;;  %v7452_v15 = vmul.f32 %v3174_v35, %v7296_v8 }
 0xa47   : > { %4337 = vrcp.f32 %v3143_v30  ;;  %v4336_v11 = vpop.eup %4335  ;;  %v3149_v30 = vadd.f32 1e-09, %v3125_v2 }
 0xa48   : > { %4339 = vrcp.f32 %v3146_v58  ;;  %v3117_v5 = vpop.xlane.xlu0 %3116  ;;  %v3176_v28 = vmul.f32 %v4336_v11, %v7436_v7 }
 0xa49   : > { %v3145_v50 = vadd.f32 1e-09, %v3117_v5  ;;  %v7448_v5 = vmax.f32 %v2998_v0, 0.0 }
 0xa4a   : > { %v3127_v20 = vpop.xlane.xlu1 %3126 }
 0xa4b   : > { %4341 = vrcp.f32 %v3145_v50 }
 0xa4c   : > { %v3121_v60 = vpop.xlane.xlu0 %3120  ;;  %4343 = vrcp.f32 %v3148_v14  ;;  %v3150_v14 = vadd.f32 1e-09, %v3127_v20 }
 0xa4d   : > { %v3147_v52 = vadd.f32 1e-09, %v3121_v60 }
 0xa4e   : > { %v3129_v58 = vpop.xlane.xlu1 %3128 }
 0xa4f   : > { %4345 = vrcp.f32 %v3147_v52  ;;  %v3151_v25 = vadd.f32 1e-09, %v3129_v58  ;;  %v7460_v52 = vmul.f32 %v3176_v28, %v7322_v46 }
 0xa50   : > { %v2976_v50 = vpop.xlane.xlu0 %2975  ;;  %4347 = vrcp.f32 %v3149_v30 }
 0xa51   : > { %v4338_v6 = vpop.eup %4337  ;;  %v3001_v59 = vsub.f32 %v7147_v53, %v2976_v50  ;;  %4349 = vrcp.f32 %v3150_v14 }
 0xa52   : > { %v4340_v48 = vpop.eup %4339  ;;  %v3131_v21 = vpop.xlane.xlu1 %3130  ;;  %v3175_v2 = vmul.f32 %v4338_v6, %v7439_v12  ;;  %4351 = vrcp.f32 %v3151_v25 }
 0xa53   : > { %v3178_v53 = vmul.f32 %v4340_v48, %v7446_v47  ;;  %v7463_v30 = vmax.f32 %v3001_v59, 0.0  ;;  %v3152_v58 = vadd.f32 1e-09, %v3131_v21 }
 0xa54   : > { %v2978_v63 = vpop.xlane.xlu0 %2977  ;;  %v7455_v60 = vmul.f32 %v3175_v2, %v7370_v54 }
 0xa55   : > { %v4342_v20 = vpop.eup %4341  ;;  %v3002_v24 = vsub.f32 %v7160_v1, %v2978_v63  ;;  %v7474_v50 = vmul.f32 %v3178_v53, %v7356_v61  ;;  %4353 = vrcp.f32 %v3152_v58 }
 0xa56   : > { %v3177_v11 = vmul.f32 %v4342_v20, %v7448_v5  ;;  %v3133_v13 = vpop.xlane.xlu1 %3132  ;;  %v3206_v8 = vadd.f32 %v7455_v60, %v7452_v15  ;;  %v4344_v54 = vpop.eup %4343 }
 0xa57   : > { %v7476_v35 = vmax.f32 %v3002_v24, 0.0  ;;  %v3180_v48 = vmul.f32 %v4344_v54, %v7463_v30  ;;  %v3153_v14 = vadd.f32 1e-09, %v3133_v13 }
 0xa58   : > { %v2980_v62 = vpop.xlane.xlu0 %2979  ;;  %v7470_v1 = vmul.f32 %v3177_v11, %v7379_v16  ;;  %v3207_v46 = vadd.f32 %v3206_v8, %v7460_v52 }
 0xa59   : > { %v4346_v0 = vpop.eup %4345  ;;  %v3003_v6 = vsub.f32 %v7171_v31, %v2980_v62  ;;  %v7491_v20 = vmul.f32 %v3180_v48, %v7365_v56  ;;  %4355 = vrcp.f32 %v3153_v14 }
 0xa5a   : > { %v3179_v28 = vmul.f32 %v4346_v0, %v7467_v26  ;;  %v3135_v59 = vpop.xlane.xlu1 %3134  ;;  %v3208_v21 = vadd.f32 %v3207_v46, %v7470_v1  ;;  %v4348_v16 = vpop.eup %4347 }
 0xa5b   : > { %v3181_v37 = vmul.f32 %v4348_v16, %v7476_v35  ;;  %v7487_v63 = vmax.f32 %v3003_v6, 0.0  ;;  %v4350_v13 = vpop.eup %4349  ;;  %v3154_v8 = vadd.f32 1e-09, %v3135_v59 }
 0xa5c   : > { %v7483_v2 = vmul.f32 %v3179_v28, %v7388_v36  ;;  %v2982_v25 = vpop.xlane.xlu0 %2981  ;;  %v3209_v61 = vadd.f32 %v3208_v21, %v7474_v50  ;;  %v4352_v62 = vpop.eup %4351 }
 0xa5d   : > { %v3004_v31 = vsub.f32 %v7178_v22, %v2982_v25  ;;  %v7498_v46 = vmul.f32 %v3181_v37, %v7374_v34  ;;  %v3182_v22 = vmul.f32 %v4350_v13, %v7487_v63 }
 0xa5e   : > { %v3137_v53 = vpop.xlane.xlu1 %3136  ;;  %v3210_v24 = vadd.f32 %v3209_v61, %v7483_v2 }
 0xa5f   : > { %v7494_v11 = vmax.f32 %v3004_v31, 0.0  ;;  %v3155_v36 = vadd.f32 1e-09, %v3137_v53  ;;  %v7507_v21 = vmul.f32 %v3182_v22, %v7383_v38  ;;  %v4354_v16 = vpop.eup %4353 }
 0xa60   : > { %v2984_v54 = vpop.xlane.xlu0 %2983  ;;  %v3211_v58 = vadd.f32 %v3210_v24, %v7491_v20 }
 0xa61   : > { %v3005_v56 = vsub.f32 %v7187_v27, %v2984_v54  ;;  %v3183_v0 = vmul.f32 %v4352_v62, %v7494_v11  ;;  %4357 = vrcp.f32 %v3155_v36 }
 0xa62   : > { %v3139_v6 = vpop.xlane.xlu1 %3138  ;;  %v3212_v48 = vadd.f32 %v3211_v58, %v7498_v46  ;;  %4359 = vrcp.f32 %v3154_v8 }
 0xa63   : > { %v7503_v28 = vmax.f32 %v3005_v56, 0.0  ;;  %v3156_v14 = vadd.f32 1e-09, %v3139_v6  ;;  %v7511_v25 = vmul.f32 %v3183_v0, %v7392_v23  ;;  %v4356_v24 = vpop.eup %4355 }
 0xa64   : > { %v2986_v59 = vpop.xlane.xlu0 %2985  ;;  %v3213_v53 = vadd.f32 %v3212_v48, %v7507_v21 }
 0xa65   : > { %v3006_v34 = vsub.f32 %v7198_v10, %v2986_v59  ;;  %v3184_v61 = vmul.f32 %v4354_v16, %v7503_v28  ;;  %4361 = vrcp.f32 %v3156_v14 }
 0xa66   : > { %v3141_v27 = vpop.xlane.xlu1 %3140  ;;  %v3214_v58 = vadd.f32 %v3213_v53, %v7511_v25 }
 0xa67   : > { %v7514_v37 = vmax.f32 %v3006_v34, 0.0  ;;  %v3157_v31 = vadd.f32 1e-09, %v3141_v27  ;;  %v3200_v23 = vmul.f32 %v3184_v61, %v7398_v42 }
 0xa68   : > { %v2990_v36 = vpop.xlane.xlu0 %2989 }
 0xa69   : > { %v3185_v38 = vmul.f32 %v4356_v24, %v7514_v37  ;;  %4363 = vrcp.f32 %v3157_v31  ;;  %v3008_v10 = vsub.f32 %v7206_v41, %v2990_v36  ;;  %v3215_v34 = vadd.f32 %v3214_v58, %v3200_v23 }
 0xa6a   : > { %v2988_v13 = vpop.xlane.xlu1 %2987 }
 0xa6b   : > { %v7520_v8 = vmax.f32 %v3008_v10, 0.0  ;;  %v3007_v54 = vsub.f32 %v7213_v9, %v2988_v13  ;;  %v4358_v62 = vpop.eup %4357  ;;  %v3201_v56 = vmul.f32 %v3185_v38, %v7404_v51 }
 0xa6c   : > { %v2994_v22 = vpop.xlane.xlu0 %2993  ;;  %v4360_v6 = vpop.eup %4359 }
 0xa6d   : > { %v7525_v0 = vmax.f32 %v3007_v54, 0.0  ;;  %v3010_v48 = vsub.f32 %v7226_v43, %v2994_v22  ;;  %v3187_v41 = vmul.f32 %v4358_v62, %v7520_v8  ;;  %v3216_v27 = vadd.f32 %v3215_v34, %v3201_v56 }
 0xa6e   : > { %v2992_v14 = vpop.xlane.xlu1 %2991 }
 0xa6f   : > { %v3186_v42 = vmul.f32 %v4360_v6, %v7525_v0  ;;  %v3009_v59 = vsub.f32 %v7223_v3, %v2992_v14  ;;  %v4362_v61 = vpop.eup %4361  ;;  %v7534_v51 = vmax.f32 %v3010_v48, 0.0  ;;  %v3203_v53 = vmul.f32 %v3187_v41, %v7414_v44 }
 0xa71   : > { %v3202_v9 = vmul.f32 %v3186_v42, %v7409_v45  ;;  %v7532_v16 = vmax.f32 %v3009_v59, 0.0 }
 0xa73   : > { %v4364_v31 = vpop.eup %4363  ;;  %v3188_v43 = vmul.f32 %v4362_v61, %v7532_v16  ;;  %v3217_v24 = vadd.f32 %v3216_v27, %v3202_v9 }
 0xa74   : > { %v3189_v36 = vmul.f32 %v4364_v31, %v7534_v51 }
 0xa75   : > { %v3204_v38 = vmul.f32 %v3188_v43, %v7419_v39  ;;  %v3218_v3 = vadd.f32 %v3217_v24, %v3203_v53 }
 0xa76   : > { %v3205_v10 = vmul.f32 %v3189_v36, %v7424_v32 }
 0xa77   : > { %v3219_v45 = vadd.f32 %v3218_v3, %v3204_v38 }
 0xa79   : > { %v3220_v13 = vadd.f32 %v3219_v45, %v3205_v10 }
 0xa7b   : > { %v3221_v54 = vrot.slane %v3220_v13, 4 }
 0xa7d   : > { %v3222_v58 = vadd.f32 %v3221_v54, %v3220_v13  ;;  %v8368_v13 = vld [vmem:[#allocation30_spill] sm:$0xff] }
 0xa7f   : > { %v3223_v62 = vrot.slane %v3222_v58, 2 }
 0xa81   : > { %v3224_v22 = vadd.f32 %v3223_v62, %v3222_v58 }
 0xa83   : > { %v3225_v6 = vrot.slane %v3224_v22, 1 }
 0xa85   : > { %v3226_v48 = vadd.f32 %v3225_v6, %v3224_v22  ;;  %v8376_v22 = vld [vmem:[#allocation31_spill] sm:$0xff] }
 0xa87   : > { %v3227_v14 = vadd.f32 1e-09, %v3226_v48 }
 0xa89   : > { %4365 = vrcp.f32 %v3227_v14 }
 0xa93   : > { %v4366_v44 = vpop.eup %4365 }
 0xa94   : > { %v3229_v41 = vmul.f32 %v4366_v44, %v7279_v49 }
 0xa96   : > { %v3230_v42 = vmin.f32 %v3229_v41, 1.0 }
 0xa98   : > { %v3231_v59 = vmul.f32 %v3230_v42, %v7452_v15  ;;  %v3311_v39 = vmul.f32 %v3230_v42, %v3226_v48  ;;  %v3233_v34 = vmul.f32 %v3230_v42, %v7460_v52  ;;  %v3232_v32 = vmul.f32 %v3230_v42, %v7455_v60  ;;  %v8377_v48 = vld [vmem:[#allocation32_spill] sm:$0xff] }
 0xa99   : > { %v3235_v27 = vmul.f32 %v3230_v42, %v7474_v50  ;;  %v3234_v61 = vmul.f32 %v3230_v42, %v7470_v1  ;;  %v3237_v31 = vmul.f32 %v3230_v42, %v7491_v20  ;;  %v3236_v43 = vmul.f32 %v3230_v42, %v7483_v2 }
 0xa9a   : > { %v3312_v24 = vsub.f32 %v7279_v49, %v3311_v39  ;;  %3247 = vadd.xlane.f32.xlu0 %v3231_v59  ;;  %v7551_v36 = vadd.f32 %v3231_v59, %v7265_v17  ;;  %v7554_v15 = vadd.f32 %v3233_v34, %v7268_v40  ;;  %v7557_v52 = vadd.f32 %v3232_v32, %v7262_v4 }
 0xa9b   : > { %v7560_v60 = vadd.f32 %v3235_v27, %v7274_v55  ;;  %v7563_v1 = vadd.f32 %v3234_v61, %v7271_v19  ;;  %v7566_v50 = vadd.f32 %v3237_v31, %v7284_v57  ;;  %v7569_v49 = vadd.f32 %v3236_v43, %v7277_v18  ;;  %v8367_v18 = vld [vmem:[#allocation29_spill] sm:$0xff] }
 0xa9c   : > { %v7571_v17 = vmax.f32 %v3312_v24, 0.0  ;;  %v3239_v40 = vmul.f32 %v3230_v42, %v7507_v21  ;;  %v3238_v2 = vmul.f32 %v3230_v42, %v7498_v46  ;;  %v3241_v4 = vmul.f32 %v3230_v42, %v3200_v23  ;;  %v8370_v21 = vld [vmem:[#allocation44_spill] sm:$0xff]  ;;  %v8372_v23 = vld [vmem:[#allocation46_spill] sm:$0xff] }
 0xa9d   : > { %v3240_v20 = vmul.f32 %v3230_v42, %v7511_v25  ;;  %v3243_v55 = vmul.f32 %v3230_v42, %v3202_v9  ;;  %v3242_v3 = vmul.f32 %v3230_v42, %v3201_v56  ;;  %v3245_v45 = vmul.f32 %v3230_v42, %v3204_v38  ;;  %v8373_v56 = vld [vmem:[#allocation45_spill] sm:$0xff]  ;;  %v8375_v38 = vld [vmem:[#allocation47_spill] sm:$0xff] }
 0xa9e   : > { %3330 = vadd.xlane.f32.xlu1 %v7571_v17  ;;  %3251 = vadd.xlane.f32.xlu0 %v3233_v34  ;;  %v7578_v19 = vadd.f32 %v3239_v40, %v7315_v29  ;;  %v7581_v57 = vadd.f32 %v3238_v2, %v8367_v18  ;;  %v7584_v54 = vadd.f32 %v3241_v4, %v8368_v13 }
 0xa9f   : > { %v7587_v46 = vadd.f32 %v3240_v20, %v8370_v21  ;;  %v7590_v25 = vadd.f32 %v3243_v55, %v8372_v23  ;;  %v7593_v9 = vadd.f32 %v3242_v3, %v8373_v56  ;;  %v7596_v58 = vadd.f32 %v3245_v45, %v8375_v38 }
 0xaa0   : > { %8369 = vst [vmem:[#allocation33_spill] sm:$0xff] %v7584_v54  ;;  %v3244_v29 = vmul.f32 %v3230_v42, %v3203_v53  ;;  %v3246_v62 = vmul.f32 %v3230_v42, %v3205_v10 }
 0xaa1   : > { %8371 = vst [vmem:[#allocation48_spill] sm:$0xff] %v7587_v46  ;;  %8374 = vst [vmem:[#allocation34_spill] sm:$0xff] %v7593_v9 }
 0xaa2   : > { %3249 = vadd.xlane.f32.xlu1 %v3232_v32  ;;  %3255 = vadd.xlane.f32.xlu0 %v3235_v27  ;;  %v7599_v6 = vadd.f32 %v3244_v29, %v8376_v22  ;;  %v7602_v14 = vadd.f32 %v3246_v62, %v8377_v48 }
 0xaa6   : > { %3253 = vadd.xlane.f32.xlu1 %v3234_v61  ;;  %3259 = vadd.xlane.f32.xlu0 %v3237_v31 }
 0xaaa   : > { %3257 = vadd.xlane.f32.xlu1 %v3236_v43  ;;  %3263 = vadd.xlane.f32.xlu0 %v3239_v40 }
 0xaae   : > { %3261 = vadd.xlane.f32.xlu1 %v3238_v2  ;;  %3267 = vadd.xlane.f32.xlu0 %v3241_v4 }
 0xab2   : > { %3265 = vadd.xlane.f32.xlu1 %v3240_v20  ;;  %3271 = vadd.xlane.f32.xlu0 %v3243_v55 }
 0xab6   : > { %3269 = vadd.xlane.f32.xlu1 %v3242_v3  ;;  %3275 = vadd.xlane.f32.xlu0 %v3245_v45 }
 0xaba   : > { %3273 = vadd.xlane.f32.xlu1 %v3244_v29 }
 0xabe   : > { %3277 = vadd.xlane.f32.xlu1 %v3246_v62 }
 0xb27   : > { %v3248_v53 = vpop.xlane.xlu0 %3247 }
 0xb28   : > { %v3279_v39 = vsub.f32 %v7434_v33, %v3248_v53 }
 0xb2a   : > { %v3295_v24 = vmax.f32 %v3279_v39, 0.0 }
 0xb2b   : > { %v3331_v10 = vpop.xlane.xlu1 %3330  ;;  %v3252_v44 = vpop.xlane.xlu0 %3251 }
 0xb2c   : > { %v3332_v41 = vadd.f32 1e-09, %v3331_v10  ;;  %v3281_v34 = vsub.f32 %v7436_v7, %v3252_v44 }
 0xb2e   : > { %4367 = vrcp.f32 %v3332_v41  ;;  %v3297_v40 = vmax.f32 %v3281_v34, 0.0 }
 0xb2f   : > { %v3250_v42 = vpop.xlane.xlu1 %3249  ;;  %v3256_v59 = vpop.xlane.xlu0 %3255 }
 0xb30   : > { %v3280_v32 = vsub.f32 %v7439_v12, %v3250_v42  ;;  %v3283_v43 = vsub.f32 %v7446_v47, %v3256_v59 }
 0xb32   : > { %v3296_v2 = vmax.f32 %v3280_v32, 0.0  ;;  %v3299_v18 = vmax.f32 %v3283_v43, 0.0 }
 0xb33   : > { %v3254_v27 = vpop.xlane.xlu1 %3253  ;;  %v3260_v61 = vpop.xlane.xlu0 %3259 }
 0xb34   : > { %v3282_v31 = vsub.f32 %v7448_v5, %v3254_v27  ;;  %v3285_v33 = vsub.f32 %v7463_v30, %v3260_v61 }
 0xb36   : > { %v3298_v4 = vmax.f32 %v3282_v31, 0.0  ;;  %v3301_v38 = vmax.f32 %v3285_v33, 0.0 }
 0xb37   : > { %v3258_v20 = vpop.xlane.xlu1 %3257  ;;  %v3264_v55 = vpop.xlane.xlu0 %3263 }
 0xb38   : > { %v7609_v3 = vpop.eup %4367  ;;  %v3284_v7 = vsub.f32 %v7467_v26, %v3258_v20  ;;  %v3287_v26 = vsub.f32 %v7487_v63, %v3264_v55 }
 0xb39   : > { %v3336_v12 = vmul.f32 %v7609_v3, %v3297_v40  ;;  %v3334_v45 = vmul.f32 %v7609_v3, %v3295_v24  ;;  %v3335_v5 = vmul.f32 %v7609_v3, %v3296_v2  ;;  %v3337_v21 = vmul.f32 %v7609_v3, %v3298_v4 }
 0xb3a   : > { %v3300_v23 = vmax.f32 %v3284_v7, 0.0  ;;  %v3338_v22 = vmul.f32 %v7609_v3, %v3299_v18  ;;  %v3303_v63 = vmax.f32 %v3287_v26, 0.0 }
 0xb3b   : > { %v7617_v47 = vmul.f32 %v3334_v45, %v7571_v17  ;;  %v7620_v13 = vmul.f32 %v3335_v5, %v7571_v17  ;;  %v3262_v56 = vpop.xlane.xlu1 %3261  ;;  %v3268_v30 = vpop.xlane.xlu0 %3267  ;;  %v7625_v29 = vmul.f32 %v3336_v12, %v7571_v17  ;;  %v7632_v53 = vmul.f32 %v3337_v21, %v7571_v17 }
 0xb3c   : > { %v3286_v48 = vsub.f32 %v7476_v35, %v3262_v56  ;;  %v3339_v44 = vmul.f32 %v7609_v3, %v3300_v23  ;;  %v7638_v34 = vmul.f32 %v3338_v22, %v7571_v17  ;;  %v3340_v35 = vmul.f32 %v7609_v3, %v3301_v38 }
 0xb3d   : > { %v3366_v62 = vadd.f32 %v7620_v13, %v7617_v47  ;;  %v3289_v27 = vsub.f32 %v7503_v28, %v3268_v30 }
 0xb3e   : > { %v3302_v41 = vmax.f32 %v3286_v48, 0.0  ;;  %v7644_v61 = vmul.f32 %v3339_v44, %v7571_v17  ;;  %v7651_v4 = vmul.f32 %v3340_v35, %v7571_v17 }
 0xb3f   : > { %v3367_v10 = vadd.f32 %v3366_v62, %v7625_v29  ;;  %v3266_v42 = vpop.xlane.xlu1 %3265  ;;  %v3272_v39 = vpop.xlane.xlu0 %3271  ;;  %v3305_v55 = vmax.f32 %v3289_v27, 0.0 }
 0xb40   : > { %v3288_v59 = vsub.f32 %v7494_v11, %v3266_v42  ;;  %v3341_v43 = vmul.f32 %v7609_v3, %v3302_v41  ;;  %v3342_v11 = vmul.f32 %v7609_v3, %v3303_v63  ;;  %v3291_v28 = vsub.f32 %v7525_v0, %v3272_v39 }
 0xb41   : > { %v3368_v32 = vadd.f32 %v3367_v10, %v7632_v53  ;;  %v3344_v56 = vmul.f32 %v7609_v3, %v3305_v55 }
 0xb42   : > { %v3304_v24 = vmax.f32 %v3288_v59, 0.0  ;;  %v7656_v7 = vmul.f32 %v3341_v43, %v7571_v17  ;;  %v3307_v0 = vmax.f32 %v3291_v28, 0.0 }
 0xb43   : > { %v3369_v31 = vadd.f32 %v3368_v32, %v7638_v34  ;;  %v3270_v40 = vpop.xlane.xlu1 %3269  ;;  %v3276_v33 = vpop.xlane.xlu0 %3275 }
 0xb44   : > { %v3290_v2 = vsub.f32 %v7514_v37, %v3270_v40  ;;  %v3343_v45 = vmul.f32 %v7609_v3, %v3304_v24  ;;  %v7661_v37 = vmul.f32 %v3342_v11, %v7571_v17  ;;  %v3293_v30 = vsub.f32 %v7532_v16, %v3276_v33 }
 0xb45   : > { %v3370_v20 = vadd.f32 %v3369_v31, %v7644_v61  ;;  %v3346_v41 = vmul.f32 %v7609_v3, %v3307_v0  ;;  %v8381_v0 = vld [vmem:[#allocation3_spill] sm:$0xff] }
 0xb46   : > { %v3306_v5 = vmax.f32 %v3290_v2, 0.0  ;;  %v7668_v38 = vmul.f32 %v3343_v45, %v7571_v17  ;;  %v3309_v42 = vmax.f32 %v3293_v30, 0.0  ;;  %v7713_v30 = vmax.f32 %v8381_v0, 0.0  ;;  %v8393_v0 = vld [vmem:[#allocation13_spill] sm:$0xff] }
 0xb47   : > { %v3371_v12 = vadd.f32 %v3370_v20, %v7651_v4  ;;  %v3274_v18 = vpop.xlane.xlu1 %3273  ;;  %v7684_v32 = vmul.f32 %v3346_v41, %v7571_v17  ;;  %v8384_v41 = vld [vmem:[#allocation17_spill] sm:$0xff] }
 0xb48   : > { %v3292_v21 = vsub.f32 %v7520_v8, %v3274_v18  ;;  %v3345_v62 = vmul.f32 %v7609_v3, %v3306_v5  ;;  %v7674_v8 = vmul.f32 %v3344_v56, %v7571_v17  ;;  %v3348_v35 = vmul.f32 %v7609_v3, %v3309_v42  ;;  %v8379_v5 = vld [vmem:[#allocation4_spill] sm:$0xff] }
 0xb49   : > { %v3372_v23 = vadd.f32 %v3371_v12, %v7656_v7  ;;  %v8378_v12 = vld [vmem:[#allocation2_spill] sm:$0xff]  ;;  %v7724_v42 = vmax.f32 %v8384_v41, 0.0  ;;  %vm3462_vm6 = vcmp.eq.f32.partialorder %v7713_v30, inf }
 0xb4a   : > { %v3308_v22 = vmax.f32 %v3292_v21, 0.0  ;;  %v7679_v16 = vmul.f32 %v3345_v62, %v7571_v17  ;;  %v7694_v24 = vmul.f32 %v3348_v35, %v7571_v17  ;;  %v7703_v45 = vmax.f32 %v8378_v12, 0.0  ;;  %v8382_v62 = vld [vmem:[#allocation14_spill] sm:$0xff]  ;;  %v8387_v35 = vld [vmem:[#allocation7_spill] sm:$0xff] }
 0xb4b   : > { %v3373_v26 = vadd.f32 %v3372_v23, %v7661_v37  ;;  %v3278_v48 = vpop.xlane.xlu1 %3277  ;;  %v8380_v23 = vld [vmem:[#allocation6_spill] sm:$0xff]  ;;  %vm3539_vm10 = vcmp.eq.f32.partialorder %v7724_v42, inf  ;;  %vm3541_vm14 = vcmp.eq.f32.partialorder %v7724_v42, 0.0 }
 0xb4c   : > { %v3294_v10 = vsub.f32 %v7534_v51, %v3278_v48  ;;  %v3347_v59 = vmul.f32 %v7609_v3, %v3308_v22  ;;  %v7709_v56 = vmax.f32 %v8380_v23, 0.0  ;;  %4369 = vrsqrt.f32 %v7703_v45 }
 0xb4d   : > { %v3374_v44 = vadd.f32 %v3373_v26, %v7668_v38  ;;  %v7717_v22 = vmax.f32 %v8382_v62, 0.0  ;;  %vm3441_vm0 = vcmp.eq.f32.partialorder %v7703_v45, inf  ;;  %vm3443_vm1 = vcmp.eq.f32.partialorder %v7703_v45, 0.0 }
 0xb4e   : > { %v3310_v39 = vmax.f32 %v3294_v10, 0.0  ;;  %v7689_v27 = vmul.f32 %v3347_v59, %v7571_v17  ;;  %v8383_v10 = vld [vmem:[#allocation15_spill] sm:$0xff]  ;;  %vm3455_vm4 = vcmp.eq.f32.partialorder %v7709_v56, inf  ;;  %vm3457_vm5 = vcmp.eq.f32.partialorder %v7709_v56, 0.0 }
 0xb4f   : > { %v3375_v63 = vadd.f32 %v3374_v44, %v7674_v8  ;;  %v7720_v44 = vmax.f32 %v8383_v10, 0.0  ;;  %v3444_v10 = vand.u32 2147483648, %v7703_v45  ;;  %vm3525_vm7 = vcmp.eq.f32.partialorder %v7717_v22, inf }
 0xb50   : > { %v3349_v43 = vmul.f32 %v7609_v3, %v3310_v39  ;;  %v7706_v3 = vmax.f32 %v8379_v5, 0.0  ;;  %v8386_v39 = vld [vmem:[#allocation5_spill] sm:$0xff]  ;;  %v8391_v5 = vld [vmem:[#allocation12_spill] sm:$0xff]  ;;  %vm3527_vm12 = vcmp.eq.f32.partialorder %v7717_v22, 0.0 }
 0xb51   : > { %v3376_v51 = vadd.f32 %v3375_v63, %v7679_v16  ;;  %v8385_v63 = vld [vmem:[#allocation16_spill] sm:$0xff]  ;;  %vm3532_vm8 = vcmp.eq.f32.partialorder %v7720_v44, inf  ;;  %vm3534_vm13 = vcmp.eq.f32.partialorder %v7720_v44, 0.0 }
 0xb52   : > { %v7698_v11 = vmul.f32 %v3349_v43, %v7571_v17  ;;  %4371 = vrsqrt.f32 %v7706_v3  ;;  %v7728_v59 = vmax.f32 %v8385_v63, 0.0  ;;  %vm3448_vm2 = vcmp.eq.f32.partialorder %v7706_v3, inf }
 0xb53   : > { %v3377_v31 = vadd.f32 %v3376_v51, %v7684_v32  ;;  %4373 = vrsqrt.f32 %v7709_v56  ;;  %v7732_v51 = vmax.f32 %v8386_v39, 0.0  ;;  %vm3450_vm3 = vcmp.eq.f32.partialorder %v7706_v3, 0.0 }
 0xb54   : > { %4375 = vrsqrt.f32 %v7713_v30  ;;  %v3451_v39 = vand.u32 2147483648, %v7706_v3  ;;  %vm3546_vm9 = vcmp.eq.f32.partialorder %v7728_v59, inf  ;;  %vm3548_vm15 = vcmp.eq.f32.partialorder %v7728_v59, 0.0 }
 0xb55   : > { %v3378_v40 = vadd.f32 %v3377_v31, %v7689_v27  ;;  %v7736_v31 = vmax.f32 %v8387_v35, 0.0  ;;  %v3458_v35 = vand.u32 2147483648, %v7709_v56  ;;  %vm3469_vm11 = vcmp.eq.f32.partialorder %v7732_v51, inf }
 0xb56   : > { %v4370_v43 = vpop.eup %4369 }
 0xb57   : > { %v3379_v2 = vadd.f32 %v3378_v40, %v7694_v24  ;;  %v3440_v62 = vmul.f32 %v4370_v43, %v7703_v45 }
 0xb59   : > { %v3380_v20 = vadd.f32 %v3379_v2, %v7698_v11  ;;  %v8388_v2 = vld [vmem:[#allocation8_spill] sm:$0xff] }
 0xb5b   : > { %v3381_v55 = vrot.slane %v3380_v20, 4 }
 0xb5c   : > { %v4372_v40 = vpop.eup %4371 }
 0xb5d   : > { %v3382_v28 = vadd.f32 %v3381_v55, %v3380_v20  ;;  %v7741_v20 = vmax.f32 %v8388_v2, 0.0  ;;  %v8389_v55 = vld [vmem:[#allocation9_spill] sm:$0xff]  ;;  %v3447_v41 = vmul.f32 %v4372_v40, %v7706_v3 }
 0xb5f   : > { %v3383_v33 = vrot.slane %v3382_v28, 2 }
 0xb61   : > { %v3384_v18 = vadd.f32 %v3383_v33, %v3382_v28  ;;  %v7744_v28 = vmax.f32 %v8389_v55, 0.0  ;;  %v8390_v33 = vld [vmem:[#allocation10_spill] sm:$0xff] }
 0xb62   : > { %v7747_v12 = vmax.f32 %v8390_v33, 0.0  ;;  %v3449_v33 = vsel %vm3448_vm2, %v7706_v3, %v3447_v41  ;;  %vm3471_vm2 = vcmp.eq.f32.partialorder %v7732_v51, 0.0 }
 0xb63   : > { %v3385_v21 = vrot.slane %v3384_v18, 1 }
 0xb65   : > { %v3386_v26 = vadd.f32 %v3385_v21, %v3384_v18  ;;  %v7750_v18 = vmax.f32 %v8391_v5, 0.0  ;;  %v8392_v21 = vld [vmem:[#allocation11_spill] sm:$0xff] }
 0xb66   : > { %v7753_v23 = vmax.f32 %v8392_v21, 0.0 }
 0xb67   : > { %v3387_v48 = vadd.f32 1e-09, %v3386_v26  ;;  %v7757_v26 = vmax.f32 %v8393_v0, 0.0  ;;  %v3442_v0 = vsel %vm3441_vm0, %v7703_v45, %v3440_v62  ;;  %vm3464_vm0 = vcmp.eq.f32.partialorder %v7713_v30, 0.0 }
 0xb68   : > { %v3445_v54 = vsel %vm3443_vm1, %v3444_v10, %v3442_v0  ;;  %vm3476_vm1 = vcmp.eq.f32.partialorder %v7736_v31, inf }
 0xb69   : > { %4377 = vrcp.f32 %v3387_v48  ;;  %v4374_v48 = vpop.eup %4373 }
 0xb6a   : > { %4379 = vrsqrt.f32 %v7717_v22  ;;  %v4376_v63 = vpop.eup %4375  ;;  %v3454_v40 = vmul.f32 %v4374_v48, %v7709_v56  ;;  %v3542_v48 = vand.u32 2147483648, %v7724_v42 }
 0xb6b   : > { %4381 = vrsqrt.f32 %v7720_v44 }
 0xb6c   : > { %4383 = vrsqrt.f32 %v7724_v42  ;;  %v3456_v10 = vsel %vm3455_vm4, %v7709_v56, %v3454_v40  ;;  %vm3478_vm4 = vcmp.eq.f32.partialorder %v7736_v31, 0.0 }
 0xb6d   : > { %4385 = vrsqrt.f32 %v7728_v59 }
 0xb6e   : > { %4387 = vrsqrt.f32 %v7732_v51 }
 0xb6f   : > { %4389 = vrsqrt.f32 %v7736_v31 }
 0xb70   : > { %4391 = vrsqrt.f32 %v7741_v20 }
 0xb71   : > { %4393 = vrsqrt.f32 %v7744_v28 }
 0xb72   : > { %4395 = vrsqrt.f32 %v7747_v12 }
 0xb73   : > { %v4378_v43 = vpop.eup %4377  ;;  %4397 = vrsqrt.f32 %v7750_v18 }
 0xb74   : > { %v4380_v5 = vpop.eup %4379  ;;  %v3389_v21 = vmul.f32 %v4378_v43, %v7571_v17  ;;  %v3452_v17 = vsel %vm3450_vm3, %v3451_v39, %v3449_v33  ;;  %4399 = vrsqrt.f32 %v7753_v23  ;;  %vm3483_vm3 = vcmp.eq.f32.partialorder %v7741_v20, inf }
 0xb75   : > { %v4382_v55 = vpop.eup %4381  ;;  %4401 = vrsqrt.f32 %v7757_v26 }
 0xb76   : > { %v4384_v62 = vpop.eup %4383  ;;  %v7789_v43 = vmin.f32 %v3389_v21, 1.0  ;;  %v3531_v39 = vmul.f32 %v4382_v55, %v7720_v44 }
 0xb77   : > { %v4386_v9 = vpop.eup %4385  ;;  %v3538_v33 = vmul.f32 %v4384_v62, %v7724_v42 }
 0xb78   : > { %v3391_v41 = vmul.f32 %v7789_v43, %v7617_v47  ;;  %v3392_v21 = vmul.f32 %v7789_v43, %v7620_v13  ;;  %v4388_v45 = vpop.eup %4387  ;;  %v3461_v47 = vmul.f32 %v4376_v63, %v7713_v30  ;;  %v3524_v13 = vmul.f32 %v4380_v5, %v7717_v22 }
 0xb79   : > { %v4390_v3 = vpop.eup %4389  ;;  %v3545_v0 = vmul.f32 %v4386_v9, %v7728_v59  ;;  %v3406_v63 = vmul.f32 %v7789_v43, %v7698_v11  ;;  %v3403_v40 = vmul.f32 %v7789_v43, %v7684_v32  ;;  %v3404_v5 = vmul.f32 %v7789_v43, %v7689_v27 }
 0xb7a   : > { %v3405_v2 = vmul.f32 %v7789_v43, %v7694_v24  ;;  %v3393_v46 = vmul.f32 %v7789_v43, %v7625_v29  ;;  %v3407_v55 = vadd.f32 %v3391_v41, %v7551_v36  ;;  %v3408_v62 = vadd.f32 %v3392_v21, %v7557_v52  ;;  %v4392_v52 = vpop.eup %4391 }
 0xb7b   : > { %v3459_v9 = vsel %vm3457_vm5, %v3458_v35, %v3456_v10  ;;  %v3463_v32 = vsel %vm3462_vm6, %v7713_v30, %v3461_v47  ;;  %v3468_v27 = vmul.f32 %v4388_v45, %v7732_v51  ;;  %v3475_v24 = vmul.f32 %v4390_v3, %v7736_v31  ;;  %v4394_v10 = vpop.eup %4393 }
 0xb7c   : > { %v3526_v36 = vsel %vm3525_vm7, %v7717_v22, %v3524_v13  ;;  %v3394_v29 = vmul.f32 %v7789_v43, %v7632_v53  ;;  %v3533_v11 = vsel %vm3532_vm8, %v7720_v44, %v3531_v39  ;;  %v3540_v56 = vsel %vm3539_vm10, %v7724_v42, %v3538_v33  ;;  %v4396_v33 = vpop.eup %4395 }
 0xb7d   : > { %v3547_v35 = vsel %vm3546_vm9, %v7728_v59, %v3545_v0  ;;  %v3419_v41 = vadd.f32 %v3403_v40, %v7590_v25  ;;  %v3420_v53 = vadd.f32 %v3404_v5, %v7599_v6  ;;  %v3421_v21 = vadd.f32 %v3405_v2, %v7596_v58 }
 0xb7e   : > { %v3422_v45 = vadd.f32 %v3406_v63, %v7602_v14  ;;  %v3395_v47 = vmul.f32 %v7789_v43, %v7638_v34  ;;  %v3409_v13 = vadd.f32 %v3393_v46, %v7554_v15  ;;  %vm3490_vm5 = vcmp.eq.f32.partialorder %v7744_v28, inf  ;;  %v4398_v34 = vpop.eup %4397 }
 0xb7f   : > { %v3551_v3 = vmul.f32 %v3445_v54, %v3407_v55  ;;  %v3552_v39 = vmul.f32 %v3452_v17, %v3408_v62  ;;  %v3470_v25 = vsel %vm3469_vm11, %v7732_v51, %v3468_v27  ;;  %v3482_v58 = vmul.f32 %v4392_v52, %v7741_v20  ;;  %v4400_v63 = vpop.eup %4399 }
 0xb80   : > { %v8394_v6 = vand.u32 2147483648, %v7717_v22  ;;  %v8395_v15 = vand.u32 2147483648, %v7720_v44  ;;  %v3396_v54 = vmul.f32 %v7789_v43, %v7644_v61  ;;  %v3410_v2 = vadd.f32 %v3394_v29, %v7563_v1  ;;  %v4402_v1 = vpop.eup %4401 }
 0xb81   : > { %vm3485_vm6 = vcmp.eq.f32.partialorder %v7741_v20, 0.0  ;;  %v3543_v17 = vsel %vm3541_vm14, %v3542_v48, %v3540_v56  ;;  %v8396_v0 = vand.u32 2147483648, %v7728_v59  ;;  %v3397_v55 = vmul.f32 %v7789_v43, %v7651_v4 }
 0xb82   : > { %v3529_v14 = vsel %vm3527_vm12, %v8394_v6, %v3526_v36  ;;  %v3536_v46 = vsel %vm3534_vm13, %v8395_v15, %v3533_v11  ;;  %v7893_v5 = vmul.f32 %v3543_v17, %v3421_v21  ;;  %v3411_v42 = vadd.f32 %v3395_v47, %v7560_v60 }
 0xb83   : > { %v3550_v22 = vsel %vm3548_vm15, %v8396_v0, %v3547_v35  ;;  %v7889_v40 = vmul.f32 %v3529_v14, %v3419_v41  ;;  %v7891_v44 = vmul.f32 %v3536_v46, %v3420_v53  ;;  %vm3492_vm7 = vcmp.eq.f32.partialorder %v7744_v28, 0.0  ;;  %v8401_v46 = vld [vmem:[#allocation48_spill] sm:$0xff] }
 0xb84   : > { %v7895_v61 = vmul.f32 %v3550_v22, %v3422_v45  ;;  %v3553_v48 = vmul.f32 %v3459_v9, %v3409_v13  ;;  %v3567_v59 = vadd.f32 %v3552_v39, %v3551_v3  ;;  %v8397_v62 = vand.u32 2147483648, %v7713_v30 }
 0xb85   : > { %v3477_v36 = vsel %vm3476_vm1, %v7736_v31, %v3475_v24  ;;  %v3489_v52 = vmul.f32 %v4394_v10, %v7744_v28  ;;  %v3493_v29 = vand.u32 2147483648, %v7744_v28  ;;  %v3398_v60 = vmul.f32 %v7789_v43, %v7656_v7 }
 0xb86   : > { %v3466_v27 = vsel %vm3464_vm0, %v8397_v62, %v3463_v32  ;;  %v3412_v4 = vadd.f32 %v3396_v54, %v7569_v49  ;;  %v3568_v11 = vadd.f32 %v3567_v59, %v3553_v48  ;;  %v8398_v56 = vand.u32 2147483648, %v7732_v51 }
 0xb87   : > { %v3554_v9 = vmul.f32 %v3466_v27, %v3410_v2  ;;  %v3484_v32 = vsel %vm3483_vm3, %v7741_v20, %v3482_v58  ;;  %v3496_v24 = vmul.f32 %v4396_v33, %v7747_v12  ;;  %vm3497_vm8 = vcmp.eq.f32.partialorder %v7747_v12, inf  ;;  %v8402_v2 = vld [vmem:[#allocation33_spill] sm:$0xff] }
 0xb88   : > { %v3473_v30 = vsel %vm3471_vm2, %v8398_v56, %v3470_v25  ;;  %v3399_v7 = vmul.f32 %v7789_v43, %v7661_v37  ;;  %v3413_v49 = vadd.f32 %v3397_v55, %v7566_v50  ;;  %v8399_v53 = vand.u32 2147483648, %v7736_v31 }
 0xb89   : > { %v3555_v35 = vmul.f32 %v3473_v30, %v3411_v42  ;;  %v3569_v41 = vadd.f32 %v3568_v11, %v3554_v9  ;;  %v3491_v21 = vsel %vm3490_vm5, %v7744_v28, %v3489_v52  ;;  %vm3499_vm9 = vcmp.eq.f32.partialorder %v7747_v12, 0.0 }
 0xb8a   : > { %v3480_v51 = vsel %vm3478_vm4, %v8399_v53, %v3477_v36  ;;  %v3503_v45 = vmul.f32 %v4398_v34, %v7750_v18  ;;  %v3400_v37 = vmul.f32 %v7789_v43, %v7668_v38  ;;  %v3414_v50 = vadd.f32 %v3398_v60, %v7581_v57 }
 0xb8b   : > { %v3556_v10 = vmul.f32 %v3480_v51, %v3412_v4  ;;  %v3570_v47 = vadd.f32 %v3569_v41, %v3555_v35  ;;  %v8400_v13 = vand.u32 2147483648, %v7741_v20  ;;  %v3498_v3 = vsel %vm3497_vm8, %v7747_v12, %v3496_v24 }
 0xb8c   : > { %vm3504_vm10 = vcmp.eq.f32.partialorder %v7750_v18, inf  ;;  %v3510_v39 = vmul.f32 %v4400_v63, %v7753_v23  ;;  %v3401_v33 = vmul.f32 %v7789_v43, %v7674_v8  ;;  %v3415_v38 = vadd.f32 %v3399_v7, %v7578_v19 }
 0xb8d   : > { %v3487_v31 = vsel %vm3485_vm6, %v8400_v13, %v3484_v32  ;;  %v3571_v57 = vadd.f32 %v3570_v47, %v3556_v10  ;;  %v3494_v58 = vsel %vm3492_vm7, %v3493_v29, %v3491_v21  ;;  %v3500_v6 = vand.u32 2147483648, %v7747_v12  ;;  %v8403_v12 = vld [vmem:[#allocation34_spill] sm:$0xff] }
 0xb8e   : > { %v3557_v25 = vmul.f32 %v3487_v31, %v3413_v49  ;;  %v3505_v20 = vsel %vm3504_vm10, %v7750_v18, %v3503_v45  ;;  %v3517_v14 = vmul.f32 %v4402_v1, %v7757_v26  ;;  %v3402_v15 = vmul.f32 %v7789_v43, %v7679_v16 }
 0xb8f   : > { %v3416_v34 = vadd.f32 %v3400_v37, %v8401_v46  ;;  %v3558_v54 = vmul.f32 %v3494_v58, %v3414_v50  ;;  %v3501_v19 = vsel %vm3499_vm9, %v3500_v6, %v3498_v3  ;;  %vm3506_vm11 = vcmp.eq.f32.partialorder %v7750_v18, 0.0 }
 0xb90   : > { %v3572_v8 = vadd.f32 %v3571_v57, %v3557_v25  ;;  %v3507_v28 = vand.u32 2147483648, %v7750_v18  ;;  %vm3511_vm12 = vcmp.eq.f32.partialorder %v7753_v23, inf  ;;  %v3417_v17 = vadd.f32 %v3401_v33, %v8402_v2 }
 0xb91   : > { %v3512_v0 = vsel %vm3511_vm12, %v7753_v23, %v3510_v39  ;;  %v3559_v22 = vmul.f32 %v3501_v19, %v3415_v38  ;;  %vm3513_vm13 = vcmp.eq.f32.partialorder %v7753_v23, 0.0  ;;  %v3514_v43 = vand.u32 2147483648, %v7753_v23 }
 0xb92   : > { %v3573_v63 = vadd.f32 %v3572_v8, %v3558_v54  ;;  %v3508_v16 = vsel %vm3506_vm11, %v3507_v28, %v3505_v20  ;;  %vm3518_vm14 = vcmp.eq.f32.partialorder %v7757_v26, inf  ;;  %v3418_v1 = vadd.f32 %v3402_v15, %v8403_v12 }
 0xb93   : > { %v3519_v55 = vsel %vm3518_vm14, %v7757_v26, %v3517_v14  ;;  %v3560_v18 = vmul.f32 %v3508_v16, %v3416_v34  ;;  %v3515_v48 = vsel %vm3513_vm13, %v3514_v43, %v3512_v0  ;;  %v3521_v59 = vand.u32 2147483648, %v7757_v26 }
 0xb94   : > { %v3574_v42 = vadd.f32 %v3573_v63, %v3559_v22  ;;  %vm3520_vm15 = vcmp.eq.f32.partialorder %v7757_v26, 0.0  ;;  %v3561_v62 = vmul.f32 %v3515_v48, %v3417_v17  ;;  %vm3592_vm0 = vcmask 0  }
 0xb95   : > { %v3522_v36 = vsel %vm3520_vm15, %v3521_v59, %v3519_v55 }
 0xb96   : > { %v3575_v27 = vadd.f32 %v3574_v42, %v3560_v18  ;;  %v3562_v52 = vmul.f32 %v3522_v36, %v3418_v1 }
 0xb98   : > { %v3576_v29 = vadd.f32 %v3575_v27, %v3561_v62 }
 0xb9a   : > { %v3577_v23 = vadd.f32 %v3576_v29, %v3562_v52 }
 0xb9c   : > { %v3578_v60 = vadd.f32 %v3577_v23, %v7889_v40 }
 0xb9e   : > { %v3579_v4 = vadd.f32 %v3578_v60, %v7891_v44 }
 0xba0   : > { %v3580_v9 = vadd.f32 %v3579_v4, %v7893_v5 }
 0xba2   : > { %v3581_v11 = vadd.f32 %v3580_v9, %v7895_v61 }
 0xba4   : > { %3582 = vadd.xlane.f32.xlu0 %v3581_v11 }
 0xc31   : > { %v3583_v56 = vpop.xlane.xlu0 %3582 }
 0xc32   : > { %v3584_v30 = vrot.slane %v3583_v56, 4 }
 0xc34   : > { %v3585_v32 = vadd.f32 %v3584_v30, %v3583_v56 }
 0xc36   : > { %v3586_v26 = vrot.slane %v3585_v32, 2 }
 0xc38   : > { %v3587_v24 = vadd.f32 %v3586_v26, %v3585_v32 }
 0xc3a   : > { %v3588_v7 = vrot.slane %v3587_v24, 1 }
 0xc3c   : > { %v3589_v49 = vadd.f32 %v3588_v7, %v3587_v24 }
 0xc3e   : > { %3664 = vpush %v3589_v49 }
 0xc6f   : > { %s3665_s22 = spop %3664 }
 0xc70   : > { %v3591_v40 = vstv %s3665_s22 }
 0xc71   : > { %3593 = vst.msk [vmem:[%s156_s21] sm:$0x1] %vm3592_vm0, %v3591_v40 }
 0xc72 PF: > { %s12_s9 = sadd.s32 1, %s4409_s9  }
 0xc73   : > { %p9_p4 = scmp.ge.s32.totalorder %s12_s9, 4  }
 0xc75   :  { %11 = sbr.rel (!%p9_p4) target bundleno = 1 (0x1), region = 61 }

</bundles_post_ra>
